<compile_context>
chip_gen: v6e
topology: v6e:2x2x1
jax: 0.10.0
libtpu: 0.0.40
codegen_flags: <defaults>
</compile_context>

<pallas_src>
import functools
import math

import jax
import jax.numpy as jnp
from jax import lax
from jax.experimental import pallas as pl
from jax.experimental.pallas import tpu as pltpu


_MAX_TILE_T = 16      # timesteps per grid step (fully unrolled inside the kernel)


def _round_up(x, m):
    return ((x + m - 1) // m) * m


# ----------------------------------------------------------------------------
# Fused stacked-LSTM Pallas kernel (pack_padded_sequence semantics).
#
# Args (per grid step over time chunks):
#   maxlen_ref : (1,) int32 SMEM (scalar prefetch)  -- max sequence length
#   len_ref    : (Bp, 1) int32 VMEM                 -- per-sequence lengths
#   gx_ref     : (tile_t, Bp, 4Hp) f32              -- hoisted layer-0 gate inputs
#   refs       : whh_0..L-1 (Hp,4Hp) bf16, wih_1..L-1 (Hp,4Hp) bf16, b_1..L-1 (1,4Hp) f32,
#                then outputs hf (L,Bp,Hp) f32, cf (L,Bp,Hp) f32 (VMEM-resident state).
# ----------------------------------------------------------------------------
def _stacked_lstm_kernel(maxlen_ref, len_ref, gx_ref, *refs, n_layers, tile_t):
    whh_refs = refs[:n_layers]
    wih_refs = refs[n_layers:2 * n_layers - 1]
    b_refs = refs[2 * n_layers - 1:3 * n_layers - 2]
    hf_ref = refs[3 * n_layers - 2]
    cf_ref = refs[3 * n_layers - 1]

    hid_p = hf_ref.shape[-1]
    chunk = pl.program_id(0)

    @pl.when(chunk == 0)
    def _init():
        hf_ref[...] = jnp.zeros_like(hf_ref)
        cf_ref[...] = jnp.zeros_like(cf_ref)

    # Skip chunks that start past the longest sequence (fully padded time tail).
    @pl.when(chunk * tile_t < maxlen_ref[0])
    def _compute():
        lengths = len_ref[...]                            # (Bp, 1) int32

        def sigm(z):                                      # one EUP push per gate
            return 0.5 * jnp.tanh(0.5 * z) + 0.5

        def cell(gin, h, c, whh_ref, valid):
            gates = gin + jnp.dot(h.astype(whh_ref.dtype), whh_ref[...],
                                  preferred_element_type=jnp.float32)
            i_g = sigm(gates[:, 0 * hid_p:1 * hid_p])     # 128-lane-aligned slices
            f_g = sigm(gates[:, 1 * hid_p:2 * hid_p])
            g_g = jnp.tanh(gates[:, 2 * hid_p:3 * hid_p])
            o_g = sigm(gates[:, 3 * hid_p:4 * hid_p])
            c_new = f_g * c + i_g * g_g
            h_new = o_g * jnp.tanh(c_new)
            # packed-sequence semantics: state frozen once t >= length
            return jnp.where(valid, h_new, h), jnp.where(valid, c_new, c)

        def step(j, carry):
            hs, cs = carry
            t = chunk * tile_t + j
            valid = lengths > t
            gin = gx_ref[j]                               # hoisted x-projection (layer 0)
            new_hs, new_cs = [], []
            for l in range(n_layers):
                if l > 0:
                    gin = (jnp.dot(new_hs[l - 1].astype(wih_refs[l - 1].dtype),
                                   wih_refs[l - 1][...],
                                   preferred_element_type=jnp.float32)
                           + b_refs[l - 1][...])
                h_l, c_l = cell(gin, hs[l], cs[l], whh_refs[l], valid)
                new_hs.append(h_l)
                new_cs.append(c_l)
            return tuple(new_hs), tuple(new_cs)

        init = (tuple(hf_ref[l] for l in range(n_layers)),
                tuple(cf_ref[l] for l in range(n_layers)))
        hs, cs = lax.fori_loop(0, tile_t, step, init, unroll=True)
        for l in range(n_layers):
            hf_ref[l] = hs[l]
            cf_ref[l] = cs[l]


# ----------------------------------------------------------------------------
# Wrapper: run a stacked LSTM and return the final (h, c) per layer.
# ----------------------------------------------------------------------------
def stacked_lstm_final_state(x, lengths, prep):
    """x: (T, B, Din) f32; lengths: (B,) int32. Returns h, c: (n_layers, B, hidden)."""
    (wih0_t, b0, whh_ts, wih_ts, biases), (hidden, hid_p, n_layers) = prep
    seq_t, batch, in_dim = x.shape

    batch_p = _round_up(batch, 8)
    tile_t = min(seq_t, _MAX_TILE_T)
    n_chunks = (seq_t + tile_t - 1) // tile_t
    seq_t_p = n_chunks * tile_t

    # ---- hoisted layer-0 input projection: ONE (T*B, Din) x (Din, 4Hp) matmul ----
    gx = jnp.dot(x.reshape(seq_t * batch, in_dim), wih0_t,
                 preferred_element_type=jnp.float32) + b0
    gx = gx.reshape(seq_t, batch, 4 * hid_p)
    gx = jnp.pad(gx, ((0, seq_t_p - seq_t), (0, batch_p - batch), (0, 0)))

    lens = jnp.pad(lengths.astype(jnp.int32), (0, batch_p - batch)).reshape(batch_p, 1)
    max_len = jnp.max(lens).reshape(1).astype(jnp.int32)   # scalar prefetch (SMEM)

    weight_args = list(whh_ts) + list(wih_ts) + list(biases)
    # NOTE: every index_map takes (grid_i, maxlen_ref) because of num_scalar_prefetch=1.
    in_specs = [
        pl.BlockSpec((batch_p, 1), lambda i, ml: (0, 0)),                     # lengths
        pl.BlockSpec((tile_t, batch_p, 4 * hid_p), lambda i, ml: (i, 0, 0)),  # gate inputs
    ]
    # TODO(synk): for large hidden sizes add pipeline_mode=pl.Buffered(1) on the weight
    # specs below (constant index_map -> double-buffering is pure VMEM waste).
    for _ in whh_ts:
        in_specs.append(pl.BlockSpec((hid_p, 4 * hid_p), lambda i, ml: (0, 0)))
    for _ in wih_ts:
        in_specs.append(pl.BlockSpec((hid_p, 4 * hid_p), lambda i, ml: (0, 0)))
    for _ in biases:
        in_specs.append(pl.BlockSpec((1, 4 * hid_p), lambda i, ml: (0, 0)))

    out_specs = (pl.BlockSpec((n_layers, batch_p, hid_p), lambda i, ml: (0, 0, 0)),
                 pl.BlockSpec((n_layers, batch_p, hid_p), lambda i, ml: (0, 0, 0)))
    out_shape = (jax.ShapeDtypeStruct((n_layers, batch_p, hid_p), jnp.float32),
                 jax.ShapeDtypeStruct((n_layers, batch_p, hid_p), jnp.float32))

    # explicit VMEM budget: dbl-buffered gx chunk + (dbl-buffered) weights + state
    nbytes = lambda a: int(a.size) * a.dtype.itemsize
    vmem_bytes = (2 * tile_t * batch_p * 4 * hid_p * 4
                  + 2 * sum(nbytes(a) for a in weight_args)
                  + 2 * batch_p * 4
                  + 2 * 2 * n_layers * batch_p * hid_p * 4)
    vmem_limit = int(min(max(2 * vmem_bytes, 4 << 20), 48 << 20))

    kernel = functools.partial(_stacked_lstm_kernel,
                               n_layers=n_layers, tile_t=tile_t)

    hf, cf = pl.pallas_call(
        kernel,
        out_shape=out_shape,
        grid_spec=pltpu.PrefetchScalarGridSpec(
            num_scalar_prefetch=1,
            grid=(n_chunks,),
            in_specs=in_specs,
            out_specs=out_specs,
        ),
        compiler_params=pltpu.CompilerParams(
            dimension_semantics=("arbitrary",),       # serial time recurrence
            vmem_limit_bytes=vmem_limit),
    )(max_len, lens, gx, *weight_args)

    # TODO(synk): on v7x, split the (independent) batch across the 2 TensorCores via a
    # leading "parallel" grid axis once batch_p >= 16.
    return hf[:, :batch, :hidden], cf[:, :batch, :hidden]


# ----------------------------------------------------------------------------
# Parameter init (PyTorch-LSTM layout) and lane-dense padded / pre-transposed prep.
# ----------------------------------------------------------------------------
def init_lstm_params(key, input_dim, hidden, n_layers):
    """Deterministic torch-style init: uniform(+-1/sqrt(H)), gate order i,f,g,o."""
    raw = []
    d = input_dim
    s = 1.0 / math.sqrt(hidden)
    for _ in range(n_layers):
        key, k1, k2, k3, k4 = jax.random.split(key, 5)
        w_ih = jax.random.uniform(k1, (4 * hidden, d), jnp.float32, -s, s)
        w_hh = jax.random.uniform(k2, (4 * hidden, hidden), jnp.float32, -s, s)
        b_ih = jax.random.uniform(k3, (4 * hidden,), jnp.float32, -s, s)
        b_hh = jax.random.uniform(k4, (4 * hidden,), jnp.float32, -s, s)
        raw.append((w_ih, w_hh, b_ih, b_hh))
        d = hidden
    return raw, key


def _pad_gates_t(w, hidden, hid_p, in_dim, in_p, dtype):
    """(4H, Din) torch layout -> per-gate zero-padded, transposed (in_p, 4*hid_p)."""
    w4 = w.reshape(4, hidden, in_dim)
    w4 = jnp.pad(w4, ((0, 0), (0, hid_p - hidden), (0, in_p - in_dim)))
    return jnp.transpose(w4.reshape(4 * hid_p, in_p), (1, 0)).astype(dtype)


def _pad_bias(b_ih, b_hh, hidden, hid_p):
    b = (b_ih + b_hh).reshape(4, hidden)
    return jnp.pad(b, ((0, 0), (0, hid_p - hidden))).reshape(1, 4 * hid_p)


def prep_lstm_params(raw, hidden):
    """Pad to lane-dense tiles (hid_p = multiple of 128), pre-transpose, store the
    recurrent matmul operands as bf16 (f32 accumulate in-kernel). Zero padding is
    state-preserving, so results are exact after slicing back to (hidden)."""
    n_layers = len(raw)
    hid_p = _round_up(hidden, 128)
    w_ih0, _, b_ih0, b_hh0 = raw[0]
    in0 = w_ih0.shape[1]
    # layer-0 input projection runs outside the kernel: keep f32, no input-dim padding
    wih0_t = jnp.transpose(w_ih0.reshape(4, hidden, in0), (2, 0, 1))
    wih0_t = jnp.pad(wih0_t, ((0, 0), (0, 0), (0, hid_p - hidden))).reshape(in0, 4 * hid_p)
    b0 = _pad_bias(b_ih0, b_hh0, hidden, hid_p)
    whh_ts = tuple(_pad_gates_t(raw[l][1], hidden, hid_p, hidden, hid_p, jnp.bfloat16)
                   for l in range(n_layers))
    wih_ts = tuple(_pad_gates_t(raw[l][0], hidden, hid_p, hidden, hid_p, jnp.bfloat16)
                   for l in range(1, n_layers))
    biases = tuple(_pad_bias(raw[l][2], raw[l][3], hidden, hid_p)
                   for l in range(1, n_layers))
    return (wih0_t, b0, whh_ts, wih_ts, biases), (hidden, hid_p, n_layers)


# ----------------------------------------------------------------------------
# ConditionEncoder forward (fully static-shaped, jit-able glue around the kernels).
# ----------------------------------------------------------------------------
def condition_encoder_forward(prefix, seq_len, window_len, branch_prep, path_prep):
    """prefix: (bs, wind_l, seq_l, D) f32; seq_len: (bs, wind_l) int; window_len: (bs,) int.
    Returns (h_path, c_path): (path_layers, bs, path_hidden)."""
    n_ex, wind_l, seq_l, in_dim = prefix.shape
    _, (branch_hidden, _, branch_layers) = branch_prep

    # ---- branch encoder over ALL (example, window) slots with static shapes.
    # Slots past window_len run with length 0 -> their final (h, c) stay exactly 0,
    # reproducing torch's zero-initialised all_hidden with no host-value gathers. ----
    n_branch = n_ex * wind_l
    x_branch = jnp.transpose(prefix.reshape(n_branch, seq_l, in_dim), (1, 0, 2))
    slot_valid = (jnp.arange(wind_l, dtype=jnp.int32)[None, :]
                  < window_len.astype(jnp.int32)[:, None])
    lens_branch = jnp.where(slot_valid, seq_len.astype(jnp.int32), 0).reshape(n_branch)

    h_b, c_b = stacked_lstm_final_state(x_branch, lens_branch, branch_prep)

    # per slot: [h_l0..h_l{L-1}, c_l0..c_l{L-1}] — matches torch cat + transpose + reshape
    hidden_seq = jnp.concatenate([h_b, c_b], axis=0)          # (2*Lb, n_branch, Hb)
    all_hidden = jnp.transpose(hidden_seq, (1, 0, 2)).reshape(
        n_ex, wind_l, 2 * branch_layers * branch_hidden)

    # ---- path LSTM over the window axis (packed == masked by window_len) ----
    x_path = jnp.transpose(all_hidden, (1, 0, 2))             # (wind_l, bs, inter_dim)
    h_p, c_p = stacked_lstm_final_state(x_path, window_len.astype(jnp.int32), path_prep)
    # TODO(synk): nn.LSTM inter-layer dropout (train-mode only) is not applied;
    # this implements deterministic inference semantics.
    return h_p, c_p


# ----------------------------------------------------------------------------
# Pure-JAX f32 reference (torch semantics) for correctness checking.
# ----------------------------------------------------------------------------
def _lstm_ref(x, lengths, raw, hidden):
    seq_t, batch, _ = x.shape
    n_layers = len(raw)
    hs = [jnp.zeros((batch, hidden), jnp.float32) for _ in range(n_layers)]
    cs = [jnp.zeros((batch, hidden), jnp.float32) for _ in range(n_layers)]
    for t in range(seq_t):
        valid = (lengths > t)[:, None]
        inp = x[t]
        for l, (w_ih, w_hh, b_ih, b_hh) in enumerate(raw):
            g = inp @ w_ih.T + b_ih + hs[l] @ w_hh.T + b_hh
            i_g = jax.nn.sigmoid(g[:, 0 * hidden:1 * hidden])
            f_g = jax.nn.sigmoid(g[:, 1 * hidden:2 * hidden])
            g_g = jnp.tanh(g[:, 2 * hidden:3 * hidden])
            o_g = jax.nn.sigmoid(g[:, 3 * hidden:4 * hidden])
            c_new = f_g * cs[l] + i_g * g_g
            h_new = o_g * jnp.tanh(c_new)
            hs[l] = jnp.where(valid, h_new, hs[l])
            cs[l] = jnp.where(valid, c_new, cs[l])
            inp = hs[l]
    return jnp.stack(hs), jnp.stack(cs)


def _condition_encoder_ref(prefix, seq_len, window_len, raw_branch, raw_path,
                           branch_hidden, path_hidden):
    bs, wind_l, seq_l, in_dim = prefix.shape
    lb = len(raw_branch)
    x_branch = jnp.transpose(prefix.reshape(bs * wind_l, seq_l, in_dim), (1, 0, 2))
    slot_valid = (jnp.arange(wind_l, dtype=jnp.int32)[None, :]
                  < window_len.astype(jnp.int32)[:, None])
    lens = jnp.where(slot_valid, seq_len.astype(jnp.int32), 0).reshape(bs * wind_l)
    h_b, c_b = _lstm_ref(x_branch, lens, raw_branch, branch_hidden)
    hidden_seq = jnp.concatenate([h_b, c_b], axis=0)
    all_hidden = jnp.transpose(hidden_seq, (1, 0, 2)).reshape(
        bs, wind_l, 2 * lb * branch_hidden)
    x_path = jnp.transpose(all_hidden, (1, 0, 2))
    return _lstm_ref(x_path, window_len.astype(jnp.int32), raw_path, path_hidden)


if __name__ == "__main__":
    key = jax.random.PRNGKey(0)

    # small shapes consistent with the module
    bs, wind_l, seq_l, input_dim = 2, 4, 6, 8
    branch_hidden, branch_layers = 16, 1
    path_hidden, path_layers = 32, 2
    inter_dim = branch_layers * branch_hidden * 2

    key, kx = jax.random.split(key)
    prefix = jax.random.normal(kx, (bs, wind_l, seq_l, input_dim), jnp.float32)
    seq_len = jnp.array([[6, 4, 3, 2],
                         [5, 2, 1, 1]], dtype=jnp.int32)      # per-branch lengths
    window_len = jnp.array([3, 2], dtype=jnp.int32)           # per-example windows

    raw_branch, key = init_lstm_params(key, input_dim, branch_hidden, branch_layers)
    raw_path, key = init_lstm_params(key, inter_dim, path_hidden, path_layers)
    branch_prep = prep_lstm_params(raw_branch, branch_hidden)
    path_prep = prep_lstm_params(raw_path, path_hidden)

    fwd = jax.jit(functools.partial(condition_encoder_forward,
                                    branch_prep=branch_prep, path_prep=path_prep))
    h_path, c_path = fwd(prefix, seq_len, window_len)
    h_path = jax.block_until_ready(h_path)
    c_path = jax.block_until_ready(c_path)

    assert h_path.shape == (path_layers, bs, path_hidden), h_path.shape
    assert c_path.shape == (path_layers, bs, path_hidden), c_path.shape
    assert bool(jnp.all(jnp.isfinite(h_path))) and bool(jnp.all(jnp.isfinite(c_path)))

    # numeric check against a pure-JAX f32 reference (bf16 recurrent weights in-kernel
    # => loose-but-meaningful tolerance; structural bugs would be O(0.1-1))
    h_ref, c_ref = _condition_encoder_ref(prefix, seq_len, window_len,
                                          raw_branch, raw_path,
                                          branch_hidden, path_hidden)
    err = max(float(jnp.max(jnp.abs(h_path - h_ref))),
              float(jnp.max(jnp.abs(c_path - c_ref))))
    assert err < 5e-2, f"kernel/reference mismatch: max abs err = {err}"

    print("KERNEL_OK")
</pallas_src>

<mosaic_0001>
module attributes {stable_mosaic.version = 11 : i64} {
  func.func @_stacked_lstm_kernel(%arg0: i32, %arg1: memref<1xi32, #tpu.memory_space<smem>>, %arg2: memref<8x1xi32, #tpu.memory_space<vmem>>, %arg3: memref<6x8x512xf32, #tpu.memory_space<vmem>>, %arg4: memref<128x512xbf16, #tpu.memory_space<vmem>>, %arg5: memref<1x8x128xf32, #tpu.memory_space<vmem>>, %arg6: memref<1x8x128xf32, #tpu.memory_space<vmem>>) attributes {dimension_semantics = [#tpu.dimension_semantics<arbitrary>], iteration_bounds = array<i64: 1>, scalar_prefetch = 1 : i64, scratch_operands = 0 : i64, tpu.core_type = #tpu.core_type<tc>, window_params = [{pipeline_mode = #tpu.pipeline_mode<synchronous>, transform_indices = @transform_0, window_bounds = array<i64: 8, 1>}, {transform_indices = @transform_1, window_bounds = array<i64: 6, 8, 512>}, {pipeline_mode = #tpu.pipeline_mode<synchronous>, transform_indices = @transform_2, window_bounds = array<i64: 128, 512>}, {pipeline_mode = #tpu.pipeline_mode<synchronous>, transform_indices = @transform_3, window_bounds = array<i64: 1, 8, 128>}, {pipeline_mode = #tpu.pipeline_mode<synchronous>, transform_indices = @transform_4, window_bounds = array<i64: 1, 8, 128>}]} {
    %c0_i32 = arith.constant 0 : i32
    %0 = arith.cmpi eq, %arg0, %c0_i32 : i32
    %1 = arith.extui %0 : i1 to i32
    %c0_i32_0 = arith.constant 0 : i32
    %2 = arith.cmpi ne, %1, %c0_i32_0 : i32
    scf.if %2 {
      %cst = arith.constant 0.000000e+00 : f32
      %8 = vector.broadcast %cst : f32 to vector<1x8x128xf32>
      %c0_2 = arith.constant 0 : index
      %c0_3 = arith.constant 0 : index
      %c0_4 = arith.constant 0 : index
      %9 = vector.load %arg5[%c0_2, %c0_3, %c0_4] : memref<1x8x128xf32, #tpu.memory_space<vmem>>, vector<1x8x128xf32>
      tpu.vector_store %arg5[%c0_2, %c0_3, %c0_4], %8 {strides = array<i32>} : memref<1x8x128xf32, #tpu.memory_space<vmem>>, vector<1x8x128xf32>,
      %cst_5 = arith.constant 0.000000e+00 : f32
      %10 = vector.broadcast %cst_5 : f32 to vector<1x8x128xf32>
      %c0_6 = arith.constant 0 : index
      %c0_7 = arith.constant 0 : index
      %c0_8 = arith.constant 0 : index
      %11 = vector.load %arg6[%c0_6, %c0_7, %c0_8] : memref<1x8x128xf32, #tpu.memory_space<vmem>>, vector<1x8x128xf32>
      tpu.vector_store %arg6[%c0_6, %c0_7, %c0_8], %10 {strides = array<i32>} : memref<1x8x128xf32, #tpu.memory_space<vmem>>, vector<1x8x128xf32>,
    } else {
    }
    %c6_i32 = arith.constant 6 : i32
    %3 = arith.muli %arg0, %c6_i32 : i32
    %c0 = arith.constant 0 : index
    %4 = memref.load %arg1[%c0] : memref<1xi32, #tpu.memory_space<smem>>
    %5 = arith.cmpi slt, %3, %4 : i32
    %6 = arith.extui %5 : i1 to i32
    %c0_i32_1 = arith.constant 0 : i32
    %7 = arith.cmpi ne, %6, %c0_i32_1 : i32
    scf.if %7 {
      %c0_2 = arith.constant 0 : index
      %c0_3 = arith.constant 0 : index
      %8 = vector.load %arg2[%c0_2, %c0_3] : memref<8x1xi32, #tpu.memory_space<vmem>>, vector<8x1xi32>
      %c0_4 = arith.constant 0 : index
      %c0_5 = arith.constant 0 : index
      %c0_6 = arith.constant 0 : index
      %9 = vector.load %arg5[%c0_4, %c0_5, %c0_6] : memref<1x8x128xf32, #tpu.memory_space<vmem>>, vector<1x8x128xf32>
      %10 = vector.shape_cast %9 : vector<1x8x128xf32> to vector<8x128xf32>
      %c0_7 = arith.constant 0 : index
      %c0_8 = arith.constant 0 : index
      %c0_9 = arith.constant 0 : index
      %11 = vector.load %arg6[%c0_7, %c0_8, %c0_9] : memref<1x8x128xf32, #tpu.memory_space<vmem>>, vector<1x8x128xf32>
      %12 = vector.shape_cast %11 : vector<1x8x128xf32> to vector<8x128xf32>
      %c0_i32_10 = arith.constant 0 : i32
      %c6_i32_11 = arith.constant 6 : i32
      %13 = arith.muli %arg0, %c6_i32_11 : i32
      %14 = arith.addi %13, %c0_i32_10 : i32
      %15 = vector.broadcast %14 : i32 to vector<8x1xi32>
      %16 = arith.cmpi sgt, %8, %15 : vector<8x1xi32>
      %17 = arith.index_cast %c0_i32_10 : i32 to index
      %c0_12 = arith.constant 0 : index
      %c0_13 = arith.constant 0 : index
      %18 = vector.load %arg3[%17, %c0_12, %c0_13] : memref<6x8x512xf32, #tpu.memory_space<vmem>>, vector<1x8x512xf32>
      %19 = vector.shape_cast %18 : vector<1x8x512xf32> to vector<8x512xf32>
      %20 = arith.truncf %10 : vector<8x128xf32> to vector<8x128xbf16>
      %c0_14 = arith.constant 0 : index
      %c0_15 = arith.constant 0 : index
      %21 = vector.load %arg4[%c0_14, %c0_15] : memref<128x512xbf16, #tpu.memory_space<vmem>>, vector<128x512xbf16>
      %cst = arith.constant dense<0.000000e+00> : vector<8x512xf32>
      %22 = tpu.matmul %20, %21, %cst {dimension_numbers = #tpu.dot_dimension_numbers<[1], [0], [0], [1], [0, 0, 1, 1], [], []>} : vector<8x128xbf16>, vector<128x512xbf16>, vector<8x512xf32> -> vector<8x512xf32>
      %23 = arith.addf %19, %22 : vector<8x512xf32>
      %24 = vector.extract_strided_slice %23 {offsets = [0, 0], sizes = [8, 128], strides = [1, 1]} : vector<8x512xf32> to vector<8x128xf32>
      %cst_16 = arith.constant 5.000000e-01 : f32
      %25 = vector.broadcast %cst_16 : f32 to vector<8x128xf32>
      %26 = arith.mulf %25, %24 : vector<8x128xf32>
      %27 = math.tanh %26 : vector<8x128xf32>
      %cst_17 = arith.constant 5.000000e-01 : f32
      %28 = vector.broadcast %cst_17 : f32 to vector<8x128xf32>
      %29 = arith.mulf %28, %27 : vector<8x128xf32>
      %cst_18 = arith.constant 5.000000e-01 : f32
      %30 = vector.broadcast %cst_18 : f32 to vector<8x128xf32>
      %31 = arith.addf %29, %30 : vector<8x128xf32>
      %32 = vector.extract_strided_slice %23 {offsets = [0, 128], sizes = [8, 128], strides = [1, 1]} : vector<8x512xf32> to vector<8x128xf32>
      %cst_19 = arith.constant 5.000000e-01 : f32
      %33 = vector.broadcast %cst_19 : f32 to vector<8x128xf32>
      %34 = arith.mulf %33, %32 : vector<8x128xf32>
      %35 = math.tanh %34 : vector<8x128xf32>
      %cst_20 = arith.constant 5.000000e-01 : f32
      %36 = vector.broadcast %cst_20 : f32 to vector<8x128xf32>
      %37 = arith.mulf %36, %35 : vector<8x128xf32>
      %cst_21 = arith.constant 5.000000e-01 : f32
      %38 = vector.broadcast %cst_21 : f32 to vector<8x128xf32>
      %39 = arith.addf %37, %38 : vector<8x128xf32>
      %40 = vector.extract_strided_slice %23 {offsets = [0, 256], sizes = [8, 128], strides = [1, 1]} : vector<8x512xf32> to vector<8x128xf32>
      %41 = math.tanh %40 : vector<8x128xf32>
      %42 = vector.extract_strided_slice %23 {offsets = [0, 384], sizes = [8, 128], strides = [1, 1]} : vector<8x512xf32> to vector<8x128xf32>
      %cst_22 = arith.constant 5.000000e-01 : f32
      %43 = vector.broadcast %cst_22 : f32 to vector<8x128xf32>
      %44 = arith.mulf %43, %42 : vector<8x128xf32>
      %45 = math.tanh %44 : vector<8x128xf32>
      %cst_23 = arith.constant 5.000000e-01 : f32
      %46 = vector.broadcast %cst_23 : f32 to vector<8x128xf32>
      %47 = arith.mulf %46, %45 : vector<8x128xf32>
      %cst_24 = arith.constant 5.000000e-01 : f32
      %48 = vector.broadcast %cst_24 : f32 to vector<8x128xf32>
      %49 = arith.addf %47, %48 : vector<8x128xf32>
      %50 = arith.mulf %39, %12 : vector<8x128xf32>
      %51 = arith.mulf %31, %41 : vector<8x128xf32>
      %52 = arith.addf %50, %51 : vector<8x128xf32>
      %53 = math.tanh %52 : vector<8x128xf32>
      %54 = arith.mulf %49, %53 : vector<8x128xf32>
      %55 = vector.shape_cast %16 : vector<8x1xi1> to vector<8x1xi1>
      %56 = vector.broadcast %55 : vector<8x1xi1> to vector<8x128xi1>
      %57 = arith.select %56, %54, %10 : vector<8x128xi1>, vector<8x128xf32>
      %58 = vector.shape_cast %16 : vector<8x1xi1> to vector<8x1xi1>
      %59 = vector.broadcast %58 : vector<8x1xi1> to vector<8x128xi1>
      %60 = arith.select %59, %52, %12 : vector<8x128xi1>, vector<8x128xf32>
      %c1_i32 = arith.constant 1 : i32
      %c6_i32_25 = arith.constant 6 : i32
      %61 = arith.muli %arg0, %c6_i32_25 : i32
      %62 = arith.addi %61, %c1_i32 : i32
      %63 = vector.broadcast %62 : i32 to vector<8x1xi32>
      %64 = arith.cmpi sgt, %8, %63 : vector<8x1xi32>
      %65 = arith.index_cast %c1_i32 : i32 to index
      %c0_26 = arith.constant 0 : index
      %c0_27 = arith.constant 0 : index
      %66 = vector.load %arg3[%65, %c0_26, %c0_27] : memref<6x8x512xf32, #tpu.memory_space<vmem>>, vector<1x8x512xf32>
      %67 = vector.shape_cast %66 : vector<1x8x512xf32> to vector<8x512xf32>
      %68 = arith.truncf %57 : vector<8x128xf32> to vector<8x128xbf16>
      %c0_28 = arith.constant 0 : index
      %c0_29 = arith.constant 0 : index
      %69 = vector.load %arg4[%c0_28, %c0_29] : memref<128x512xbf16, #tpu.memory_space<vmem>>, vector<128x512xbf16>
      %cst_30 = arith.constant dense<0.000000e+00> : vector<8x512xf32>
      %70 = tpu.matmul %68, %69, %cst_30 {dimension_numbers = #tpu.dot_dimension_numbers<[1], [0], [0], [1], [0, 0, 1, 1], [], []>} : vector<8x128xbf16>, vector<128x512xbf16>, vector<8x512xf32> -> vector<8x512xf32>
      %71 = arith.addf %67, %70 : vector<8x512xf32>
      %72 = vector.extract_strided_slice %71 {offsets = [0, 0], sizes = [8, 128], strides = [1, 1]} : vector<8x512xf32> to vector<8x128xf32>
      %cst_31 = arith.constant 5.000000e-01 : f32
      %73 = vector.broadcast %cst_31 : f32 to vector<8x128xf32>
      %74 = arith.mulf %73, %72 : vector<8x128xf32>
      %75 = math.tanh %74 : vector<8x128xf32>
      %cst_32 = arith.constant 5.000000e-01 : f32
      %76 = vector.broadcast %cst_32 : f32 to vector<8x128xf32>
      %77 = arith.mulf %76, %75 : vector<8x128xf32>
      %cst_33 = arith.constant 5.000000e-01 : f32
      %78 = vector.broadcast %cst_33 : f32 to vector<8x128xf32>
      %79 = arith.addf %77, %78 : vector<8x128xf32>
      %80 = vector.extract_strided_slice %71 {offsets = [0, 128], sizes = [8, 128], strides = [1, 1]} : vector<8x512xf32> to vector<8x128xf32>
      %cst_34 = arith.constant 5.000000e-01 : f32
      %81 = vector.broadcast %cst_34 : f32 to vector<8x128xf32>
      %82 = arith.mulf %81, %80 : vector<8x128xf32>
      %83 = math.tanh %82 : vector<8x128xf32>
      %cst_35 = arith.constant 5.000000e-01 : f32
      %84 = vector.broadcast %cst_35 : f32 to vector<8x128xf32>
      %85 = arith.mulf %84, %83 : vector<8x128xf32>
      %cst_36 = arith.constant 5.000000e-01 : f32
      %86 = vector.broadcast %cst_36 : f32 to vector<8x128xf32>
      %87 = arith.addf %85, %86 : vector<8x128xf32>
      %88 = vector.extract_strided_slice %71 {offsets = [0, 256], sizes = [8, 128], strides = [1, 1]} : vector<8x512xf32> to vector<8x128xf32>
      %89 = math.tanh %88 : vector<8x128xf32>
      %90 = vector.extract_strided_slice %71 {offsets = [0, 384], sizes = [8, 128], strides = [1, 1]} : vector<8x512xf32> to vector<8x128xf32>
      %cst_37 = arith.constant 5.000000e-01 : f32
      %91 = vector.broadcast %cst_37 : f32 to vector<8x128xf32>
      %92 = arith.mulf %91, %90 : vector<8x128xf32>
      %93 = math.tanh %92 : vector<8x128xf32>
      %cst_38 = arith.constant 5.000000e-01 : f32
      %94 = vector.broadcast %cst_38 : f32 to vector<8x128xf32>
      %95 = arith.mulf %94, %93 : vector<8x128xf32>
      %cst_39 = arith.constant 5.000000e-01 : f32
      %96 = vector.broadcast %cst_39 : f32 to vector<8x128xf32>
      %97 = arith.addf %95, %96 : vector<8x128xf32>
      %98 = arith.mulf %87, %60 : vector<8x128xf32>
      %99 = arith.mulf %79, %89 : vector<8x128xf32>
      %100 = arith.addf %98, %99 : vector<8x128xf32>
      %101 = math.tanh %100 : vector<8x128xf32>
      %102 = arith.mulf %97, %101 : vector<8x128xf32>
      %103 = vector.shape_cast %64 : vector<8x1xi1> to vector<8x1xi1>
      %104 = vector.broadcast %103 : vector<8x1xi1> to vector<8x128xi1>
      %105 = arith.select %104, %102, %57 : vector<8x128xi1>, vector<8x128xf32>
      %106 = vector.shape_cast %64 : vector<8x1xi1> to vector<8x1xi1>
      %107 = vector.broadcast %106 : vector<8x1xi1> to vector<8x128xi1>
      %108 = arith.select %107, %100, %60 : vector<8x128xi1>, vector<8x128xf32>
      %c2_i32 = arith.constant 2 : i32
      %c6_i32_40 = arith.constant 6 : i32
      %109 = arith.muli %arg0, %c6_i32_40 : i32
      %110 = arith.addi %109, %c2_i32 : i32
      %111 = vector.broadcast %110 : i32 to vector<8x1xi32>
      %112 = arith.cmpi sgt, %8, %111 : vector<8x1xi32>
      %113 = arith.index_cast %c2_i32 : i32 to index
      %c0_41 = arith.constant 0 : index
      %c0_42 = arith.constant 0 : index
      %114 = vector.load %arg3[%113, %c0_41, %c0_42] : memref<6x8x512xf32, #tpu.memory_space<vmem>>, vector<1x8x512xf32>
      %115 = vector.shape_cast %114 : vector<1x8x512xf32> to vector<8x512xf32>
      %116 = arith.truncf %105 : vector<8x128xf32> to vector<8x128xbf16>
      %c0_43 = arith.constant 0 : index
      %c0_44 = arith.constant 0 : index
      %117 = vector.load %arg4[%c0_43, %c0_44] : memref<128x512xbf16, #tpu.memory_space<vmem>>, vector<128x512xbf16>
      %cst_45 = arith.constant dense<0.000000e+00> : vector<8x512xf32>
      %118 = tpu.matmul %116, %117, %cst_45 {dimension_numbers = #tpu.dot_dimension_numbers<[1], [0], [0], [1], [0, 0, 1, 1], [], []>} : vector<8x128xbf16>, vector<128x512xbf16>, vector<8x512xf32> -> vector<8x512xf32>
      %119 = arith.addf %115, %118 : vector<8x512xf32>
      %120 = vector.extract_strided_slice %119 {offsets = [0, 0], sizes = [8, 128], strides = [1, 1]} : vector<8x512xf32> to vector<8x128xf32>
      %cst_46 = arith.constant 5.000000e-01 : f32
      %121 = vector.broadcast %cst_46 : f32 to vector<8x128xf32>
      %122 = arith.mulf %121, %120 : vector<8x128xf32>
      %123 = math.tanh %122 : vector<8x128xf32>
      %cst_47 = arith.constant 5.000000e-01 : f32
      %124 = vector.broadcast %cst_47 : f32 to vector<8x128xf32>
      %125 = arith.mulf %124, %123 : vector<8x128xf32>
      %cst_48 = arith.constant 5.000000e-01 : f32
      %126 = vector.broadcast %cst_48 : f32 to vector<8x128xf32>
      %127 = arith.addf %125, %126 : vector<8x128xf32>
      %128 = vector.extract_strided_slice %119 {offsets = [0, 128], sizes = [8, 128], strides = [1, 1]} : vector<8x512xf32> to vector<8x128xf32>
      %cst_49 = arith.constant 5.000000e-01 : f32
      %129 = vector.broadcast %cst_49 : f32 to vector<8x128xf32>
      %130 = arith.mulf %129, %128 : vector<8x128xf32>
      %131 = math.tanh %130 : vector<8x128xf32>
      %cst_50 = arith.constant 5.000000e-01 : f32
      %132 = vector.broadcast %cst_50 : f32 to vector<8x128xf32>
      %133 = arith.mulf %132, %131 : vector<8x128xf32>
      %cst_51 = arith.constant 5.000000e-01 : f32
      %134 = vector.broadcast %cst_51 : f32 to vector<8x128xf32>
      %135 = arith.addf %133, %134 : vector<8x128xf32>
      %136 = vector.extract_strided_slice %119 {offsets = [0, 256], sizes = [8, 128], strides = [1, 1]} : vector<8x512xf32> to vector<8x128xf32>
      %137 = math.tanh %136 : vector<8x128xf32>
      %138 = vector.extract_strided_slice %119 {offsets = [0, 384], sizes = [8, 128], strides = [1, 1]} : vector<8x512xf32> to vector<8x128xf32>
      %cst_52 = arith.constant 5.000000e-01 : f32
      %139 = vector.broadcast %cst_52 : f32 to vector<8x128xf32>
      %140 = arith.mulf %139, %138 : vector<8x128xf32>
      %141 = math.tanh %140 : vector<8x128xf32>
      %cst_53 = arith.constant 5.000000e-01 : f32
      %142 = vector.broadcast %cst_53 : f32 to vector<8x128xf32>
      %143 = arith.mulf %142, %141 : vector<8x128xf32>
      %cst_54 = arith.constant 5.000000e-01 : f32
      %144 = vector.broadcast %cst_54 : f32 to vector<8x128xf32>
      %145 = arith.addf %143, %144 : vector<8x128xf32>
      %146 = arith.mulf %135, %108 : vector<8x128xf32>
      %147 = arith.mulf %127, %137 : vector<8x128xf32>
      %148 = arith.addf %146, %147 : vector<8x128xf32>
      %149 = math.tanh %148 : vector<8x128xf32>
      %150 = arith.mulf %145, %149 : vector<8x128xf32>
      %151 = vector.shape_cast %112 : vector<8x1xi1> to vector<8x1xi1>
      %152 = vector.broadcast %151 : vector<8x1xi1> to vector<8x128xi1>
      %153 = arith.select %152, %150, %105 : vector<8x128xi1>, vector<8x128xf32>
      %154 = vector.shape_cast %112 : vector<8x1xi1> to vector<8x1xi1>
      %155 = vector.broadcast %154 : vector<8x1xi1> to vector<8x128xi1>
      %156 = arith.select %155, %148, %108 : vector<8x128xi1>, vector<8x128xf32>
      %c3_i32 = arith.constant 3 : i32
      %c6_i32_55 = arith.constant 6 : i32
      %157 = arith.muli %arg0, %c6_i32_55 : i32
      %158 = arith.addi %157, %c3_i32 : i32
      %159 = vector.broadcast %158 : i32 to vector<8x1xi32>
      %160 = arith.cmpi sgt, %8, %159 : vector<8x1xi32>
      %161 = arith.index_cast %c3_i32 : i32 to index
      %c0_56 = arith.constant 0 : index
      %c0_57 = arith.constant 0 : index
      %162 = vector.load %arg3[%161, %c0_56, %c0_57] : memref<6x8x512xf32, #tpu.memory_space<vmem>>, vector<1x8x512xf32>
      %163 = vector.shape_cast %162 : vector<1x8x512xf32> to vector<8x512xf32>
      %164 = arith.truncf %153 : vector<8x128xf32> to vector<8x128xbf16>
      %c0_58 = arith.constant 0 : index
      %c0_59 = arith.constant 0 : index
      %165 = vector.load %arg4[%c0_58, %c0_59] : memref<128x512xbf16, #tpu.memory_space<vmem>>, vector<128x512xbf16>
      %cst_60 = arith.constant dense<0.000000e+00> : vector<8x512xf32>
      %166 = tpu.matmul %164, %165, %cst_60 {dimension_numbers = #tpu.dot_dimension_numbers<[1], [0], [0], [1], [0, 0, 1, 1], [], []>} : vector<8x128xbf16>, vector<128x512xbf16>, vector<8x512xf32> -> vector<8x512xf32>
      %167 = arith.addf %163, %166 : vector<8x512xf32>
      %168 = vector.extract_strided_slice %167 {offsets = [0, 0], sizes = [8, 128], strides = [1, 1]} : vector<8x512xf32> to vector<8x128xf32>
      %cst_61 = arith.constant 5.000000e-01 : f32
      %169 = vector.broadcast %cst_61 : f32 to vector<8x128xf32>
      %170 = arith.mulf %169, %168 : vector<8x128xf32>
      %171 = math.tanh %170 : vector<8x128xf32>
      %cst_62 = arith.constant 5.000000e-01 : f32
      %172 = vector.broadcast %cst_62 : f32 to vector<8x128xf32>
      %173 = arith.mulf %172, %171 : vector<8x128xf32>
      %cst_63 = arith.constant 5.000000e-01 : f32
      %174 = vector.broadcast %cst_63 : f32 to vector<8x128xf32>
      %175 = arith.addf %173, %174 : vector<8x128xf32>
      %176 = vector.extract_strided_slice %167 {offsets = [0, 128], sizes = [8, 128], strides = [1, 1]} : vector<8x512xf32> to vector<8x128xf32>
      %cst_64 = arith.constant 5.000000e-01 : f32
      %177 = vector.broadcast %cst_64 : f32 to vector<8x128xf32>
      %178 = arith.mulf %177, %176 : vector<8x128xf32>
      %179 = math.tanh %178 : vector<8x128xf32>
      %cst_65 = arith.constant 5.000000e-01 : f32
      %180 = vector.broadcast %cst_65 : f32 to vector<8x128xf32>
      %181 = arith.mulf %180, %179 : vector<8x128xf32>
      %cst_66 = arith.constant 5.000000e-01 : f32
      %182 = vector.broadcast %cst_66 : f32 to vector<8x128xf32>
      %183 = arith.addf %181, %182 : vector<8x128xf32>
      %184 = vector.extract_strided_slice %167 {offsets = [0, 256], sizes = [8, 128], strides = [1, 1]} : vector<8x512xf32> to vector<8x128xf32>
      %185 = math.tanh %184 : vector<8x128xf32>
      %186 = vector.extract_strided_slice %167 {offsets = [0, 384], sizes = [8, 128], strides = [1, 1]} : vector<8x512xf32> to vector<8x128xf32>
      %cst_67 = arith.constant 5.000000e-01 : f32
      %187 = vector.broadcast %cst_67 : f32 to vector<8x128xf32>
      %188 = arith.mulf %187, %186 : vector<8x128xf32>
      %189 = math.tanh %188 : vector<8x128xf32>
      %cst_68 = arith.constant 5.000000e-01 : f32
      %190 = vector.broadcast %cst_68 : f32 to vector<8x128xf32>
      %191 = arith.mulf %190, %189 : vector<8x128xf32>
      %cst_69 = arith.constant 5.000000e-01 : f32
      %192 = vector.broadcast %cst_69 : f32 to vector<8x128xf32>
      %193 = arith.addf %191, %192 : vector<8x128xf32>
      %194 = arith.mulf %183, %156 : vector<8x128xf32>
      %195 = arith.mulf %175, %185 : vector<8x128xf32>
      %196 = arith.addf %194, %195 : vector<8x128xf32>
      %197 = math.tanh %196 : vector<8x128xf32>
      %198 = arith.mulf %193, %197 : vector<8x128xf32>
      %199 = vector.shape_cast %160 : vector<8x1xi1> to vector<8x1xi1>
      %200 = vector.broadcast %199 : vector<8x1xi1> to vector<8x128xi1>
      %201 = arith.select %200, %198, %153 : vector<8x128xi1>, vector<8x128xf32>
      %202 = vector.shape_cast %160 : vector<8x1xi1> to vector<8x1xi1>
      %203 = vector.broadcast %202 : vector<8x1xi1> to vector<8x128xi1>
      %204 = arith.select %203, %196, %156 : vector<8x128xi1>, vector<8x128xf32>
      %c4_i32 = arith.constant 4 : i32
      %c6_i32_70 = arith.constant 6 : i32
      %205 = arith.muli %arg0, %c6_i32_70 : i32
      %206 = arith.addi %205, %c4_i32 : i32
      %207 = vector.broadcast %206 : i32 to vector<8x1xi32>
      %208 = arith.cmpi sgt, %8, %207 : vector<8x1xi32>
      %209 = arith.index_cast %c4_i32 : i32 to index
      %c0_71 = arith.constant 0 : index
      %c0_72 = arith.constant 0 : index
      %210 = vector.load %arg3[%209, %c0_71, %c0_72] : memref<6x8x512xf32, #tpu.memory_space<vmem>>, vector<1x8x512xf32>
      %211 = vector.shape_cast %210 : vector<1x8x512xf32> to vector<8x512xf32>
      %212 = arith.truncf %201 : vector<8x128xf32> to vector<8x128xbf16>
      %c0_73 = arith.constant 0 : index
      %c0_74 = arith.constant 0 : index
      %213 = vector.load %arg4[%c0_73, %c0_74] : memref<128x512xbf16, #tpu.memory_space<vmem>>, vector<128x512xbf16>
      %cst_75 = arith.constant dense<0.000000e+00> : vector<8x512xf32>
      %214 = tpu.matmul %212, %213, %cst_75 {dimension_numbers = #tpu.dot_dimension_numbers<[1], [0], [0], [1], [0, 0, 1, 1], [], []>} : vector<8x128xbf16>, vector<128x512xbf16>, vector<8x512xf32> -> vector<8x512xf32>
      %215 = arith.addf %211, %214 : vector<8x512xf32>
      %216 = vector.extract_strided_slice %215 {offsets = [0, 0], sizes = [8, 128], strides = [1, 1]} : vector<8x512xf32> to vector<8x128xf32>
      %cst_76 = arith.constant 5.000000e-01 : f32
      %217 = vector.broadcast %cst_76 : f32 to vector<8x128xf32>
      %218 = arith.mulf %217, %216 : vector<8x128xf32>
      %219 = math.tanh %218 : vector<8x128xf32>
      %cst_77 = arith.constant 5.000000e-01 : f32
      %220 = vector.broadcast %cst_77 : f32 to vector<8x128xf32>
      %221 = arith.mulf %220, %219 : vector<8x128xf32>
      %cst_78 = arith.constant 5.000000e-01 : f32
      %222 = vector.broadcast %cst_78 : f32 to vector<8x128xf32>
      %223 = arith.addf %221, %222 : vector<8x128xf32>
      %224 = vector.extract_strided_slice %215 {offsets = [0, 128], sizes = [8, 128], strides = [1, 1]} : vector<8x512xf32> to vector<8x128xf32>
      %cst_79 = arith.constant 5.000000e-01 : f32
      %225 = vector.broadcast %cst_79 : f32 to vector<8x128xf32>
      %226 = arith.mulf %225, %224 : vector<8x128xf32>
      %227 = math.tanh %226 : vector<8x128xf32>
      %cst_80 = arith.constant 5.000000e-01 : f32
      %228 = vector.broadcast %cst_80 : f32 to vector<8x128xf32>
      %229 = arith.mulf %228, %227 : vector<8x128xf32>
      %cst_81 = arith.constant 5.000000e-01 : f32
      %230 = vector.broadcast %cst_81 : f32 to vector<8x128xf32>
      %231 = arith.addf %229, %230 : vector<8x128xf32>
      %232 = vector.extract_strided_slice %215 {offsets = [0, 256], sizes = [8, 128], strides = [1, 1]} : vector<8x512xf32> to vector<8x128xf32>
      %233 = math.tanh %232 : vector<8x128xf32>
      %234 = vector.extract_strided_slice %215 {offsets = [0, 384], sizes = [8, 128], strides = [1, 1]} : vector<8x512xf32> to vector<8x128xf32>
      %cst_82 = arith.constant 5.000000e-01 : f32
      %235 = vector.broadcast %cst_82 : f32 to vector<8x128xf32>
      %236 = arith.mulf %235, %234 : vector<8x128xf32>
      %237 = math.tanh %236 : vector<8x128xf32>
      %cst_83 = arith.constant 5.000000e-01 : f32
      %238 = vector.broadcast %cst_83 : f32 to vector<8x128xf32>
      %239 = arith.mulf %238, %237 : vector<8x128xf32>
      %cst_84 = arith.constant 5.000000e-01 : f32
      %240 = vector.broadcast %cst_84 : f32 to vector<8x128xf32>
      %241 = arith.addf %239, %240 : vector<8x128xf32>
      %242 = arith.mulf %231, %204 : vector<8x128xf32>
      %243 = arith.mulf %223, %233 : vector<8x128xf32>
      %244 = arith.addf %242, %243 : vector<8x128xf32>
      %245 = math.tanh %244 : vector<8x128xf32>
      %246 = arith.mulf %241, %245 : vector<8x128xf32>
      %247 = vector.shape_cast %208 : vector<8x1xi1> to vector<8x1xi1>
      %248 = vector.broadcast %247 : vector<8x1xi1> to vector<8x128xi1>
      %249 = arith.select %248, %246, %201 : vector<8x128xi1>, vector<8x128xf32>
      %250 = vector.shape_cast %208 : vector<8x1xi1> to vector<8x1xi1>
      %251 = vector.broadcast %250 : vector<8x1xi1> to vector<8x128xi1>
      %252 = arith.select %251, %244, %204 : vector<8x128xi1>, vector<8x128xf32>
      %c5_i32 = arith.constant 5 : i32
      %c6_i32_85 = arith.constant 6 : i32
      %253 = arith.muli %arg0, %c6_i32_85 : i32
      %254 = arith.addi %253, %c5_i32 : i32
      %255 = vector.broadcast %254 : i32 to vector<8x1xi32>
      %256 = arith.cmpi sgt, %8, %255 : vector<8x1xi32>
      %257 = arith.index_cast %c5_i32 : i32 to index
      %c0_86 = arith.constant 0 : index
      %c0_87 = arith.constant 0 : index
      %258 = vector.load %arg3[%257, %c0_86, %c0_87] : memref<6x8x512xf32, #tpu.memory_space<vmem>>, vector<1x8x512xf32>
      %259 = vector.shape_cast %258 : vector<1x8x512xf32> to vector<8x512xf32>
      %260 = arith.truncf %249 : vector<8x128xf32> to vector<8x128xbf16>
      %c0_88 = arith.constant 0 : index
      %c0_89 = arith.constant 0 : index
      %261 = vector.load %arg4[%c0_88, %c0_89] : memref<128x512xbf16, #tpu.memory_space<vmem>>, vector<128x512xbf16>
      %cst_90 = arith.constant dense<0.000000e+00> : vector<8x512xf32>
      %262 = tpu.matmul %260, %261, %cst_90 {dimension_numbers = #tpu.dot_dimension_numbers<[1], [0], [0], [1], [0, 0, 1, 1], [], []>} : vector<8x128xbf16>, vector<128x512xbf16>, vector<8x512xf32> -> vector<8x512xf32>
      %263 = arith.addf %259, %262 : vector<8x512xf32>
      %264 = vector.extract_strided_slice %263 {offsets = [0, 0], sizes = [8, 128], strides = [1, 1]} : vector<8x512xf32> to vector<8x128xf32>
      %cst_91 = arith.constant 5.000000e-01 : f32
      %265 = vector.broadcast %cst_91 : f32 to vector<8x128xf32>
      %266 = arith.mulf %265, %264 : vector<8x128xf32>
      %267 = math.tanh %266 : vector<8x128xf32>
      %cst_92 = arith.constant 5.000000e-01 : f32
      %268 = vector.broadcast %cst_92 : f32 to vector<8x128xf32>
      %269 = arith.mulf %268, %267 : vector<8x128xf32>
      %cst_93 = arith.constant 5.000000e-01 : f32
      %270 = vector.broadcast %cst_93 : f32 to vector<8x128xf32>
      %271 = arith.addf %269, %270 : vector<8x128xf32>
      %272 = vector.extract_strided_slice %263 {offsets = [0, 128], sizes = [8, 128], strides = [1, 1]} : vector<8x512xf32> to vector<8x128xf32>
      %cst_94 = arith.constant 5.000000e-01 : f32
      %273 = vector.broadcast %cst_94 : f32 to vector<8x128xf32>
      %274 = arith.mulf %273, %272 : vector<8x128xf32>
      %275 = math.tanh %274 : vector<8x128xf32>
      %cst_95 = arith.constant 5.000000e-01 : f32
      %276 = vector.broadcast %cst_95 : f32 to vector<8x128xf32>
      %277 = arith.mulf %276, %275 : vector<8x128xf32>
      %cst_96 = arith.constant 5.000000e-01 : f32
      %278 = vector.broadcast %cst_96 : f32 to vector<8x128xf32>
      %279 = arith.addf %277, %278 : vector<8x128xf32>
      %280 = vector.extract_strided_slice %263 {offsets = [0, 256], sizes = [8, 128], strides = [1, 1]} : vector<8x512xf32> to vector<8x128xf32>
      %281 = math.tanh %280 : vector<8x128xf32>
      %282 = vector.extract_strided_slice %263 {offsets = [0, 384], sizes = [8, 128], strides = [1, 1]} : vector<8x512xf32> to vector<8x128xf32>
      %cst_97 = arith.constant 5.000000e-01 : f32
      %283 = vector.broadcast %cst_97 : f32 to vector<8x128xf32>
      %284 = arith.mulf %283, %282 : vector<8x128xf32>
      %285 = math.tanh %284 : vector<8x128xf32>
      %cst_98 = arith.constant 5.000000e-01 : f32
      %286 = vector.broadcast %cst_98 : f32 to vector<8x128xf32>
      %287 = arith.mulf %286, %285 : vector<8x128xf32>
      %cst_99 = arith.constant 5.000000e-01 : f32
      %288 = vector.broadcast %cst_99 : f32 to vector<8x128xf32>
      %289 = arith.addf %287, %288 : vector<8x128xf32>
      %290 = arith.mulf %279, %252 : vector<8x128xf32>
      %291 = arith.mulf %271, %281 : vector<8x128xf32>
      %292 = arith.addf %290, %291 : vector<8x128xf32>
      %293 = math.tanh %292 : vector<8x128xf32>
      %294 = arith.mulf %289, %293 : vector<8x128xf32>
      %295 = vector.shape_cast %256 : vector<8x1xi1> to vector<8x1xi1>
      %296 = vector.broadcast %295 : vector<8x1xi1> to vector<8x128xi1>
      %297 = arith.select %296, %294, %249 : vector<8x128xi1>, vector<8x128xf32>
      %298 = vector.shape_cast %256 : vector<8x1xi1> to vector<8x1xi1>
      %299 = vector.broadcast %298 : vector<8x1xi1> to vector<8x128xi1>
      %300 = arith.select %299, %292, %252 : vector<8x128xi1>, vector<8x128xf32>
      %c6_i32_100 = arith.constant 6 : i32
      %c0_101 = arith.constant 0 : index
      %c0_102 = arith.constant 0 : index
      %c0_103 = arith.constant 0 : index
      %301 = vector.load %arg5[%c0_101, %c0_102, %c0_103] : memref<1x8x128xf32, #tpu.memory_space<vmem>>, vector<1x8x128xf32>
      %302 = vector.shape_cast %301 : vector<1x8x128xf32> to vector<8x128xf32>
      %303 = vector.shape_cast %297 : vector<8x128xf32> to vector<1x8x128xf32>
      tpu.vector_store %arg5[%c0_101, %c0_102, %c0_103], %303 {strides = array<i32>} : memref<1x8x128xf32, #tpu.memory_space<vmem>>, vector<1x8x128xf32>,
      %c0_104 = arith.constant 0 : index
      %c0_105 = arith.constant 0 : index
      %c0_106 = arith.constant 0 : index
      %304 = vector.load %arg6[%c0_104, %c0_105, %c0_106] : memref<1x8x128xf32, #tpu.memory_space<vmem>>, vector<1x8x128xf32>
      %305 = vector.shape_cast %304 : vector<1x8x128xf32> to vector<8x128xf32>
      %306 = vector.shape_cast %300 : vector<8x128xf32> to vector<1x8x128xf32>
      tpu.vector_store %arg6[%c0_104, %c0_105, %c0_106], %306 {strides = array<i32>} : memref<1x8x128xf32, #tpu.memory_space<vmem>>, vector<1x8x128xf32>,
    } else {
    }
    return
  }
  func.func @transform_0(%arg0: i32, %arg1: memref<1xi32, #tpu.memory_space<smem>>) -> (i32, i32) {
    %c0_i32 = arith.constant 0 : i32
    %c0_i32_0 = arith.constant 0 : i32
    %c0_i32_1 = arith.constant 0 : i32
    return %c0_i32, %c0_i32_0 : i32, i32
  }
  func.func @transform_1(%arg0: i32, %arg1: memref<1xi32, #tpu.memory_space<smem>>) -> (i32, i32, i32) {
    %c0_i32 = arith.constant 0 : i32
    %c0_i32_0 = arith.constant 0 : i32
    %c0_i32_1 = arith.constant 0 : i32
    return %arg0, %c0_i32, %c0_i32_0 : i32, i32, i32
  }
  func.func @transform_2(%arg0: i32, %arg1: memref<1xi32, #tpu.memory_space<smem>>) -> (i32, i32) {
    %c0_i32 = arith.constant 0 : i32
    %c0_i32_0 = arith.constant 0 : i32
    %c0_i32_1 = arith.constant 0 : i32
    return %c0_i32, %c0_i32_0 : i32, i32
  }
  func.func @transform_3(%arg0: i32, %arg1: memref<1xi32, #tpu.memory_space<smem>>) -> (i32, i32, i32) {
    %c0_i32 = arith.constant 0 : i32
    %c0_i32_0 = arith.constant 0 : i32
    %c0_i32_1 = arith.constant 0 : i32
    %c0_i32_2 = arith.constant 0 : i32
    return %c0_i32, %c0_i32_0, %c0_i32_1 : i32, i32, i32
  }
  func.func @transform_4(%arg0: i32, %arg1: memref<1xi32, #tpu.memory_space<smem>>) -> (i32, i32, i32) {
    %c0_i32 = arith.constant 0 : i32
    %c0_i32_0 = arith.constant 0 : i32
    %c0_i32_1 = arith.constant 0 : i32
    %c0_i32_2 = arith.constant 0 : i32
    return %c0_i32, %c0_i32_0, %c0_i32_1 : i32, i32, i32
  }
}

module attributes {stable_mosaic.version = 11 : i64} {
  func.func @_stacked_lstm_kernel(%arg0: i32, %arg1: memref<1xi32, #tpu.memory_space<smem>>, %arg2: memref<8x1xi32, #tpu.memory_space<vmem>>, %arg3: memref<4x8x512xf32, #tpu.memory_space<vmem>>, %arg4: memref<128x512xbf16, #tpu.memory_space<vmem>>, %arg5: memref<128x512xbf16, #tpu.memory_space<vmem>>, %arg6: memref<128x512xbf16, #tpu.memory_space<vmem>>, %arg7: memref<1x512xf32, #tpu.memory_space<vmem>>, %arg8: memref<2x8x128xf32, #tpu.memory_space<vmem>>, %arg9: memref<2x8x128xf32, #tpu.memory_space<vmem>>) attributes {dimension_semantics = [#tpu.dimension_semantics<arbitrary>], iteration_bounds = array<i64: 1>, scalar_prefetch = 1 : i64, scratch_operands = 0 : i64, tpu.core_type = #tpu.core_type<tc>, window_params = [{pipeline_mode = #tpu.pipeline_mode<synchronous>, transform_indices = @transform_0, window_bounds = array<i64: 8, 1>}, {transform_indices = @transform_1, window_bounds = array<i64: 4, 8, 512>}, {pipeline_mode = #tpu.pipeline_mode<synchronous>, transform_indices = @transform_2, window_bounds = array<i64: 128, 512>}, {pipeline_mode = #tpu.pipeline_mode<synchronous>, transform_indices = @transform_3, window_bounds = array<i64: 128, 512>}, {pipeline_mode = #tpu.pipeline_mode<synchronous>, transform_indices = @transform_4, window_bounds = array<i64: 128, 512>}, {pipeline_mode = #tpu.pipeline_mode<synchronous>, transform_indices = @transform_5, window_bounds = array<i64: 1, 512>}, {pipeline_mode = #tpu.pipeline_mode<synchronous>, transform_indices = @transform_6, window_bounds = array<i64: 2, 8, 128>}, {pipeline_mode = #tpu.pipeline_mode<synchronous>, transform_indices = @transform_7, window_bounds = array<i64: 2, 8, 128>}]} {
    %c0_i32 = arith.constant 0 : i32
    %0 = arith.cmpi eq, %arg0, %c0_i32 : i32
    %1 = arith.extui %0 : i1 to i32
    %c0_i32_0 = arith.constant 0 : i32
    %2 = arith.cmpi ne, %1, %c0_i32_0 : i32
    scf.if %2 {
      %cst = arith.constant 0.000000e+00 : f32
      %8 = vector.broadcast %cst : f32 to vector<2x8x128xf32>
      %c0_2 = arith.constant 0 : index
      %c0_3 = arith.constant 0 : index
      %c0_4 = arith.constant 0 : index
      %9 = vector.load %arg8[%c0_2, %c0_3, %c0_4] : memref<2x8x128xf32, #tpu.memory_space<vmem>>, vector<2x8x128xf32>
      tpu.vector_store %arg8[%c0_2, %c0_3, %c0_4], %8 {strides = array<i32>} : memref<2x8x128xf32, #tpu.memory_space<vmem>>, vector<2x8x128xf32>,
      %cst_5 = arith.constant 0.000000e+00 : f32
      %10 = vector.broadcast %cst_5 : f32 to vector<2x8x128xf32>
      %c0_6 = arith.constant 0 : index
      %c0_7 = arith.constant 0 : index
      %c0_8 = arith.constant 0 : index
      %11 = vector.load %arg9[%c0_6, %c0_7, %c0_8] : memref<2x8x128xf32, #tpu.memory_space<vmem>>, vector<2x8x128xf32>
      tpu.vector_store %arg9[%c0_6, %c0_7, %c0_8], %10 {strides = array<i32>} : memref<2x8x128xf32, #tpu.memory_space<vmem>>, vector<2x8x128xf32>,
    } else {
    }
    %c4_i32 = arith.constant 4 : i32
    %3 = arith.muli %arg0, %c4_i32 : i32
    %c0 = arith.constant 0 : index
    %4 = memref.load %arg1[%c0] : memref<1xi32, #tpu.memory_space<smem>>
    %5 = arith.cmpi slt, %3, %4 : i32
    %6 = arith.extui %5 : i1 to i32
    %c0_i32_1 = arith.constant 0 : i32
    %7 = arith.cmpi ne, %6, %c0_i32_1 : i32
    scf.if %7 {
      %c0_2 = arith.constant 0 : index
      %c0_3 = arith.constant 0 : index
      %8 = vector.load %arg2[%c0_2, %c0_3] : memref<8x1xi32, #tpu.memory_space<vmem>>, vector<8x1xi32>
      %c0_4 = arith.constant 0 : index
      %c0_5 = arith.constant 0 : index
      %c0_6 = arith.constant 0 : index
      %9 = vector.load %arg8[%c0_4, %c0_5, %c0_6] : memref<2x8x128xf32, #tpu.memory_space<vmem>>, vector<1x8x128xf32>
      %10 = vector.shape_cast %9 : vector<1x8x128xf32> to vector<8x128xf32>
      %c1 = arith.constant 1 : index
      %c0_7 = arith.constant 0 : index
      %c0_8 = arith.constant 0 : index
      %11 = vector.load %arg8[%c1, %c0_7, %c0_8] : memref<2x8x128xf32, #tpu.memory_space<vmem>>, vector<1x8x128xf32>
      %12 = vector.shape_cast %11 : vector<1x8x128xf32> to vector<8x128xf32>
      %c0_9 = arith.constant 0 : index
      %c0_10 = arith.constant 0 : index
      %c0_11 = arith.constant 0 : index
      %13 = vector.load %arg9[%c0_9, %c0_10, %c0_11] : memref<2x8x128xf32, #tpu.memory_space<vmem>>, vector<1x8x128xf32>
      %14 = vector.shape_cast %13 : vector<1x8x128xf32> to vector<8x128xf32>
      %c1_12 = arith.constant 1 : index
      %c0_13 = arith.constant 0 : index
      %c0_14 = arith.constant 0 : index
      %15 = vector.load %arg9[%c1_12, %c0_13, %c0_14] : memref<2x8x128xf32, #tpu.memory_space<vmem>>, vector<1x8x128xf32>
      %16 = vector.shape_cast %15 : vector<1x8x128xf32> to vector<8x128xf32>
      %c0_i32_15 = arith.constant 0 : i32
      %c4_i32_16 = arith.constant 4 : i32
      %17 = arith.muli %arg0, %c4_i32_16 : i32
      %18 = arith.addi %17, %c0_i32_15 : i32
      %19 = vector.broadcast %18 : i32 to vector<8x1xi32>
      %20 = arith.cmpi sgt, %8, %19 : vector<8x1xi32>
      %21 = arith.index_cast %c0_i32_15 : i32 to index
      %c0_17 = arith.constant 0 : index
      %c0_18 = arith.constant 0 : index
      %22 = vector.load %arg3[%21, %c0_17, %c0_18] : memref<4x8x512xf32, #tpu.memory_space<vmem>>, vector<1x8x512xf32>
      %23 = vector.shape_cast %22 : vector<1x8x512xf32> to vector<8x512xf32>
      %24 = arith.truncf %10 : vector<8x128xf32> to vector<8x128xbf16>
      %c0_19 = arith.constant 0 : index
      %c0_20 = arith.constant 0 : index
      %25 = vector.load %arg4[%c0_19, %c0_20] : memref<128x512xbf16, #tpu.memory_space<vmem>>, vector<128x512xbf16>
      %cst = arith.constant dense<0.000000e+00> : vector<8x512xf32>
      %26 = tpu.matmul %24, %25, %cst {dimension_numbers = #tpu.dot_dimension_numbers<[1], [0], [0], [1], [0, 0, 1, 1], [], []>} : vector<8x128xbf16>, vector<128x512xbf16>, vector<8x512xf32> -> vector<8x512xf32>
      %27 = arith.addf %23, %26 : vector<8x512xf32>
      %28 = vector.extract_strided_slice %27 {offsets = [0, 0], sizes = [8, 128], strides = [1, 1]} : vector<8x512xf32> to vector<8x128xf32>
      %cst_21 = arith.constant 5.000000e-01 : f32
      %29 = vector.broadcast %cst_21 : f32 to vector<8x128xf32>
      %30 = arith.mulf %29, %28 : vector<8x128xf32>
      %31 = math.tanh %30 : vector<8x128xf32>
      %cst_22 = arith.constant 5.000000e-01 : f32
      %32 = vector.broadcast %cst_22 : f32 to vector<8x128xf32>
      %33 = arith.mulf %32, %31 : vector<8x128xf32>
      %cst_23 = arith.constant 5.000000e-01 : f32
      %34 = vector.broadcast %cst_23 : f32 to vector<8x128xf32>
      %35 = arith.addf %33, %34 : vector<8x128xf32>
      %36 = vector.extract_strided_slice %27 {offsets = [0, 128], sizes = [8, 128], strides = [1, 1]} : vector<8x512xf32> to vector<8x128xf32>
      %cst_24 = arith.constant 5.000000e-01 : f32
      %37 = vector.broadcast %cst_24 : f32 to vector<8x128xf32>
      %38 = arith.mulf %37, %36 : vector<8x128xf32>
      %39 = math.tanh %38 : vector<8x128xf32>
      %cst_25 = arith.constant 5.000000e-01 : f32
      %40 = vector.broadcast %cst_25 : f32 to vector<8x128xf32>
      %41 = arith.mulf %40, %39 : vector<8x128xf32>
      %cst_26 = arith.constant 5.000000e-01 : f32
      %42 = vector.broadcast %cst_26 : f32 to vector<8x128xf32>
      %43 = arith.addf %41, %42 : vector<8x128xf32>
      %44 = vector.extract_strided_slice %27 {offsets = [0, 256], sizes = [8, 128], strides = [1, 1]} : vector<8x512xf32> to vector<8x128xf32>
      %45 = math.tanh %44 : vector<8x128xf32>
      %46 = vector.extract_strided_slice %27 {offsets = [0, 384], sizes = [8, 128], strides = [1, 1]} : vector<8x512xf32> to vector<8x128xf32>
      %cst_27 = arith.constant 5.000000e-01 : f32
      %47 = vector.broadcast %cst_27 : f32 to vector<8x128xf32>
      %48 = arith.mulf %47, %46 : vector<8x128xf32>
      %49 = math.tanh %48 : vector<8x128xf32>
      %cst_28 = arith.constant 5.000000e-01 : f32
      %50 = vector.broadcast %cst_28 : f32 to vector<8x128xf32>
      %51 = arith.mulf %50, %49 : vector<8x128xf32>
      %cst_29 = arith.constant 5.000000e-01 : f32
      %52 = vector.broadcast %cst_29 : f32 to vector<8x128xf32>
      %53 = arith.addf %51, %52 : vector<8x128xf32>
      %54 = arith.mulf %43, %14 : vector<8x128xf32>
      %55 = arith.mulf %35, %45 : vector<8x128xf32>
      %56 = arith.addf %54, %55 : vector<8x128xf32>
      %57 = math.tanh %56 : vector<8x128xf32>
      %58 = arith.mulf %53, %57 : vector<8x128xf32>
      %59 = vector.shape_cast %20 : vector<8x1xi1> to vector<8x1xi1>
      %60 = vector.broadcast %59 : vector<8x1xi1> to vector<8x128xi1>
      %61 = arith.select %60, %58, %10 : vector<8x128xi1>, vector<8x128xf32>
      %62 = vector.shape_cast %20 : vector<8x1xi1> to vector<8x1xi1>
      %63 = vector.broadcast %62 : vector<8x1xi1> to vector<8x128xi1>
      %64 = arith.select %63, %56, %14 : vector<8x128xi1>, vector<8x128xf32>
      %65 = arith.truncf %61 : vector<8x128xf32> to vector<8x128xbf16>
      %c0_30 = arith.constant 0 : index
      %c0_31 = arith.constant 0 : index
      %66 = vector.load %arg6[%c0_30, %c0_31] : memref<128x512xbf16, #tpu.memory_space<vmem>>, vector<128x512xbf16>
      %cst_32 = arith.constant dense<0.000000e+00> : vector<8x512xf32>
      %67 = tpu.matmul %65, %66, %cst_32 {dimension_numbers = #tpu.dot_dimension_numbers<[1], [0], [0], [1], [0, 0, 1, 1], [], []>} : vector<8x128xbf16>, vector<128x512xbf16>, vector<8x512xf32> -> vector<8x512xf32>
      %c0_33 = arith.constant 0 : index
      %c0_34 = arith.constant 0 : index
      %68 = vector.load %arg7[%c0_33, %c0_34] : memref<1x512xf32, #tpu.memory_space<vmem>>, vector<1x512xf32>
      %69 = vector.broadcast %68 : vector<1x512xf32> to vector<8x512xf32>
      %70 = arith.addf %67, %69 : vector<8x512xf32>
      %71 = arith.truncf %12 : vector<8x128xf32> to vector<8x128xbf16>
      %c0_35 = arith.constant 0 : index
      %c0_36 = arith.constant 0 : index
      %72 = vector.load %arg5[%c0_35, %c0_36] : memref<128x512xbf16, #tpu.memory_space<vmem>>, vector<128x512xbf16>
      %cst_37 = arith.constant dense<0.000000e+00> : vector<8x512xf32>
      %73 = tpu.matmul %71, %72, %cst_37 {dimension_numbers = #tpu.dot_dimension_numbers<[1], [0], [0], [1], [0, 0, 1, 1], [], []>} : vector<8x128xbf16>, vector<128x512xbf16>, vector<8x512xf32> -> vector<8x512xf32>
      %74 = arith.addf %70, %73 : vector<8x512xf32>
      %75 = vector.extract_strided_slice %74 {offsets = [0, 0], sizes = [8, 128], strides = [1, 1]} : vector<8x512xf32> to vector<8x128xf32>
      %cst_38 = arith.constant 5.000000e-01 : f32
      %76 = vector.broadcast %cst_38 : f32 to vector<8x128xf32>
      %77 = arith.mulf %76, %75 : vector<8x128xf32>
      %78 = math.tanh %77 : vector<8x128xf32>
      %cst_39 = arith.constant 5.000000e-01 : f32
      %79 = vector.broadcast %cst_39 : f32 to vector<8x128xf32>
      %80 = arith.mulf %79, %78 : vector<8x128xf32>
      %cst_40 = arith.constant 5.000000e-01 : f32
      %81 = vector.broadcast %cst_40 : f32 to vector<8x128xf32>
      %82 = arith.addf %80, %81 : vector<8x128xf32>
      %83 = vector.extract_strided_slice %74 {offsets = [0, 128], sizes = [8, 128], strides = [1, 1]} : vector<8x512xf32> to vector<8x128xf32>
      %cst_41 = arith.constant 5.000000e-01 : f32
      %84 = vector.broadcast %cst_41 : f32 to vector<8x128xf32>
      %85 = arith.mulf %84, %83 : vector<8x128xf32>
      %86 = math.tanh %85 : vector<8x128xf32>
      %cst_42 = arith.constant 5.000000e-01 : f32
      %87 = vector.broadcast %cst_42 : f32 to vector<8x128xf32>
      %88 = arith.mulf %87, %86 : vector<8x128xf32>
      %cst_43 = arith.constant 5.000000e-01 : f32
      %89 = vector.broadcast %cst_43 : f32 to vector<8x128xf32>
      %90 = arith.addf %88, %89 : vector<8x128xf32>
      %91 = vector.extract_strided_slice %74 {offsets = [0, 256], sizes = [8, 128], strides = [1, 1]} : vector<8x512xf32> to vector<8x128xf32>
      %92 = math.tanh %91 : vector<8x128xf32>
      %93 = vector.extract_strided_slice %74 {offsets = [0, 384], sizes = [8, 128], strides = [1, 1]} : vector<8x512xf32> to vector<8x128xf32>
      %cst_44 = arith.constant 5.000000e-01 : f32
      %94 = vector.broadcast %cst_44 : f32 to vector<8x128xf32>
      %95 = arith.mulf %94, %93 : vector<8x128xf32>
      %96 = math.tanh %95 : vector<8x128xf32>
      %cst_45 = arith.constant 5.000000e-01 : f32
      %97 = vector.broadcast %cst_45 : f32 to vector<8x128xf32>
      %98 = arith.mulf %97, %96 : vector<8x128xf32>
      %cst_46 = arith.constant 5.000000e-01 : f32
      %99 = vector.broadcast %cst_46 : f32 to vector<8x128xf32>
      %100 = arith.addf %98, %99 : vector<8x128xf32>
      %101 = arith.mulf %90, %16 : vector<8x128xf32>
      %102 = arith.mulf %82, %92 : vector<8x128xf32>
      %103 = arith.addf %101, %102 : vector<8x128xf32>
      %104 = math.tanh %103 : vector<8x128xf32>
      %105 = arith.mulf %100, %104 : vector<8x128xf32>
      %106 = vector.shape_cast %20 : vector<8x1xi1> to vector<8x1xi1>
      %107 = vector.broadcast %106 : vector<8x1xi1> to vector<8x128xi1>
      %108 = arith.select %107, %105, %12 : vector<8x128xi1>, vector<8x128xf32>
      %109 = vector.shape_cast %20 : vector<8x1xi1> to vector<8x1xi1>
      %110 = vector.broadcast %109 : vector<8x1xi1> to vector<8x128xi1>
      %111 = arith.select %110, %103, %16 : vector<8x128xi1>, vector<8x128xf32>
      %c1_i32 = arith.constant 1 : i32
      %c4_i32_47 = arith.constant 4 : i32
      %112 = arith.muli %arg0, %c4_i32_47 : i32
      %113 = arith.addi %112, %c1_i32 : i32
      %114 = vector.broadcast %113 : i32 to vector<8x1xi32>
      %115 = arith.cmpi sgt, %8, %114 : vector<8x1xi32>
      %116 = arith.index_cast %c1_i32 : i32 to index
      %c0_48 = arith.constant 0 : index
      %c0_49 = arith.constant 0 : index
      %117 = vector.load %arg3[%116, %c0_48, %c0_49] : memref<4x8x512xf32, #tpu.memory_space<vmem>>, vector<1x8x512xf32>
      %118 = vector.shape_cast %117 : vector<1x8x512xf32> to vector<8x512xf32>
      %119 = arith.truncf %61 : vector<8x128xf32> to vector<8x128xbf16>
      %c0_50 = arith.constant 0 : index
      %c0_51 = arith.constant 0 : index
      %120 = vector.load %arg4[%c0_50, %c0_51] : memref<128x512xbf16, #tpu.memory_space<vmem>>, vector<128x512xbf16>
      %cst_52 = arith.constant dense<0.000000e+00> : vector<8x512xf32>
      %121 = tpu.matmul %119, %120, %cst_52 {dimension_numbers = #tpu.dot_dimension_numbers<[1], [0], [0], [1], [0, 0, 1, 1], [], []>} : vector<8x128xbf16>, vector<128x512xbf16>, vector<8x512xf32> -> vector<8x512xf32>
      %122 = arith.addf %118, %121 : vector<8x512xf32>
      %123 = vector.extract_strided_slice %122 {offsets = [0, 0], sizes = [8, 128], strides = [1, 1]} : vector<8x512xf32> to vector<8x128xf32>
      %cst_53 = arith.constant 5.000000e-01 : f32
      %124 = vector.broadcast %cst_53 : f32 to vector<8x128xf32>
      %125 = arith.mulf %124, %123 : vector<8x128xf32>
      %126 = math.tanh %125 : vector<8x128xf32>
      %cst_54 = arith.constant 5.000000e-01 : f32
      %127 = vector.broadcast %cst_54 : f32 to vector<8x128xf32>
      %128 = arith.mulf %127, %126 : vector<8x128xf32>
      %cst_55 = arith.constant 5.000000e-01 : f32
      %129 = vector.broadcast %cst_55 : f32 to vector<8x128xf32>
      %130 = arith.addf %128, %129 : vector<8x128xf32>
      %131 = vector.extract_strided_slice %122 {offsets = [0, 128], sizes = [8, 128], strides = [1, 1]} : vector<8x512xf32> to vector<8x128xf32>
      %cst_56 = arith.constant 5.000000e-01 : f32
      %132 = vector.broadcast %cst_56 : f32 to vector<8x128xf32>
      %133 = arith.mulf %132, %131 : vector<8x128xf32>
      %134 = math.tanh %133 : vector<8x128xf32>
      %cst_57 = arith.constant 5.000000e-01 : f32
      %135 = vector.broadcast %cst_57 : f32 to vector<8x128xf32>
      %136 = arith.mulf %135, %134 : vector<8x128xf32>
      %cst_58 = arith.constant 5.000000e-01 : f32
      %137 = vector.broadcast %cst_58 : f32 to vector<8x128xf32>
      %138 = arith.addf %136, %137 : vector<8x128xf32>
      %139 = vector.extract_strided_slice %122 {offsets = [0, 256], sizes = [8, 128], strides = [1, 1]} : vector<8x512xf32> to vector<8x128xf32>
      %140 = math.tanh %139 : vector<8x128xf32>
      %141 = vector.extract_strided_slice %122 {offsets = [0, 384], sizes = [8, 128], strides = [1, 1]} : vector<8x512xf32> to vector<8x128xf32>
      %cst_59 = arith.constant 5.000000e-01 : f32
      %142 = vector.broadcast %cst_59 : f32 to vector<8x128xf32>
      %143 = arith.mulf %142, %141 : vector<8x128xf32>
      %144 = math.tanh %143 : vector<8x128xf32>
      %cst_60 = arith.constant 5.000000e-01 : f32
      %145 = vector.broadcast %cst_60 : f32 to vector<8x128xf32>
      %146 = arith.mulf %145, %144 : vector<8x128xf32>
      %cst_61 = arith.constant 5.000000e-01 : f32
      %147 = vector.broadcast %cst_61 : f32 to vector<8x128xf32>
      %148 = arith.addf %146, %147 : vector<8x128xf32>
      %149 = arith.mulf %138, %64 : vector<8x128xf32>
      %150 = arith.mulf %130, %140 : vector<8x128xf32>
      %151 = arith.addf %149, %150 : vector<8x128xf32>
      %152 = math.tanh %151 : vector<8x128xf32>
      %153 = arith.mulf %148, %152 : vector<8x128xf32>
      %154 = vector.shape_cast %115 : vector<8x1xi1> to vector<8x1xi1>
      %155 = vector.broadcast %154 : vector<8x1xi1> to vector<8x128xi1>
      %156 = arith.select %155, %153, %61 : vector<8x128xi1>, vector<8x128xf32>
      %157 = vector.shape_cast %115 : vector<8x1xi1> to vector<8x1xi1>
      %158 = vector.broadcast %157 : vector<8x1xi1> to vector<8x128xi1>
      %159 = arith.select %158, %151, %64 : vector<8x128xi1>, vector<8x128xf32>
      %160 = arith.truncf %156 : vector<8x128xf32> to vector<8x128xbf16>
      %c0_62 = arith.constant 0 : index
      %c0_63 = arith.constant 0 : index
      %161 = vector.load %arg6[%c0_62, %c0_63] : memref<128x512xbf16, #tpu.memory_space<vmem>>, vector<128x512xbf16>
      %cst_64 = arith.constant dense<0.000000e+00> : vector<8x512xf32>
      %162 = tpu.matmul %160, %161, %cst_64 {dimension_numbers = #tpu.dot_dimension_numbers<[1], [0], [0], [1], [0, 0, 1, 1], [], []>} : vector<8x128xbf16>, vector<128x512xbf16>, vector<8x512xf32> -> vector<8x512xf32>
      %c0_65 = arith.constant 0 : index
      %c0_66 = arith.constant 0 : index
      %163 = vector.load %arg7[%c0_65, %c0_66] : memref<1x512xf32, #tpu.memory_space<vmem>>, vector<1x512xf32>
      %164 = vector.broadcast %163 : vector<1x512xf32> to vector<8x512xf32>
      %165 = arith.addf %162, %164 : vector<8x512xf32>
      %166 = arith.truncf %108 : vector<8x128xf32> to vector<8x128xbf16>
      %c0_67 = arith.constant 0 : index
      %c0_68 = arith.constant 0 : index
      %167 = vector.load %arg5[%c0_67, %c0_68] : memref<128x512xbf16, #tpu.memory_space<vmem>>, vector<128x512xbf16>
      %cst_69 = arith.constant dense<0.000000e+00> : vector<8x512xf32>
      %168 = tpu.matmul %166, %167, %cst_69 {dimension_numbers = #tpu.dot_dimension_numbers<[1], [0], [0], [1], [0, 0, 1, 1], [], []>} : vector<8x128xbf16>, vector<128x512xbf16>, vector<8x512xf32> -> vector<8x512xf32>
      %169 = arith.addf %165, %168 : vector<8x512xf32>
      %170 = vector.extract_strided_slice %169 {offsets = [0, 0], sizes = [8, 128], strides = [1, 1]} : vector<8x512xf32> to vector<8x128xf32>
      %cst_70 = arith.constant 5.000000e-01 : f32
      %171 = vector.broadcast %cst_70 : f32 to vector<8x128xf32>
      %172 = arith.mulf %171, %170 : vector<8x128xf32>
      %173 = math.tanh %172 : vector<8x128xf32>
      %cst_71 = arith.constant 5.000000e-01 : f32
      %174 = vector.broadcast %cst_71 : f32 to vector<8x128xf32>
      %175 = arith.mulf %174, %173 : vector<8x128xf32>
      %cst_72 = arith.constant 5.000000e-01 : f32
      %176 = vector.broadcast %cst_72 : f32 to vector<8x128xf32>
      %177 = arith.addf %175, %176 : vector<8x128xf32>
      %178 = vector.extract_strided_slice %169 {offsets = [0, 128], sizes = [8, 128], strides = [1, 1]} : vector<8x512xf32> to vector<8x128xf32>
      %cst_73 = arith.constant 5.000000e-01 : f32
      %179 = vector.broadcast %cst_73 : f32 to vector<8x128xf32>
      %180 = arith.mulf %179, %178 : vector<8x128xf32>
      %181 = math.tanh %180 : vector<8x128xf32>
      %cst_74 = arith.constant 5.000000e-01 : f32
      %182 = vector.broadcast %cst_74 : f32 to vector<8x128xf32>
      %183 = arith.mulf %182, %181 : vector<8x128xf32>
      %cst_75 = arith.constant 5.000000e-01 : f32
      %184 = vector.broadcast %cst_75 : f32 to vector<8x128xf32>
      %185 = arith.addf %183, %184 : vector<8x128xf32>
      %186 = vector.extract_strided_slice %169 {offsets = [0, 256], sizes = [8, 128], strides = [1, 1]} : vector<8x512xf32> to vector<8x128xf32>
      %187 = math.tanh %186 : vector<8x128xf32>
      %188 = vector.extract_strided_slice %169 {offsets = [0, 384], sizes = [8, 128], strides = [1, 1]} : vector<8x512xf32> to vector<8x128xf32>
      %cst_76 = arith.constant 5.000000e-01 : f32
      %189 = vector.broadcast %cst_76 : f32 to vector<8x128xf32>
      %190 = arith.mulf %189, %188 : vector<8x128xf32>
      %191 = math.tanh %190 : vector<8x128xf32>
      %cst_77 = arith.constant 5.000000e-01 : f32
      %192 = vector.broadcast %cst_77 : f32 to vector<8x128xf32>
      %193 = arith.mulf %192, %191 : vector<8x128xf32>
      %cst_78 = arith.constant 5.000000e-01 : f32
      %194 = vector.broadcast %cst_78 : f32 to vector<8x128xf32>
      %195 = arith.addf %193, %194 : vector<8x128xf32>
      %196 = arith.mulf %185, %111 : vector<8x128xf32>
      %197 = arith.mulf %177, %187 : vector<8x128xf32>
      %198 = arith.addf %196, %197 : vector<8x128xf32>
      %199 = math.tanh %198 : vector<8x128xf32>
      %200 = arith.mulf %195, %199 : vector<8x128xf32>
      %201 = vector.shape_cast %115 : vector<8x1xi1> to vector<8x1xi1>
      %202 = vector.broadcast %201 : vector<8x1xi1> to vector<8x128xi1>
      %203 = arith.select %202, %200, %108 : vector<8x128xi1>, vector<8x128xf32>
      %204 = vector.shape_cast %115 : vector<8x1xi1> to vector<8x1xi1>
      %205 = vector.broadcast %204 : vector<8x1xi1> to vector<8x128xi1>
      %206 = arith.select %205, %198, %111 : vector<8x128xi1>, vector<8x128xf32>
      %c2_i32 = arith.constant 2 : i32
      %c4_i32_79 = arith.constant 4 : i32
      %207 = arith.muli %arg0, %c4_i32_79 : i32
      %208 = arith.addi %207, %c2_i32 : i32
      %209 = vector.broadcast %208 : i32 to vector<8x1xi32>
      %210 = arith.cmpi sgt, %8, %209 : vector<8x1xi32>
      %211 = arith.index_cast %c2_i32 : i32 to index
      %c0_80 = arith.constant 0 : index
      %c0_81 = arith.constant 0 : index
      %212 = vector.load %arg3[%211, %c0_80, %c0_81] : memref<4x8x512xf32, #tpu.memory_space<vmem>>, vector<1x8x512xf32>
      %213 = vector.shape_cast %212 : vector<1x8x512xf32> to vector<8x512xf32>
      %214 = arith.truncf %156 : vector<8x128xf32> to vector<8x128xbf16>
      %c0_82 = arith.constant 0 : index
      %c0_83 = arith.constant 0 : index
      %215 = vector.load %arg4[%c0_82, %c0_83] : memref<128x512xbf16, #tpu.memory_space<vmem>>, vector<128x512xbf16>
      %cst_84 = arith.constant dense<0.000000e+00> : vector<8x512xf32>
      %216 = tpu.matmul %214, %215, %cst_84 {dimension_numbers = #tpu.dot_dimension_numbers<[1], [0], [0], [1], [0, 0, 1, 1], [], []>} : vector<8x128xbf16>, vector<128x512xbf16>, vector<8x512xf32> -> vector<8x512xf32>
      %217 = arith.addf %213, %216 : vector<8x512xf32>
      %218 = vector.extract_strided_slice %217 {offsets = [0, 0], sizes = [8, 128], strides = [1, 1]} : vector<8x512xf32> to vector<8x128xf32>
      %cst_85 = arith.constant 5.000000e-01 : f32
      %219 = vector.broadcast %cst_85 : f32 to vector<8x128xf32>
      %220 = arith.mulf %219, %218 : vector<8x128xf32>
      %221 = math.tanh %220 : vector<8x128xf32>
      %cst_86 = arith.constant 5.000000e-01 : f32
      %222 = vector.broadcast %cst_86 : f32 to vector<8x128xf32>
      %223 = arith.mulf %222, %221 : vector<8x128xf32>
      %cst_87 = arith.constant 5.000000e-01 : f32
      %224 = vector.broadcast %cst_87 : f32 to vector<8x128xf32>
      %225 = arith.addf %223, %224 : vector<8x128xf32>
      %226 = vector.extract_strided_slice %217 {offsets = [0, 128], sizes = [8, 128], strides = [1, 1]} : vector<8x512xf32> to vector<8x128xf32>
      %cst_88 = arith.constant 5.000000e-01 : f32
      %227 = vector.broadcast %cst_88 : f32 to vector<8x128xf32>
      %228 = arith.mulf %227, %226 : vector<8x128xf32>
      %229 = math.tanh %228 : vector<8x128xf32>
      %cst_89 = arith.constant 5.000000e-01 : f32
      %230 = vector.broadcast %cst_89 : f32 to vector<8x128xf32>
      %231 = arith.mulf %230, %229 : vector<8x128xf32>
      %cst_90 = arith.constant 5.000000e-01 : f32
      %232 = vector.broadcast %cst_90 : f32 to vector<8x128xf32>
      %233 = arith.addf %231, %232 : vector<8x128xf32>
      %234 = vector.extract_strided_slice %217 {offsets = [0, 256], sizes = [8, 128], strides = [1, 1]} : vector<8x512xf32> to vector<8x128xf32>
      %235 = math.tanh %234 : vector<8x128xf32>
      %236 = vector.extract_strided_slice %217 {offsets = [0, 384], sizes = [8, 128], strides = [1, 1]} : vector<8x512xf32> to vector<8x128xf32>
      %cst_91 = arith.constant 5.000000e-01 : f32
      %237 = vector.broadcast %cst_91 : f32 to vector<8x128xf32>
      %238 = arith.mulf %237, %236 : vector<8x128xf32>
      %239 = math.tanh %238 : vector<8x128xf32>
      %cst_92 = arith.constant 5.000000e-01 : f32
      %240 = vector.broadcast %cst_92 : f32 to vector<8x128xf32>
      %241 = arith.mulf %240, %239 : vector<8x128xf32>
      %cst_93 = arith.constant 5.000000e-01 : f32
      %242 = vector.broadcast %cst_93 : f32 to vector<8x128xf32>
      %243 = arith.addf %241, %242 : vector<8x128xf32>
      %244 = arith.mulf %233, %159 : vector<8x128xf32>
      %245 = arith.mulf %225, %235 : vector<8x128xf32>
      %246 = arith.addf %244, %245 : vector<8x128xf32>
      %247 = math.tanh %246 : vector<8x128xf32>
      %248 = arith.mulf %243, %247 : vector<8x128xf32>
      %249 = vector.shape_cast %210 : vector<8x1xi1> to vector<8x1xi1>
      %250 = vector.broadcast %249 : vector<8x1xi1> to vector<8x128xi1>
      %251 = arith.select %250, %248, %156 : vector<8x128xi1>, vector<8x128xf32>
      %252 = vector.shape_cast %210 : vector<8x1xi1> to vector<8x1xi1>
      %253 = vector.broadcast %252 : vector<8x1xi1> to vector<8x128xi1>
      %254 = arith.select %253, %246, %159 : vector<8x128xi1>, vector<8x128xf32>
      %255 = arith.truncf %251 : vector<8x128xf32> to vector<8x128xbf16>
      %c0_94 = arith.constant 0 : index
      %c0_95 = arith.constant 0 : index
      %256 = vector.load %arg6[%c0_94, %c0_95] : memref<128x512xbf16, #tpu.memory_space<vmem>>, vector<128x512xbf16>
      %cst_96 = arith.constant dense<0.000000e+00> : vector<8x512xf32>
      %257 = tpu.matmul %255, %256, %cst_96 {dimension_numbers = #tpu.dot_dimension_numbers<[1], [0], [0], [1], [0, 0, 1, 1], [], []>} : vector<8x128xbf16>, vector<128x512xbf16>, vector<8x512xf32> -> vector<8x512xf32>
      %c0_97 = arith.constant 0 : index
      %c0_98 = arith.constant 0 : index
      %258 = vector.load %arg7[%c0_97, %c0_98] : memref<1x512xf32, #tpu.memory_space<vmem>>, vector<1x512xf32>
      %259 = vector.broadcast %258 : vector<1x512xf32> to vector<8x512xf32>
      %260 = arith.addf %257, %259 : vector<8x512xf32>
      %261 = arith.truncf %203 : vector<8x128xf32> to vector<8x128xbf16>
      %c0_99 = arith.constant 0 : index
      %c0_100 = arith.constant 0 : index
      %262 = vector.load %arg5[%c0_99, %c0_100] : memref<128x512xbf16, #tpu.memory_space<vmem>>, vector<128x512xbf16>
      %cst_101 = arith.constant dense<0.000000e+00> : vector<8x512xf32>
      %263 = tpu.matmul %261, %262, %cst_101 {dimension_numbers = #tpu.dot_dimension_numbers<[1], [0], [0], [1], [0, 0, 1, 1], [], []>} : vector<8x128xbf16>, vector<128x512xbf16>, vector<8x512xf32> -> vector<8x512xf32>
      %264 = arith.addf %260, %263 : vector<8x512xf32>
      %265 = vector.extract_strided_slice %264 {offsets = [0, 0], sizes = [8, 128], strides = [1, 1]} : vector<8x512xf32> to vector<8x128xf32>
      %cst_102 = arith.constant 5.000000e-01 : f32
      %266 = vector.broadcast %cst_102 : f32 to vector<8x128xf32>
      %267 = arith.mulf %266, %265 : vector<8x128xf32>
      %268 = math.tanh %267 : vector<8x128xf32>
      %cst_103 = arith.constant 5.000000e-01 : f32
      %269 = vector.broadcast %cst_103 : f32 to vector<8x128xf32>
      %270 = arith.mulf %269, %268 : vector<8x128xf32>
      %cst_104 = arith.constant 5.000000e-01 : f32
      %271 = vector.broadcast %cst_104 : f32 to vector<8x128xf32>
      %272 = arith.addf %270, %271 : vector<8x128xf32>
      %273 = vector.extract_strided_slice %264 {offsets = [0, 128], sizes = [8, 128], strides = [1, 1]} : vector<8x512xf32> to vector<8x128xf32>
      %cst_105 = arith.constant 5.000000e-01 : f32
      %274 = vector.broadcast %cst_105 : f32 to vector<8x128xf32>
      %275 = arith.mulf %274, %273 : vector<8x128xf32>
      %276 = math.tanh %275 : vector<8x128xf32>
      %cst_106 = arith.constant 5.000000e-01 : f32
      %277 = vector.broadcast %cst_106 : f32 to vector<8x128xf32>
      %278 = arith.mulf %277, %276 : vector<8x128xf32>
      %cst_107 = arith.constant 5.000000e-01 : f32
      %279 = vector.broadcast %cst_107 : f32 to vector<8x128xf32>
      %280 = arith.addf %278, %279 : vector<8x128xf32>
      %281 = vector.extract_strided_slice %264 {offsets = [0, 256], sizes = [8, 128], strides = [1, 1]} : vector<8x512xf32> to vector<8x128xf32>
      %282 = math.tanh %281 : vector<8x128xf32>
      %283 = vector.extract_strided_slice %264 {offsets = [0, 384], sizes = [8, 128], strides = [1, 1]} : vector<8x512xf32> to vector<8x128xf32>
      %cst_108 = arith.constant 5.000000e-01 : f32
      %284 = vector.broadcast %cst_108 : f32 to vector<8x128xf32>
      %285 = arith.mulf %284, %283 : vector<8x128xf32>
      %286 = math.tanh %285 : vector<8x128xf32>
      %cst_109 = arith.constant 5.000000e-01 : f32
      %287 = vector.broadcast %cst_109 : f32 to vector<8x128xf32>
      %288 = arith.mulf %287, %286 : vector<8x128xf32>
      %cst_110 = arith.constant 5.000000e-01 : f32
      %289 = vector.broadcast %cst_110 : f32 to vector<8x128xf32>
      %290 = arith.addf %288, %289 : vector<8x128xf32>
      %291 = arith.mulf %280, %206 : vector<8x128xf32>
      %292 = arith.mulf %272, %282 : vector<8x128xf32>
      %293 = arith.addf %291, %292 : vector<8x128xf32>
      %294 = math.tanh %293 : vector<8x128xf32>
      %295 = arith.mulf %290, %294 : vector<8x128xf32>
      %296 = vector.shape_cast %210 : vector<8x1xi1> to vector<8x1xi1>
      %297 = vector.broadcast %296 : vector<8x1xi1> to vector<8x128xi1>
      %298 = arith.select %297, %295, %203 : vector<8x128xi1>, vector<8x128xf32>
      %299 = vector.shape_cast %210 : vector<8x1xi1> to vector<8x1xi1>
      %300 = vector.broadcast %299 : vector<8x1xi1> to vector<8x128xi1>
      %301 = arith.select %300, %293, %206 : vector<8x128xi1>, vector<8x128xf32>
      %c3_i32 = arith.constant 3 : i32
      %c4_i32_111 = arith.constant 4 : i32
      %302 = arith.muli %arg0, %c4_i32_111 : i32
      %303 = arith.addi %302, %c3_i32 : i32
      %304 = vector.broadcast %303 : i32 to vector<8x1xi32>
      %305 = arith.cmpi sgt, %8, %304 : vector<8x1xi32>
      %306 = arith.index_cast %c3_i32 : i32 to index
      %c0_112 = arith.constant 0 : index
      %c0_113 = arith.constant 0 : index
      %307 = vector.load %arg3[%306, %c0_112, %c0_113] : memref<4x8x512xf32, #tpu.memory_space<vmem>>, vector<1x8x512xf32>
      %308 = vector.shape_cast %307 : vector<1x8x512xf32> to vector<8x512xf32>
      %309 = arith.truncf %251 : vector<8x128xf32> to vector<8x128xbf16>
      %c0_114 = arith.constant 0 : index
      %c0_115 = arith.constant 0 : index
      %310 = vector.load %arg4[%c0_114, %c0_115] : memref<128x512xbf16, #tpu.memory_space<vmem>>, vector<128x512xbf16>
      %cst_116 = arith.constant dense<0.000000e+00> : vector<8x512xf32>
      %311 = tpu.matmul %309, %310, %cst_116 {dimension_numbers = #tpu.dot_dimension_numbers<[1], [0], [0], [1], [0, 0, 1, 1], [], []>} : vector<8x128xbf16>, vector<128x512xbf16>, vector<8x512xf32> -> vector<8x512xf32>
      %312 = arith.addf %308, %311 : vector<8x512xf32>
      %313 = vector.extract_strided_slice %312 {offsets = [0, 0], sizes = [8, 128], strides = [1, 1]} : vector<8x512xf32> to vector<8x128xf32>
      %cst_117 = arith.constant 5.000000e-01 : f32
      %314 = vector.broadcast %cst_117 : f32 to vector<8x128xf32>
      %315 = arith.mulf %314, %313 : vector<8x128xf32>
      %316 = math.tanh %315 : vector<8x128xf32>
      %cst_118 = arith.constant 5.000000e-01 : f32
      %317 = vector.broadcast %cst_118 : f32 to vector<8x128xf32>
      %318 = arith.mulf %317, %316 : vector<8x128xf32>
      %cst_119 = arith.constant 5.000000e-01 : f32
      %319 = vector.broadcast %cst_119 : f32 to vector<8x128xf32>
      %320 = arith.addf %318, %319 : vector<8x128xf32>
      %321 = vector.extract_strided_slice %312 {offsets = [0, 128], sizes = [8, 128], strides = [1, 1]} : vector<8x512xf32> to vector<8x128xf32>
      %cst_120 = arith.constant 5.000000e-01 : f32
      %322 = vector.broadcast %cst_120 : f32 to vector<8x128xf32>
      %323 = arith.mulf %322, %321 : vector<8x128xf32>
      %324 = math.tanh %323 : vector<8x128xf32>
      %cst_121 = arith.constant 5.000000e-01 : f32
      %325 = vector.broadcast %cst_121 : f32 to vector<8x128xf32>
      %326 = arith.mulf %325, %324 : vector<8x128xf32>
      %cst_122 = arith.constant 5.000000e-01 : f32
      %327 = vector.broadcast %cst_122 : f32 to vector<8x128xf32>
      %328 = arith.addf %326, %327 : vector<8x128xf32>
      %329 = vector.extract_strided_slice %312 {offsets = [0, 256], sizes = [8, 128], strides = [1, 1]} : vector<8x512xf32> to vector<8x128xf32>
      %330 = math.tanh %329 : vector<8x128xf32>
      %331 = vector.extract_strided_slice %312 {offsets = [0, 384], sizes = [8, 128], strides = [1, 1]} : vector<8x512xf32> to vector<8x128xf32>
      %cst_123 = arith.constant 5.000000e-01 : f32
      %332 = vector.broadcast %cst_123 : f32 to vector<8x128xf32>
      %333 = arith.mulf %332, %331 : vector<8x128xf32>
      %334 = math.tanh %333 : vector<8x128xf32>
      %cst_124 = arith.constant 5.000000e-01 : f32
      %335 = vector.broadcast %cst_124 : f32 to vector<8x128xf32>
      %336 = arith.mulf %335, %334 : vector<8x128xf32>
      %cst_125 = arith.constant 5.000000e-01 : f32
      %337 = vector.broadcast %cst_125 : f32 to vector<8x128xf32>
      %338 = arith.addf %336, %337 : vector<8x128xf32>
      %339 = arith.mulf %328, %254 : vector<8x128xf32>
      %340 = arith.mulf %320, %330 : vector<8x128xf32>
      %341 = arith.addf %339, %340 : vector<8x128xf32>
      %342 = math.tanh %341 : vector<8x128xf32>
      %343 = arith.mulf %338, %342 : vector<8x128xf32>
      %344 = vector.shape_cast %305 : vector<8x1xi1> to vector<8x1xi1>
      %345 = vector.broadcast %344 : vector<8x1xi1> to vector<8x128xi1>
      %346 = arith.select %345, %343, %251 : vector<8x128xi1>, vector<8x128xf32>
      %347 = vector.shape_cast %305 : vector<8x1xi1> to vector<8x1xi1>
      %348 = vector.broadcast %347 : vector<8x1xi1> to vector<8x128xi1>
      %349 = arith.select %348, %341, %254 : vector<8x128xi1>, vector<8x128xf32>
      %350 = arith.truncf %346 : vector<8x128xf32> to vector<8x128xbf16>
      %c0_126 = arith.constant 0 : index
      %c0_127 = arith.constant 0 : index
      %351 = vector.load %arg6[%c0_126, %c0_127] : memref<128x512xbf16, #tpu.memory_space<vmem>>, vector<128x512xbf16>
      %cst_128 = arith.constant dense<0.000000e+00> : vector<8x512xf32>
      %352 = tpu.matmul %350, %351, %cst_128 {dimension_numbers = #tpu.dot_dimension_numbers<[1], [0], [0], [1], [0, 0, 1, 1], [], []>} : vector<8x128xbf16>, vector<128x512xbf16>, vector<8x512xf32> -> vector<8x512xf32>
      %c0_129 = arith.constant 0 : index
      %c0_130 = arith.constant 0 : index
      %353 = vector.load %arg7[%c0_129, %c0_130] : memref<1x512xf32, #tpu.memory_space<vmem>>, vector<1x512xf32>
      %354 = vector.broadcast %353 : vector<1x512xf32> to vector<8x512xf32>
      %355 = arith.addf %352, %354 : vector<8x512xf32>
      %356 = arith.truncf %298 : vector<8x128xf32> to vector<8x128xbf16>
      %c0_131 = arith.constant 0 : index
      %c0_132 = arith.constant 0 : index
      %357 = vector.load %arg5[%c0_131, %c0_132] : memref<128x512xbf16, #tpu.memory_space<vmem>>, vector<128x512xbf16>
      %cst_133 = arith.constant dense<0.000000e+00> : vector<8x512xf32>
      %358 = tpu.matmul %356, %357, %cst_133 {dimension_numbers = #tpu.dot_dimension_numbers<[1], [0], [0], [1], [0, 0, 1, 1], [], []>} : vector<8x128xbf16>, vector<128x512xbf16>, vector<8x512xf32> -> vector<8x512xf32>
      %359 = arith.addf %355, %358 : vector<8x512xf32>
      %360 = vector.extract_strided_slice %359 {offsets = [0, 0], sizes = [8, 128], strides = [1, 1]} : vector<8x512xf32> to vector<8x128xf32>
      %cst_134 = arith.constant 5.000000e-01 : f32
      %361 = vector.broadcast %cst_134 : f32 to vector<8x128xf32>
      %362 = arith.mulf %361, %360 : vector<8x128xf32>
      %363 = math.tanh %362 : vector<8x128xf32>
      %cst_135 = arith.constant 5.000000e-01 : f32
      %364 = vector.broadcast %cst_135 : f32 to vector<8x128xf32>
      %365 = arith.mulf %364, %363 : vector<8x128xf32>
      %cst_136 = arith.constant 5.000000e-01 : f32
      %366 = vector.broadcast %cst_136 : f32 to vector<8x128xf32>
      %367 = arith.addf %365, %366 : vector<8x128xf32>
      %368 = vector.extract_strided_slice %359 {offsets = [0, 128], sizes = [8, 128], strides = [1, 1]} : vector<8x512xf32> to vector<8x128xf32>
      %cst_137 = arith.constant 5.000000e-01 : f32
      %369 = vector.broadcast %cst_137 : f32 to vector<8x128xf32>
      %370 = arith.mulf %369, %368 : vector<8x128xf32>
      %371 = math.tanh %370 : vector<8x128xf32>
      %cst_138 = arith.constant 5.000000e-01 : f32
      %372 = vector.broadcast %cst_138 : f32 to vector<8x128xf32>
      %373 = arith.mulf %372, %371 : vector<8x128xf32>
      %cst_139 = arith.constant 5.000000e-01 : f32
      %374 = vector.broadcast %cst_139 : f32 to vector<8x128xf32>
      %375 = arith.addf %373, %374 : vector<8x128xf32>
      %376 = vector.extract_strided_slice %359 {offsets = [0, 256], sizes = [8, 128], strides = [1, 1]} : vector<8x512xf32> to vector<8x128xf32>
      %377 = math.tanh %376 : vector<8x128xf32>
      %378 = vector.extract_strided_slice %359 {offsets = [0, 384], sizes = [8, 128], strides = [1, 1]} : vector<8x512xf32> to vector<8x128xf32>
      %cst_140 = arith.constant 5.000000e-01 : f32
      %379 = vector.broadcast %cst_140 : f32 to vector<8x128xf32>
      %380 = arith.mulf %379, %378 : vector<8x128xf32>
      %381 = math.tanh %380 : vector<8x128xf32>
      %cst_141 = arith.constant 5.000000e-01 : f32
      %382 = vector.broadcast %cst_141 : f32 to vector<8x128xf32>
      %383 = arith.mulf %382, %381 : vector<8x128xf32>
      %cst_142 = arith.constant 5.000000e-01 : f32
      %384 = vector.broadcast %cst_142 : f32 to vector<8x128xf32>
      %385 = arith.addf %383, %384 : vector<8x128xf32>
      %386 = arith.mulf %375, %301 : vector<8x128xf32>
      %387 = arith.mulf %367, %377 : vector<8x128xf32>
      %388 = arith.addf %386, %387 : vector<8x128xf32>
      %389 = math.tanh %388 : vector<8x128xf32>
      %390 = arith.mulf %385, %389 : vector<8x128xf32>
      %391 = vector.shape_cast %305 : vector<8x1xi1> to vector<8x1xi1>
      %392 = vector.broadcast %391 : vector<8x1xi1> to vector<8x128xi1>
      %393 = arith.select %392, %390, %298 : vector<8x128xi1>, vector<8x128xf32>
      %394 = vector.shape_cast %305 : vector<8x1xi1> to vector<8x1xi1>
      %395 = vector.broadcast %394 : vector<8x1xi1> to vector<8x128xi1>
      %396 = arith.select %395, %388, %301 : vector<8x128xi1>, vector<8x128xf32>
      %c4_i32_143 = arith.constant 4 : i32
      %c0_144 = arith.constant 0 : index
      %c0_145 = arith.constant 0 : index
      %c0_146 = arith.constant 0 : index
      %397 = vector.load %arg8[%c0_144, %c0_145, %c0_146] : memref<2x8x128xf32, #tpu.memory_space<vmem>>, vector<1x8x128xf32>
      %398 = vector.shape_cast %397 : vector<1x8x128xf32> to vector<8x128xf32>
      %399 = vector.shape_cast %346 : vector<8x128xf32> to vector<1x8x128xf32>
      tpu.vector_store %arg8[%c0_144, %c0_145, %c0_146], %399 {strides = array<i32>} : memref<2x8x128xf32, #tpu.memory_space<vmem>>, vector<1x8x128xf32>,
      %c0_147 = arith.constant 0 : index
      %c0_148 = arith.constant 0 : index
      %c0_149 = arith.constant 0 : index
      %400 = vector.load %arg9[%c0_147, %c0_148, %c0_149] : memref<2x8x128xf32, #tpu.memory_space<vmem>>, vector<1x8x128xf32>
      %401 = vector.shape_cast %400 : vector<1x8x128xf32> to vector<8x128xf32>
      %402 = vector.shape_cast %349 : vector<8x128xf32> to vector<1x8x128xf32>
      tpu.vector_store %arg9[%c0_147, %c0_148, %c0_149], %402 {strides = array<i32>} : memref<2x8x128xf32, #tpu.memory_space<vmem>>, vector<1x8x128xf32>,
      %c1_150 = arith.constant 1 : index
      %c0_151 = arith.constant 0 : index
      %c0_152 = arith.constant 0 : index
      %403 = vector.load %arg8[%c1_150, %c0_151, %c0_152] : memref<2x8x128xf32, #tpu.memory_space<vmem>>, vector<1x8x128xf32>
      %404 = vector.shape_cast %403 : vector<1x8x128xf32> to vector<8x128xf32>
      %405 = vector.shape_cast %393 : vector<8x128xf32> to vector<1x8x128xf32>
      tpu.vector_store %arg8[%c1_150, %c0_151, %c0_152], %405 {strides = array<i32>} : memref<2x8x128xf32, #tpu.memory_space<vmem>>, vector<1x8x128xf32>,
      %c1_153 = arith.constant 1 : index
      %c0_154 = arith.constant 0 : index
      %c0_155 = arith.constant 0 : index
      %406 = vector.load %arg9[%c1_153, %c0_154, %c0_155] : memref<2x8x128xf32, #tpu.memory_space<vmem>>, vector<1x8x128xf32>
      %407 = vector.shape_cast %406 : vector<1x8x128xf32> to vector<8x128xf32>
      %408 = vector.shape_cast %396 : vector<8x128xf32> to vector<1x8x128xf32>
      tpu.vector_store %arg9[%c1_153, %c0_154, %c0_155], %408 {strides = array<i32>} : memref<2x8x128xf32, #tpu.memory_space<vmem>>, vector<1x8x128xf32>,
    } else {
    }
    return
  }
  func.func @transform_0(%arg0: i32, %arg1: memref<1xi32, #tpu.memory_space<smem>>) -> (i32, i32) {
    %c0_i32 = arith.constant 0 : i32
    %c0_i32_0 = arith.constant 0 : i32
    %c0_i32_1 = arith.constant 0 : i32
    return %c0_i32, %c0_i32_0 : i32, i32
  }
  func.func @transform_1(%arg0: i32, %arg1: memref<1xi32, #tpu.memory_space<smem>>) -> (i32, i32, i32) {
    %c0_i32 = arith.constant 0 : i32
    %c0_i32_0 = arith.constant 0 : i32
    %c0_i32_1 = arith.constant 0 : i32
    return %arg0, %c0_i32, %c0_i32_0 : i32, i32, i32
  }
  func.func @transform_2(%arg0: i32, %arg1: memref<1xi32, #tpu.memory_space<smem>>) -> (i32, i32) {
    %c0_i32 = arith.constant 0 : i32
    %c0_i32_0 = arith.constant 0 : i32
    %c0_i32_1 = arith.constant 0 : i32
    return %c0_i32, %c0_i32_0 : i32, i32
  }
  func.func @transform_3(%arg0: i32, %arg1: memref<1xi32, #tpu.memory_space<smem>>) -> (i32, i32) {
    %c0_i32 = arith.constant 0 : i32
    %c0_i32_0 = arith.constant 0 : i32
    %c0_i32_1 = arith.constant 0 : i32
    return %c0_i32, %c0_i32_0 : i32, i32
  }
  func.func @transform_4(%arg0: i32, %arg1: memref<1xi32, #tpu.memory_space<smem>>) -> (i32, i32) {
    %c0_i32 = arith.constant 0 : i32
    %c0_i32_0 = arith.constant 0 : i32
    %c0_i32_1 = arith.constant 0 : i32
    return %c0_i32, %c0_i32_0 : i32, i32
  }
  func.func @transform_5(%arg0: i32, %arg1: memref<1xi32, #tpu.memory_space<smem>>) -> (i32, i32) {
    %c0_i32 = arith.constant 0 : i32
    %c0_i32_0 = arith.constant 0 : i32
    %c0_i32_1 = arith.constant 0 : i32
    return %c0_i32, %c0_i32_0 : i32, i32
  }
  func.func @transform_6(%arg0: i32, %arg1: memref<1xi32, #tpu.memory_space<smem>>) -> (i32, i32, i32) {
    %c0_i32 = arith.constant 0 : i32
    %c0_i32_0 = arith.constant 0 : i32
    %c0_i32_1 = arith.constant 0 : i32
    %c0_i32_2 = arith.constant 0 : i32
    return %c0_i32, %c0_i32_0, %c0_i32_1 : i32, i32, i32
  }
  func.func @transform_7(%arg0: i32, %arg1: memref<1xi32, #tpu.memory_space<smem>>) -> (i32, i32, i32) {
    %c0_i32 = arith.constant 0 : i32
    %c0_i32_0 = arith.constant 0 : i32
    %c0_i32_1 = arith.constant 0 : i32
    %c0_i32_2 = arith.constant 0 : i32
    return %c0_i32, %c0_i32_0, %c0_i32_1 : i32, i32, i32
  }
}

</mosaic_0001>

<bundles_post_ra>
// kernel: condition_encoder_forward.2
= control target key start
LH: loop header
LB: loop body
LE: loop exit
PB: predicated region body
PF: predicated region fallthrough
CT: control target
= control target key end

     0   :  { %v1120_v0 = vmov 0.0   ;;  %s1669_s0 = inlined_call_operand.<no memory space> [shape: s32[1], index: 0, kind: input, shape index: {}]   ;;  %s1670_s1 = inlined_call_operand.vmem [shape: s32[8,1], index: 1, kind: input, shape index: {}]   ;;  %s1671_s2 = inlined_call_operand.vmem [shape: f32[6,8,512], index: 2, kind: input, shape index: {}]   ;;  %s1672_s3 = inlined_call_operand.vmem [shape: bf16[128,512], index: 3, kind: input, shape index: {}]   ;;  %s1673_s4 = inlined_call_operand.vmem [shape: f32[1,8,128], index: 4, kind: output, shape index: {0}]   ;;  %s1674_s5 = inlined_call_operand.vmem [shape: f32[1,8,128], index: 5, kind: output, shape index: {1}]  }
   0x1   :  { %23 = vst [vmem:[%s1673_s4] sm:$0xff] %v1120_v0  ;;  %24 = vst [vmem:[%s1674_s5] sm:$0xff] %v1120_v0  ;;  %p955_p0 = scmp.le.s32.totalorder %s1669_s0, 0 }
   0x3   :  { %30 = sbr.rel (%p955_p0) target bundleno = 1481 (0x5c9), region = 21 }
   0x8   :  { %v1164_v1 = vld [vmem:[%s1672_s3 + $0xe4] ss:$16 sps:$4 sm:$0xff]   ;;  %v1169_v2 = vld [vmem:[%s1672_s3 + $0xe0] ss:$16 sps:$4 sm:$0xff]   ;;  %v1121_v3 = vmov 0   ;;  %v37_v42 = vld [vmem:[%s1671_s2 + $0x8] sm:$0xff] }
   0x9   :  { %265 = vmatprep.mubr.bf16.mxu0 %v1121_v3  ;;  %306 = vmatprep.mubr.bf16.mxu1 %v1121_v3  ;;  %v1177_v4 = vld [vmem:[%s1672_s3 + $0xec] ss:$16 sps:$4 sm:$0xff]   ;;  %v1182_v5 = vld [vmem:[%s1672_s3 + $0xe8] ss:$16 sps:$4 sm:$0xff]   ;;  %v1189_v6 = vld [vmem:[%s1672_s3 + $0xc4] ss:$16 sps:$4 sm:$0xff]  }
   0xa   :  { %233 = vmatprep.subr.bf16.mxu0 %v1164_v1  ;;  %1010 = vset.pattern.permute.xlu0 %v1121_v3  ;;  %v1194_v7 = vld [vmem:[%s1672_s3 + $0xc0] ss:$16 sps:$4 sm:$0xff]   ;;  %v1201_v8 = vld [vmem:[%s1672_s3 + $0xcc] ss:$16 sps:$4 sm:$0xff]   ;;  %v1208_v9 = vld [vmem:[%s1672_s3 + $0xc8] ss:$16 sps:$4 sm:$0xff]  }
   0xb   :  { %234 = vmatpush1.bf16.msra.mxu0 %v1169_v2  ;;  %1011 = vset.pattern.permute.xlu1 %v1121_v3  ;;  %v1214_v10 = vld [vmem:[%s1672_s3 + $0xa4] ss:$16 sps:$4 sm:$0xff]   ;;  %v1220_v11 = vld [vmem:[%s1672_s3 + $0xa0] ss:$16 sps:$4 sm:$0xff]   ;;  %v1225_v12 = vld [vmem:[%s1672_s3 + $0xac] ss:$16 sps:$4 sm:$0xff]  }
   0xc   :  { %274 = vmatprep.subr.bf16.mxu1 %v1177_v4  ;;  %235 = vmatprep.subr.bf16.mxu0 %v1189_v6  ;;  %v1231_v13 = vld [vmem:[%s1672_s3 + $0x84] ss:$16 sps:$4 sm:$0xff]   ;;  %v1237_v14 = vld [vmem:[%s1672_s3 + $0xa8] ss:$16 sps:$4 sm:$0xff]   ;;  %v1243_v15 = vld [vmem:[%s1672_s3 + $0x8c] ss:$16 sps:$4 sm:$0xff]  }
   0xd   :  { %275 = vmatpush1.bf16.msra.mxu1 %v1182_v5  ;;  %v1249_v16 = vld [vmem:[%s1672_s3 + $0x80] ss:$16 sps:$4 sm:$0xff]   ;;  %v1255_v17 = vld [vmem:[%s1672_s3 + $0x64] ss:$16 sps:$4 sm:$0xff]   ;;  %v1261_v18 = vld [vmem:[%s1672_s3 + $0x88] ss:$16 sps:$4 sm:$0xff]  }
   0xe   :  { %276 = vmatprep.subr.bf16.mxu1 %v1201_v8  ;;  %v1267_v19 = vld [vmem:[%s1672_s3 + $0x6c] ss:$16 sps:$4 sm:$0xff]   ;;  %v1273_v20 = vld [vmem:[%s1672_s3 + $0x60] ss:$16 sps:$4 sm:$0xff]   ;;  %v1279_v21 = vld [vmem:[%s1672_s3 + $0x44] ss:$16 sps:$4 sm:$0xff]  }
   0xf   :  { %236 = vmatpush1.bf16.msra.mxu0 %v1194_v7  ;;  %v1285_v22 = vld [vmem:[%s1672_s3 + $0x68] ss:$16 sps:$4 sm:$0xff]   ;;  %v1291_v23 = vld [vmem:[%s1672_s3 + $0x4c] ss:$16 sps:$4 sm:$0xff]   ;;  %v1297_v24 = vld [vmem:[%s1672_s3 + $0x40] ss:$16 sps:$4 sm:$0xff]  }
  0x10   :  { %237 = vmatprep.subr.bf16.mxu0 %v1214_v10  ;;  %v1303_v25 = vld [vmem:[%s1672_s3 + $0x24] ss:$16 sps:$4 sm:$0xff]   ;;  %v1309_v26 = vld [vmem:[%s1672_s3 + $0x48] ss:$16 sps:$4 sm:$0xff]   ;;  %v1320_v28 = vld [vmem:[%s1672_s3 + $0x2c] ss:$16 sps:$4 sm:$0xff]  }
  0x11   :  { %277 = vmatpush1.bf16.msra.mxu1 %v1208_v9  ;;  %v1314_v27 = vld [vmem:[%s1670_s1] sm:$0xff]  ;;  %v1341_v32 = vld [vmem:[%s1672_s3 + $0x28] ss:$16 sps:$4 sm:$0xff]   ;;  %v1348_v34 = vld [vmem:[%s1672_s3 + $0xc] ss:$16 sps:$4 sm:$0xff]  }
  0x12   :  { %278 = vmatprep.subr.bf16.mxu1 %v1225_v12  ;;  %vm35_vm0 = vcmp.gt.s32.totalorder %v1314_v27, 0  ;;  %vm346_vm1 = vcmp.gt.s32.totalorder %v1314_v27, 1  ;;  %v1328_v29 = vld [vmem:[%s1672_s3 + $0x20] ss:$16 sps:$4 sm:$0xff]   ;;  %v1335_v31 = vld [vmem:[%s1672_s3 + $0x4] ss:$16 sps:$4 sm:$0xff]  }
  0x13   :  { %238 = vmatpush1.bf16.msra.mxu0 %v1220_v11  ;;  %v337_v30 = vsel %vm35_vm0, 1, %v1121_v3  ;;  %v457_v33 = vsel %vm346_vm1, 1, %v1121_v3  ;;  %vm706_vm2 = vcmp.gt.s32.totalorder %v1314_v27, 4  ;;  %v1355_v35 = vld [vmem:[%s1672_s3] ss:$16 sps:$4 sm:$0xff]   ;;  %v39_v56 = vld [vmem:[%s1671_s2 + $0x18] sm:$0xff] }
  0x14   :  { %239 = vmatprep.subr.bf16.mxu0 %v1231_v13  ;;  %339 = vperm.xlu0 %1010, %v337_v30   ;;  %v1360_v36 = vld [vmem:[%s1673_s4] sm:$0xff]  ;;  %v1367_v37 = vld [vmem:[%s1672_s3 + $0x8] ss:$16 sps:$4 sm:$0xff]   ;;  %v817_v38 = vsel %vm706_vm2, 1, %v1121_v3  ;;  %v38_v45 = vld [vmem:[%s1671_s2 + $0x10] sm:$0xff]  ;;  %vm466_vm4 = vcmp.gt.s32.totalorder %v1314_v27, 2 }
  0x15   :  { %279 = vmatpush1.bf16.msra.mxu1 %v1237_v14  ;;  %v40_v39 = vpack.c.bf16 %v1360_v36, %v1360_v36  ;;  %v36_v40 = vld [vmem:[%s1671_s2] sm:$0xff]  ;;  %vm586_vm5 = vcmp.gt.s32.totalorder %v1314_v27, 3  ;;  %vm826_vm6 = vcmp.gt.s32.totalorder %v1314_v27, 5  ;;  %v990_v27 = vld [vmem:[%s1671_s2 + $0x30] sm:$0xff] }
  0x16   :  { %280 = vmatprep.subr.bf16.mxu1 %v1243_v15  ;;  %v33_v30 = vld [vmem:[%s1674_s5] sm:$0xff] }
  0x17   :  { %240 = vmatpush1.bf16.msra.mxu0 %v1249_v16 }
  0x18   :  { %241 = vmatprep.subr.bf16.mxu0 %v1255_v17  ;;  %459 = vperm.xlu0 %1010, %v457_v33  }
  0x19   :  { %281 = vmatpush1.bf16.msra.mxu1 %v1261_v18 }
  0x1a   :  { %282 = vmatprep.subr.bf16.mxu1 %v1267_v19 }
  0x1b   :  { %242 = vmatpush1.bf16.msra.mxu0 %v1273_v20 }
  0x1c   :  { %243 = vmatprep.subr.bf16.mxu0 %v1279_v21  ;;  %819 = vperm.xlu0 %1010, %v817_v38  }
  0x1d   :  { %283 = vmatpush1.bf16.msra.mxu1 %v1285_v22 }
  0x1e   :  { %284 = vmatprep.subr.bf16.mxu1 %v1291_v23 }
  0x1f   :  { %244 = vmatpush1.bf16.msra.mxu0 %v1297_v24 }
  0x20   :  { %245 = vmatprep.subr.bf16.mxu0 %v1303_v25 }
  0x21   :  { %285 = vmatpush1.bf16.msra.mxu1 %v1309_v26 }
  0x22   :  { %286 = vmatprep.subr.bf16.mxu1 %v1320_v28 }
  0x23   :  { %246 = vmatpush1.bf16.msra.mxu0 %v1328_v29 }
  0x24   :  { %247 = vmatprep.subr.bf16.mxu0 %v1335_v31 }
  0x25   :  { %287 = vmatpush1.bf16.msra.mxu1 %v1341_v32 }
  0x26   :  { %288 = vmatprep.subr.bf16.mxu1 %v1348_v34 }
  0x27   :  { %248 = vmatpush1.bf16.msra.mxu0 %v1355_v35 }
  0x28   :  { %353 = vmatprep.subr.bf16.mxu0 %v1164_v1 }
  0x29   :  { %289 = vmatpush1.bf16.msra.mxu1 %v1367_v37 }
  0x2a   :  { %266 = vmatmul.mubr.bf16.vlgmr.msra.gmra.mxu0 %v40_v39  ;;  %394 = vmatprep.subr.bf16.mxu1 %v1177_v4 }
  0x2b   :  { %354 = vmatpush1.bf16.msra.mxu0 %v1169_v2  ;;  %385 = vmatprep.mubr.bf16.mxu0 %v1121_v3 }
  0x2c   :  { %307 = vmatmul.mubr.bf16.vlgmr.msra.gmra.mxu1 %v40_v39  ;;  %355 = vmatprep.subr.bf16.mxu0 %v1189_v6 }
  0x2d   :  { %395 = vmatpush1.bf16.msra.mxu1 %v1182_v5  ;;  %426 = vmatprep.mubr.bf16.mxu1 %v1121_v3 }
  0x2e   :  { %396 = vmatprep.subr.bf16.mxu1 %v1201_v8 }
  0x2f   :  { %356 = vmatpush1.bf16.msra.mxu0 %v1194_v7 }
  0x30   :  { %357 = vmatprep.subr.bf16.mxu0 %v1214_v10 }
  0x31   :  { %397 = vmatpush1.bf16.msra.mxu1 %v1208_v9 }
  0x32   :  { %398 = vmatprep.subr.bf16.mxu1 %v1225_v12 }
  0x33   :  { %358 = vmatpush1.bf16.msra.mxu0 %v1220_v11 }
  0x34   :  { %359 = vmatprep.subr.bf16.mxu0 %v1231_v13 }
  0x35   :  { %399 = vmatpush1.bf16.msra.mxu1 %v1237_v14 }
  0x36   :  { %400 = vmatprep.subr.bf16.mxu1 %v1243_v15 }
  0x37   :  { %360 = vmatpush1.bf16.msra.mxu0 %v1249_v16 }
  0x38   :  { %361 = vmatprep.subr.bf16.mxu0 %v1255_v17 }
  0x39   :  { %401 = vmatpush1.bf16.msra.mxu1 %v1261_v18 }
  0x3a   :  { %402 = vmatprep.subr.bf16.mxu1 %v1267_v19 }
  0x3b   :  { %362 = vmatpush1.bf16.msra.mxu0 %v1273_v20 }
  0x3c   :  { %363 = vmatprep.subr.bf16.mxu0 %v1279_v21 }
  0x3d   :  { %403 = vmatpush1.bf16.msra.mxu1 %v1285_v22 }
  0x3e   :  { %404 = vmatprep.subr.bf16.mxu1 %v1291_v23 }
  0x3f   :  { %364 = vmatpush1.bf16.msra.mxu0 %v1297_v24 }
  0x40   :  { %365 = vmatprep.subr.bf16.mxu0 %v1303_v25 }
  0x41   :  { %405 = vmatpush1.bf16.msra.mxu1 %v1309_v26 }
  0x42   :  { %406 = vmatprep.subr.bf16.mxu1 %v1320_v28 }
  0x43   :  { %366 = vmatpush1.bf16.msra.mxu0 %v1328_v29 }
  0x44   :  { %367 = vmatprep.subr.bf16.mxu0 %v1335_v31 }
  0x45   :  { %407 = vmatpush1.bf16.msra.mxu1 %v1341_v32 }
  0x46   :  { %408 = vmatprep.subr.bf16.mxu1 %v1348_v34 }
  0x47   :  { %368 = vmatpush1.bf16.msra.mxu0 %v1355_v35 }
  0x48   :  { %473 = vmatprep.subr.bf16.mxu0 %v1164_v1 }
  0x49   :  { %409 = vmatpush1.bf16.msra.mxu1 %v1367_v37 }
  0x4a   :  { %514 = vmatprep.subr.bf16.mxu1 %v1177_v4 }
  0x8f   :  { %v340_v38 = vpop.permute.xlu0 %339 }
  0x90   :  { %vm341_vm3 = vcmp.eq.s32.totalorder %v340_v38, 1  ;;  %v991_v38 = vld [vmem:[%s1671_s2 + $0x38] sm:$0xff] }
  0xea   :  { %v267_v41 = vpop.f32.mrf.mxu0 }
  0xeb   :  { %v315_v43 = vadd.f32 %v267_v41, %v36_v40 }
  0xec   :  { %v269_v44 = vpop.f32.mrf.mxu0  ;;  %v308_v46 = vpop.f32.mrf.mxu1 }
  0xed   :  { %v319_v47 = vmul.f32 0.5, %v315_v43  ;;  %v316_v48 = vadd.f32 %v269_v44, %v37_v42  ;;  %v317_v52 = vadd.f32 %v308_v46, %v38_v45 }
  0xee   :  { %v271_v49 = vpop.f32.mrf.mxu0  ;;  %v310_v50 = vpop.f32.mrf.mxu1 }
  0xef   :  { %1060 = vtanh.f32 %v319_v47  ;;  %v323_v51 = vmul.f32 0.5, %v316_v48  ;;  %v318_v57 = vadd.f32 %v310_v50, %v39_v56  ;;  %v697_v50 = vsel %vm586_vm5, 1, %v1121_v3 }
  0xf0   :  { %v272_v53 = vpop.f32.mrf.mxu0  ;;  %v312_v54 = vpop.f32.mrf.mxu1 }
  0xf1   :  { %1062 = vtanh.f32 %v323_v51  ;;  %v328_v58 = vmul.f32 0.5, %v318_v57  ;;  %v937_v51 = vsel %vm826_vm6, 1, %v1121_v3 }
  0xf2   :  { %v313_v55 = vpop.f32.mrf.mxu1  ;;  %1064 = vtanh.f32 %v317_v52  ;;  %v988_v52 = vld [vmem:[%s1671_s2 + $0x20] sm:$0xff] }
  0xf3   :  { %1066 = vtanh.f32 %v328_v58  ;;  %v989_v55 = vld [vmem:[%s1671_s2 + $0x28] sm:$0xff] }
  0xfc   :  { %v1061_v59 = vpop.eup %1060 }
  0xfd   :  { %v321_v60 = vmul.f32 0.5, %v1061_v59 }
  0xfe   :  { %v1063_v61 = vpop.eup %1062 }
  0xff   :  { %v322_v62 = vadd.f32 0.5, %v321_v60  ;;  %v325_v63 = vmul.f32 0.5, %v1063_v61  ;;  %v1065_v0 = vpop.eup %1064 }
 0x100   :  { %v1067_v43 = vpop.eup %1066 }
 0x101   :  { %v326_v33 = vadd.f32 0.5, %v325_v63  ;;  %v333_v40 = vmul.f32 %v1065_v0, %v322_v62  ;;  %v330_v44 = vmul.f32 0.5, %v1067_v43 }
 0x103   :  { %v332_v39 = vmul.f32 %v326_v33, %v33_v30  ;;  %v331_v45 = vadd.f32 0.5, %v330_v44 }
 0x105   :  { %v334_v41 = vadd.f32 %v333_v40, %v332_v39 }
 0x107   :  { %1068 = vtanh.f32 %v334_v41  ;;  %v1426_v42 = vsel %vm341_vm3, %v334_v41, %v33_v30 }
 0x114   :  { %v1069_v46 = vpop.eup %1068 }
 0x115   :  { %v336_v47 = vmul.f32 %v1069_v46, %v331_v45 }
 0x117   :  { %v1429_v48 = vsel %vm341_vm3, %v336_v47, %v1360_v36  ;;  %v577_v36 = vsel %vm466_vm4, 1, %v1121_v3 }
 0x118   :  { %v352_v49 = vpack.c.bf16 %v1429_v48, %v1429_v48  ;;  %579 = vperm.xlu1 %1011, %v577_v36  }
 0x11a   :  { %386 = vmatmul.mubr.bf16.vlgmr.msra.gmra.mxu0 %v352_v49  ;;  %427 = vmatmul.mubr.bf16.vlgmr.msra.gmra.mxu1 %v352_v49 }
 0x11b   :  { %474 = vmatpush1.bf16.msra.mxu0 %v1169_v2  ;;  %515 = vmatpush1.bf16.msra.mxu1 %v1182_v5 }
 0x11c   :  { %475 = vmatprep.subr.bf16.mxu0 %v1189_v6  ;;  %516 = vmatprep.subr.bf16.mxu1 %v1201_v8 }
 0x11d   :  { %505 = vmatprep.mubr.bf16.mxu0 %v1121_v3  ;;  %546 = vmatprep.mubr.bf16.mxu1 %v1121_v3 }
 0x11e   :  { %699 = vperm.xlu1 %1011, %v697_v50  }
 0x11f   :  { %476 = vmatpush1.bf16.msra.mxu0 %v1194_v7  ;;  %517 = vmatpush1.bf16.msra.mxu1 %v1208_v9 }
 0x120   :  { %477 = vmatprep.subr.bf16.mxu0 %v1214_v10  ;;  %518 = vmatprep.subr.bf16.mxu1 %v1225_v12 }
 0x122   :  { %939 = vperm.xlu1 %1011, %v937_v51   ;;  %v460_v51 = vpop.permute.xlu0 %459 }
 0x123   :  { %478 = vmatpush1.bf16.msra.mxu0 %v1220_v11  ;;  %519 = vmatpush1.bf16.msra.mxu1 %v1237_v14  ;;  %vm461_vm7 = vcmp.eq.s32.totalorder %v460_v51, 1 }
 0x124   :  { %479 = vmatprep.subr.bf16.mxu0 %v1231_v13  ;;  %520 = vmatprep.subr.bf16.mxu1 %v1243_v15 }
 0x127   :  { %480 = vmatpush1.bf16.msra.mxu0 %v1249_v16  ;;  %521 = vmatpush1.bf16.msra.mxu1 %v1261_v18 }
 0x128   :  { %481 = vmatprep.subr.bf16.mxu0 %v1255_v17  ;;  %522 = vmatprep.subr.bf16.mxu1 %v1267_v19 }
 0x12b   :  { %482 = vmatpush1.bf16.msra.mxu0 %v1273_v20  ;;  %523 = vmatpush1.bf16.msra.mxu1 %v1285_v22 }
 0x12c   :  { %483 = vmatprep.subr.bf16.mxu0 %v1279_v21  ;;  %524 = vmatprep.subr.bf16.mxu1 %v1291_v23 }
 0x12f   :  { %484 = vmatpush1.bf16.msra.mxu0 %v1297_v24  ;;  %525 = vmatpush1.bf16.msra.mxu1 %v1309_v26 }
 0x130   :  { %485 = vmatprep.subr.bf16.mxu0 %v1303_v25  ;;  %526 = vmatprep.subr.bf16.mxu1 %v1320_v28 }
 0x133   :  { %486 = vmatpush1.bf16.msra.mxu0 %v1328_v29  ;;  %527 = vmatpush1.bf16.msra.mxu1 %v1341_v32 }
 0x134   :  { %487 = vmatprep.subr.bf16.mxu0 %v1335_v31  ;;  %528 = vmatprep.subr.bf16.mxu1 %v1348_v34 }
 0x137   :  { %488 = vmatpush1.bf16.msra.mxu0 %v1355_v35  ;;  %529 = vmatpush1.bf16.msra.mxu1 %v1367_v37 }
 0x138   :  { %593 = vmatprep.subr.bf16.mxu0 %v1164_v1  ;;  %634 = vmatprep.subr.bf16.mxu1 %v1177_v4 }
 0x1da   :  { %v387_v53 = vpop.f32.mrf.mxu0  ;;  %v428_v54 = vpop.f32.mrf.mxu1 }
 0x1db   :  { %v435_v56 = vadd.f32 %v988_v52, %v387_v53  ;;  %v437_v33 = vadd.f32 %v990_v27, %v428_v54 }
 0x1dc   :  { %v389_v57 = vpop.f32.mrf.mxu0  ;;  %v430_v58 = vpop.f32.mrf.mxu1 }
 0x1dd   :  { %v439_v59 = vmul.f32 0.5, %v435_v56  ;;  %v436_v60 = vadd.f32 %v989_v55, %v389_v57  ;;  %v438_v39 = vadd.f32 %v991_v38, %v430_v58  ;;  %v994_v38 = vld [vmem:[%s1671_s2 + $0x50] sm:$0xff] }
 0x1de   :  { %v391_v61 = vpop.f32.mrf.mxu0  ;;  %v432_v62 = vpop.f32.mrf.mxu1 }
 0x1df   :  { %1070 = vtanh.f32 %v439_v59  ;;  %v443_v63 = vmul.f32 0.5, %v436_v60  ;;  %v448_v40 = vmul.f32 0.5, %v438_v39  ;;  %v993_v61 = vld [vmem:[%s1671_s2 + $0x48] sm:$0xff] }
 0x1e0   :  { %v392_v0 = vpop.f32.mrf.mxu0  ;;  %v433_v30 = vpop.f32.mrf.mxu1 }
 0x1e1   :  { %1072 = vtanh.f32 %v443_v63 }
 0x1e2   :  { %1074 = vtanh.f32 %v437_v33 }
 0x1e3   :  { %1076 = vtanh.f32 %v448_v40 }
 0x1ec   :  { %v1071_v41 = vpop.eup %1070 }
 0x1ed   :  { %v441_v43 = vmul.f32 0.5, %v1071_v41 }
 0x1ee   :  { %v1073_v44 = vpop.eup %1072 }
 0x1ef   :  { %v442_v45 = vadd.f32 0.5, %v441_v43  ;;  %v445_v46 = vmul.f32 0.5, %v1073_v44  ;;  %v1075_v49 = vpop.eup %1074 }
 0x1f0   :  { %v1077_v54 = vpop.eup %1076 }
 0x1f1   :  { %v446_v47 = vadd.f32 0.5, %v445_v46  ;;  %v453_v50 = vmul.f32 %v1075_v49, %v442_v45  ;;  %v450_v55 = vmul.f32 0.5, %v1077_v54  ;;  %v995_v46 = vld [vmem:[%s1671_s2 + $0x58] sm:$0xff] }
 0x1f3   :  { %v452_v36 = vmul.f32 %v446_v47, %v1426_v42  ;;  %v451_v56 = vadd.f32 0.5, %v450_v55 }
 0x1f5   :  { %v454_v52 = vadd.f32 %v453_v50, %v452_v36 }
 0x1f7   :  { %1078 = vtanh.f32 %v454_v52  ;;  %v1487_v53 = vsel %vm461_vm7, %v454_v52, %v1426_v42  ;;  %v992_v42 = vld [vmem:[%s1671_s2 + $0x40] sm:$0xff] }
 0x204   :  { %v1079_v57 = vpop.eup %1078 }
 0x205   :  { %v456_v58 = vmul.f32 %v1079_v57, %v451_v56  ;;  %v580_v56 = vpop.permute.xlu1 %579 }
 0x206   :  { %vm581_vm8 = vcmp.eq.s32.totalorder %v580_v56, 1 }
 0x207   :  { %v1490_v59 = vsel %vm461_vm7, %v456_v58, %v1429_v48 }
 0x208   :  { %v472_v60 = vpack.c.bf16 %v1490_v59, %v1490_v59 }
 0x20a   :  { %506 = vmatmul.mubr.bf16.vlgmr.msra.gmra.mxu0 %v472_v60  ;;  %547 = vmatmul.mubr.bf16.vlgmr.msra.gmra.mxu1 %v472_v60 }
 0x20b   :  { %594 = vmatpush1.bf16.msra.mxu0 %v1169_v2  ;;  %635 = vmatpush1.bf16.msra.mxu1 %v1182_v5 }
 0x20c   :  { %595 = vmatprep.subr.bf16.mxu0 %v1189_v6  ;;  %636 = vmatprep.subr.bf16.mxu1 %v1201_v8 }
 0x20d   :  { %625 = vmatprep.mubr.bf16.mxu0 %v1121_v3  ;;  %666 = vmatprep.mubr.bf16.mxu1 %v1121_v3 }
 0x20f   :  { %596 = vmatpush1.bf16.msra.mxu0 %v1194_v7  ;;  %637 = vmatpush1.bf16.msra.mxu1 %v1208_v9 }
 0x210   :  { %597 = vmatprep.subr.bf16.mxu0 %v1214_v10  ;;  %638 = vmatprep.subr.bf16.mxu1 %v1225_v12 }
 0x213   :  { %598 = vmatpush1.bf16.msra.mxu0 %v1220_v11  ;;  %639 = vmatpush1.bf16.msra.mxu1 %v1237_v14 }
 0x214   :  { %599 = vmatprep.subr.bf16.mxu0 %v1231_v13  ;;  %640 = vmatprep.subr.bf16.mxu1 %v1243_v15 }
 0x217   :  { %600 = vmatpush1.bf16.msra.mxu0 %v1249_v16  ;;  %641 = vmatpush1.bf16.msra.mxu1 %v1261_v18 }
 0x218   :  { %601 = vmatprep.subr.bf16.mxu0 %v1255_v17  ;;  %642 = vmatprep.subr.bf16.mxu1 %v1267_v19 }
 0x21b   :  { %602 = vmatpush1.bf16.msra.mxu0 %v1273_v20  ;;  %643 = vmatpush1.bf16.msra.mxu1 %v1285_v22 }
 0x21c   :  { %603 = vmatprep.subr.bf16.mxu0 %v1279_v21  ;;  %644 = vmatprep.subr.bf16.mxu1 %v1291_v23 }
 0x21f   :  { %604 = vmatpush1.bf16.msra.mxu0 %v1297_v24  ;;  %645 = vmatpush1.bf16.msra.mxu1 %v1309_v26 }
 0x220   :  { %605 = vmatprep.subr.bf16.mxu0 %v1303_v25  ;;  %646 = vmatprep.subr.bf16.mxu1 %v1320_v28 }
 0x223   :  { %606 = vmatpush1.bf16.msra.mxu0 %v1328_v29  ;;  %647 = vmatpush1.bf16.msra.mxu1 %v1341_v32 }
 0x224   :  { %607 = vmatprep.subr.bf16.mxu0 %v1335_v31  ;;  %648 = vmatprep.subr.bf16.mxu1 %v1348_v34 }
 0x227   :  { %608 = vmatpush1.bf16.msra.mxu0 %v1355_v35  ;;  %649 = vmatpush1.bf16.msra.mxu1 %v1367_v37 }
 0x228   :  { %713 = vmatprep.subr.bf16.mxu0 %v1164_v1  ;;  %754 = vmatprep.subr.bf16.mxu1 %v1177_v4 }
 0x2ca   :  { %v507_v48 = vpop.f32.mrf.mxu0  ;;  %v548_v27 = vpop.f32.mrf.mxu1 }
 0x2cb   :  { %v555_v62 = vadd.f32 %v992_v42, %v507_v48  ;;  %v557_v45 = vadd.f32 %v994_v38, %v548_v27 }
 0x2cc   :  { %v509_v63 = vpop.f32.mrf.mxu0  ;;  %v550_v0 = vpop.f32.mrf.mxu1 }
 0x2cd   :  { %v559_v30 = vmul.f32 0.5, %v555_v62  ;;  %v556_v33 = vadd.f32 %v993_v61, %v509_v63  ;;  %v558_v47 = vadd.f32 %v995_v46, %v550_v0 }
 0x2ce   :  { %v511_v39 = vpop.f32.mrf.mxu0  ;;  %v552_v40 = vpop.f32.mrf.mxu1 }
 0x2cf   :  { %1080 = vtanh.f32 %v559_v30  ;;  %v563_v41 = vmul.f32 0.5, %v556_v33  ;;  %v568_v49 = vmul.f32 0.5, %v558_v47  ;;  %v997_v39 = vld [vmem:[%s1671_s2 + $0x68] sm:$0xff] }
 0x2d0   :  { %v512_v43 = vpop.f32.mrf.mxu0  ;;  %v553_v44 = vpop.f32.mrf.mxu1 }
 0x2d1   :  { %1082 = vtanh.f32 %v563_v41 }
 0x2d2   :  { %1084 = vtanh.f32 %v557_v45 }
 0x2d3   :  { %1086 = vtanh.f32 %v568_v49 }
 0x2dc   :  { %v1081_v36 = vpop.eup %1080 }
 0x2dd   :  { %v561_v50 = vmul.f32 0.5, %v1081_v36 }
 0x2de   :  { %v1083_v51 = vpop.eup %1082 }
 0x2df   :  { %v562_v52 = vadd.f32 0.5, %v561_v50  ;;  %v565_v54 = vmul.f32 0.5, %v1083_v51  ;;  %v1085_v57 = vpop.eup %1084  ;;  %v999_v51 = vld [vmem:[%s1671_s2 + $0x78] sm:$0xff] }
 0x2e0   :  { %v1087_v27 = vpop.eup %1086 }
 0x2e1   :  { %v566_v55 = vadd.f32 0.5, %v565_v54  ;;  %v573_v60 = vmul.f32 %v1085_v57, %v562_v52  ;;  %v570_v61 = vmul.f32 0.5, %v1087_v27 }
 0x2e3   :  { %v572_v58 = vmul.f32 %v566_v55, %v1487_v53  ;;  %v571_v62 = vadd.f32 0.5, %v570_v61 }
 0x2e5   :  { %v574_v42 = vadd.f32 %v573_v60, %v572_v58 }
 0x2e7   :  { %1088 = vtanh.f32 %v574_v42  ;;  %v1542_v48 = vsel %vm581_vm8, %v574_v42, %v1487_v53  ;;  %v996_v53 = vld [vmem:[%s1671_s2 + $0x60] sm:$0xff] }
 0x2f4   :  { %v1089_v63 = vpop.eup %1088 }
 0x2f5   :  { %v576_v0 = vmul.f32 %v1089_v63, %v571_v62  ;;  %v700_v63 = vpop.permute.xlu1 %699 }
 0x2f6   :  { %vm701_vm9 = vcmp.eq.s32.totalorder %v700_v63, 1  ;;  %v1007_v63 = vld [vmem:[%s1671_s2 + $0xb8] sm:$0xff] }
 0x2f7   :  { %v1545_v30 = vsel %vm581_vm8, %v576_v0, %v1490_v59 }
 0x2f8   :  { %v592_v33 = vpack.c.bf16 %v1545_v30, %v1545_v30 }
 0x2fa   :  { %626 = vmatmul.mubr.bf16.vlgmr.msra.gmra.mxu0 %v592_v33  ;;  %667 = vmatmul.mubr.bf16.vlgmr.msra.gmra.mxu1 %v592_v33 }
 0x2fb   :  { %714 = vmatpush1.bf16.msra.mxu0 %v1169_v2  ;;  %755 = vmatpush1.bf16.msra.mxu1 %v1182_v5 }
 0x2fc   :  { %715 = vmatprep.subr.bf16.mxu0 %v1189_v6  ;;  %756 = vmatprep.subr.bf16.mxu1 %v1201_v8 }
 0x2fd   :  { %745 = vmatprep.mubr.bf16.mxu0 %v1121_v3  ;;  %786 = vmatprep.mubr.bf16.mxu1 %v1121_v3 }
 0x2ff   :  { %716 = vmatpush1.bf16.msra.mxu0 %v1194_v7  ;;  %757 = vmatpush1.bf16.msra.mxu1 %v1208_v9 }
 0x300   :  { %717 = vmatprep.subr.bf16.mxu0 %v1214_v10  ;;  %758 = vmatprep.subr.bf16.mxu1 %v1225_v12 }
 0x303   :  { %718 = vmatpush1.bf16.msra.mxu0 %v1220_v11  ;;  %759 = vmatpush1.bf16.msra.mxu1 %v1237_v14 }
 0x304   :  { %719 = vmatprep.subr.bf16.mxu0 %v1231_v13  ;;  %760 = vmatprep.subr.bf16.mxu1 %v1243_v15 }
 0x307   :  { %720 = vmatpush1.bf16.msra.mxu0 %v1249_v16  ;;  %761 = vmatpush1.bf16.msra.mxu1 %v1261_v18 }
 0x308   :  { %721 = vmatprep.subr.bf16.mxu0 %v1255_v17  ;;  %762 = vmatprep.subr.bf16.mxu1 %v1267_v19 }
 0x30b   :  { %722 = vmatpush1.bf16.msra.mxu0 %v1273_v20  ;;  %763 = vmatpush1.bf16.msra.mxu1 %v1285_v22 }
 0x30c   :  { %723 = vmatprep.subr.bf16.mxu0 %v1279_v21  ;;  %764 = vmatprep.subr.bf16.mxu1 %v1291_v23 }
 0x30f   :  { %724 = vmatpush1.bf16.msra.mxu0 %v1297_v24  ;;  %765 = vmatpush1.bf16.msra.mxu1 %v1309_v26 }
 0x310   :  { %725 = vmatprep.subr.bf16.mxu0 %v1303_v25  ;;  %766 = vmatprep.subr.bf16.mxu1 %v1320_v28 }
 0x313   :  { %726 = vmatpush1.bf16.msra.mxu0 %v1328_v29  ;;  %767 = vmatpush1.bf16.msra.mxu1 %v1341_v32 }
 0x314   :  { %727 = vmatprep.subr.bf16.mxu0 %v1335_v31  ;;  %768 = vmatprep.subr.bf16.mxu1 %v1348_v34 }
 0x317   :  { %728 = vmatpush1.bf16.msra.mxu0 %v1355_v35  ;;  %769 = vmatpush1.bf16.msra.mxu1 %v1367_v37 }
 0x318   :  { %833 = vmatprep.subr.bf16.mxu0 %v1164_v1  ;;  %874 = vmatprep.subr.bf16.mxu1 %v1177_v4  ;;  %v998_v1 = vld [vmem:[%s1671_s2 + $0x70] sm:$0xff] }
 0x3ba   :  { %v627_v59 = vpop.f32.mrf.mxu0  ;;  %v668_v38 = vpop.f32.mrf.mxu1 }
 0x3bb   :  { %v675_v40 = vadd.f32 %v996_v53, %v627_v59  ;;  %v677_v50 = vadd.f32 %v998_v1, %v668_v38 }
 0x3bc   :  { %v629_v41 = vpop.f32.mrf.mxu0  ;;  %v670_v43 = vpop.f32.mrf.mxu1 }
 0x3bd   :  { %v679_v44 = vmul.f32 0.5, %v675_v40  ;;  %v676_v45 = vadd.f32 %v997_v39, %v629_v41  ;;  %v678_v52 = vadd.f32 %v999_v51, %v670_v43 }
 0x3be   :  { %v631_v4 = vpop.f32.mrf.mxu0  ;;  %v672_v46 = vpop.f32.mrf.mxu1 }
 0x3bf   :  { %1090 = vtanh.f32 %v679_v44  ;;  %v683_v47 = vmul.f32 0.5, %v676_v45  ;;  %v688_v54 = vmul.f32 0.5, %v678_v52 }
 0x3c0   :  { %v632_v49 = vpop.f32.mrf.mxu0  ;;  %v673_v36 = vpop.f32.mrf.mxu1 }
 0x3c1   :  { %1092 = vtanh.f32 %v683_v47  ;;  %v1004_v47 = vld [vmem:[%s1671_s2 + $0xa0] sm:$0xff] }
 0x3c2   :  { %1094 = vtanh.f32 %v677_v50  ;;  %v1005_v50 = vld [vmem:[%s1671_s2 + $0xa8] sm:$0xff] }
 0x3c3   :  { %1096 = vtanh.f32 %v688_v54 }
 0x3cc   :  { %v1091_v55 = vpop.eup %1090 }
 0x3cd   :  { %v681_v56 = vmul.f32 0.5, %v1091_v55 }
 0x3ce   :  { %v1093_v57 = vpop.eup %1092 }
 0x3cf   :  { %v682_v58 = vadd.f32 0.5, %v681_v56  ;;  %v685_v60 = vmul.f32 0.5, %v1093_v57  ;;  %v1095_v27 = vpop.eup %1094  ;;  %v1006_v57 = vld [vmem:[%s1671_s2 + $0xb0] sm:$0xff] }
 0x3d0   :  { %v1097_v53 = vpop.eup %1096 }
 0x3d1   :  { %v686_v42 = vadd.f32 0.5, %v685_v60  ;;  %v693_v62 = vmul.f32 %v1095_v27, %v682_v58  ;;  %v690_v59 = vmul.f32 0.5, %v1097_v53 }
 0x3d3   :  { %v692_v61 = vmul.f32 %v686_v42, %v1542_v48  ;;  %v691_v38 = vadd.f32 0.5, %v690_v59 }
 0x3d5   :  { %v694_v0 = vadd.f32 %v693_v62, %v692_v61 }
 0x3d7   :  { %1098 = vtanh.f32 %v694_v0  ;;  %v1597_v33 = vsel %vm701_vm9, %v694_v0, %v1542_v48 }
 0x3e4   :  { %v1099_v39 = vpop.eup %1098 }
 0x3e5   :  { %v696_v40 = vmul.f32 %v1099_v39, %v691_v38 }
 0x3e7   :  { %v1600_v41 = vsel %vm701_vm9, %v696_v40, %v1545_v30 }
 0x3e8   :  { %v712_v43 = vpack.c.bf16 %v1600_v41, %v1600_v41 }
 0x3ea   :  { %746 = vmatmul.mubr.bf16.vlgmr.msra.gmra.mxu0 %v712_v43  ;;  %787 = vmatmul.mubr.bf16.vlgmr.msra.gmra.mxu1 %v712_v43 }
 0x3eb   :  { %834 = vmatpush1.bf16.msra.mxu0 %v1169_v2  ;;  %875 = vmatpush1.bf16.msra.mxu1 %v1182_v5  ;;  %v1000_v2 = vld [vmem:[%s1671_s2 + $0x80] sm:$0xff] }
 0x3ec   :  { %835 = vmatprep.subr.bf16.mxu0 %v1189_v6  ;;  %876 = vmatprep.subr.bf16.mxu1 %v1201_v8  ;;  %v1001_v6 = vld [vmem:[%s1671_s2 + $0x88] sm:$0xff] }
 0x3ed   :  { %865 = vmatprep.mubr.bf16.mxu0 %v1121_v3  ;;  %906 = vmatprep.mubr.bf16.mxu1 %v1121_v3 }
 0x3ef   :  { %836 = vmatpush1.bf16.msra.mxu0 %v1194_v7  ;;  %877 = vmatpush1.bf16.msra.mxu1 %v1208_v9 }
 0x3f0   :  { %837 = vmatprep.subr.bf16.mxu0 %v1214_v10  ;;  %878 = vmatprep.subr.bf16.mxu1 %v1225_v12  ;;  %v1002_v12 = vld [vmem:[%s1671_s2 + $0x90] sm:$0xff] }
 0x3f3   :  { %838 = vmatpush1.bf16.msra.mxu0 %v1220_v11  ;;  %879 = vmatpush1.bf16.msra.mxu1 %v1237_v14 }
 0x3f4   :  { %839 = vmatprep.subr.bf16.mxu0 %v1231_v13  ;;  %880 = vmatprep.subr.bf16.mxu1 %v1243_v15 }
 0x3f7   :  { %840 = vmatpush1.bf16.msra.mxu0 %v1249_v16  ;;  %881 = vmatpush1.bf16.msra.mxu1 %v1261_v18 }
 0x3f8   :  { %841 = vmatprep.subr.bf16.mxu0 %v1255_v17  ;;  %882 = vmatprep.subr.bf16.mxu1 %v1267_v19  ;;  %v1003_v19 = vld [vmem:[%s1671_s2 + $0x98] sm:$0xff] }
 0x3fb   :  { %842 = vmatpush1.bf16.msra.mxu0 %v1273_v20  ;;  %883 = vmatpush1.bf16.msra.mxu1 %v1285_v22 }
 0x3fc   :  { %843 = vmatprep.subr.bf16.mxu0 %v1279_v21  ;;  %884 = vmatprep.subr.bf16.mxu1 %v1291_v23 }
 0x3ff   :  { %844 = vmatpush1.bf16.msra.mxu0 %v1297_v24  ;;  %885 = vmatpush1.bf16.msra.mxu1 %v1309_v26 }
 0x400   :  { %845 = vmatprep.subr.bf16.mxu0 %v1303_v25  ;;  %886 = vmatprep.subr.bf16.mxu1 %v1320_v28 }
 0x403   :  { %846 = vmatpush1.bf16.msra.mxu0 %v1328_v29  ;;  %887 = vmatpush1.bf16.msra.mxu1 %v1341_v32 }
 0x404   :  { %847 = vmatprep.subr.bf16.mxu0 %v1335_v31  ;;  %888 = vmatprep.subr.bf16.mxu1 %v1348_v34  ;;  %v820_v31 = vpop.permute.xlu0 %819 }
 0x405   :  { %vm821_vm10 = vcmp.eq.s32.totalorder %v820_v31, 1 }
 0x407   :  { %848 = vmatpush1.bf16.msra.mxu0 %v1355_v35  ;;  %889 = vmatpush1.bf16.msra.mxu1 %v1367_v37 }
 0x4aa   :  { %v747_v3 = vpop.f32.mrf.mxu0  ;;  %v788_v5 = vpop.f32.mrf.mxu1 }
 0x4ab   :  { %v795_v7 = vadd.f32 %v1000_v2, %v747_v3  ;;  %v797_v18 = vadd.f32 %v1002_v12, %v788_v5  ;;  %v940_v2 = vpop.permute.xlu1 %939 }
 0x4ac   :  { %v749_v8 = vpop.f32.mrf.mxu0  ;;  %v790_v9 = vpop.f32.mrf.mxu1  ;;  %vm941_vm11 = vcmp.eq.s32.totalorder %v940_v2, 1 }
 0x4ad   :  { %v799_v10 = vmul.f32 0.5, %v795_v7  ;;  %v796_v11 = vadd.f32 %v1001_v6, %v749_v8  ;;  %v798_v20 = vadd.f32 %v1003_v19, %v790_v9 }
 0x4ae   :  { %v751_v13 = vpop.f32.mrf.mxu0  ;;  %v792_v14 = vpop.f32.mrf.mxu1 }
 0x4af   :  { %1100 = vtanh.f32 %v799_v10  ;;  %v803_v15 = vmul.f32 0.5, %v796_v11  ;;  %v808_v21 = vmul.f32 0.5, %v798_v20 }
 0x4b0   :  { %v752_v16 = vpop.f32.mrf.mxu0  ;;  %v793_v17 = vpop.f32.mrf.mxu1 }
 0x4b1   :  { %1102 = vtanh.f32 %v803_v15 }
 0x4b2   :  { %1104 = vtanh.f32 %v797_v18 }
 0x4b3   :  { %1106 = vtanh.f32 %v808_v21 }
 0x4bc   :  { %v1101_v22 = vpop.eup %1100 }
 0x4bd   :  { %v801_v23 = vmul.f32 0.5, %v1101_v22 }
 0x4be   :  { %v1103_v24 = vpop.eup %1102 }
 0x4bf   :  { %v802_v25 = vadd.f32 0.5, %v801_v23  ;;  %v805_v26 = vmul.f32 0.5, %v1103_v24  ;;  %v1105_v29 = vpop.eup %1104 }
 0x4c0   :  { %v1107_v48 = vpop.eup %1106 }
 0x4c1   :  { %v806_v28 = vadd.f32 0.5, %v805_v26  ;;  %v813_v34 = vmul.f32 %v1105_v29, %v802_v25  ;;  %v810_v30 = vmul.f32 0.5, %v1107_v48 }
 0x4c3   :  { %v812_v32 = vmul.f32 %v806_v28, %v1597_v33  ;;  %v811_v44 = vadd.f32 0.5, %v810_v30 }
 0x4c5   :  { %v814_v35 = vadd.f32 %v813_v34, %v812_v32 }
 0x4c7   :  { %1108 = vtanh.f32 %v814_v35  ;;  %v823_v37 = vsel %vm821_vm10, %v814_v35, %v1597_v33 }
 0x4d4   :  { %v1109_v45 = vpop.eup %1108 }
 0x4d5   :  { %v816_v1 = vmul.f32 %v1109_v45, %v811_v44 }
 0x4d7   :  { %v822_v4 = vsel %vm821_vm10, %v816_v1, %v1600_v41 }
 0x4d8   :  { %v832_v46 = vpack.c.bf16 %v822_v4, %v822_v4 }
 0x4da   :  { %866 = vmatmul.mubr.bf16.vlgmr.msra.gmra.mxu0 %v832_v46  ;;  %907 = vmatmul.mubr.bf16.vlgmr.msra.gmra.mxu1 %v832_v46 }
 0x59a   :  { %v867_v49 = vpop.f32.mrf.mxu0  ;;  %v908_v36 = vpop.f32.mrf.mxu1 }
 0x59b   :  { %v915_v51 = vadd.f32 %v1004_v47, %v867_v49  ;;  %v917_v62 = vadd.f32 %v1006_v57, %v908_v36 }
 0x59c   :  { %v869_v52 = vpop.f32.mrf.mxu0  ;;  %v910_v54 = vpop.f32.mrf.mxu1 }
 0x59d   :  { %v919_v55 = vmul.f32 0.5, %v915_v51  ;;  %v916_v56 = vadd.f32 %v1005_v50, %v869_v52  ;;  %v918_v0 = vadd.f32 %v1007_v63, %v910_v54 }
 0x59e   :  { %v871_v58 = vpop.f32.mrf.mxu0  ;;  %v912_v60 = vpop.f32.mrf.mxu1 }
 0x59f   :  { %1110 = vtanh.f32 %v919_v55  ;;  %v923_v42 = vmul.f32 0.5, %v916_v56  ;;  %v928_v33 = vmul.f32 0.5, %v918_v0 }
 0x5a0   :  { %v872_v27 = vpop.f32.mrf.mxu0  ;;  %v913_v61 = vpop.f32.mrf.mxu1 }
 0x5a1   :  { %1112 = vtanh.f32 %v923_v42 }
 0x5a2   :  { %1114 = vtanh.f32 %v917_v62 }
 0x5a3   :  { %1116 = vtanh.f32 %v928_v33 }
 0x5ac   :  { %v1111_v53 = vpop.eup %1110 }
 0x5ad   :  { %v921_v59 = vmul.f32 0.5, %v1111_v53 }
 0x5ae   :  { %v1113_v38 = vpop.eup %1112 }
 0x5af   :  { %v922_v39 = vadd.f32 0.5, %v921_v59  ;;  %v925_v40 = vmul.f32 0.5, %v1113_v38  ;;  %v1115_v43 = vpop.eup %1114 }
 0x5b0   :  { %v1117_v8 = vpop.eup %1116 }
 0x5b1   :  { %v926_v41 = vadd.f32 0.5, %v925_v40  ;;  %v933_v5 = vmul.f32 %v1115_v43, %v922_v39  ;;  %v930_v9 = vmul.f32 0.5, %v1117_v8 }
 0x5b3   :  { %v932_v3 = vmul.f32 %v926_v41, %v823_v37  ;;  %v931_v10 = vadd.f32 0.5, %v930_v9 }
 0x5b5   :  { %v934_v6 = vadd.f32 %v933_v5, %v932_v3 }
 0x5b7   :  { %1118 = vtanh.f32 %v934_v6  ;;  %v943_v7 = vsel %vm941_vm11, %v934_v6, %v823_v37 }
 0x5b8   :  { %945 = vst [vmem:[%s1674_s5] sm:$0xff] %v943_v7 }
 0x5c4   :  { %v1119_v11 = vpop.eup %1118 }
 0x5c5   :  { %v936_v12 = vmul.f32 %v1119_v11, %v931_v10 }
 0x5c7   :  { %v942_v13 = vsel %vm941_vm11, %v936_v12, %v822_v4 }
 0x5c8   :  { %944 = vst [vmem:[%s1673_s4] sm:$0xff] %v942_v13 }
 0x5c9 PF:  {}

// kernel: condition_encoder_forward.3
= control target key start
LH: loop header
LB: loop body
LE: loop exit
PB: predicated region body
PF: predicated region fallthrough
CT: control target
= control target key end

     0   :  { %v2332_v0 = vmov 0.0   ;;  %s3807_s0 = inlined_call_operand.<no memory space> [shape: s32[1], index: 0, kind: input, shape index: {}]   ;;  %s3808_s1 = inlined_call_operand.vmem [shape: s32[8,1], index: 1, kind: input, shape index: {}]   ;;  %s3809_s2 = inlined_call_operand.vmem [shape: f32[4,8,512], index: 2, kind: input, shape index: {}]   ;;  %s3810_s3 = inlined_call_operand.vmem [shape: bf16[128,512], index: 3, kind: input, shape index: {}]   ;;  %s3811_s4 = inlined_call_operand.vmem [shape: bf16[128,512], index: 4, kind: input, shape index: {}]   ;;  %s3812_s5 = inlined_call_operand.vmem [shape: bf16[128,512], index: 5, kind: input, shape index: {}]   ;;  %s3813_s6 = inlined_call_operand.vmem [shape: f32[1,512], index: 6, kind: input, shape index: {}]   ;;  %s3814_s7 = inlined_call_operand.vmem [shape: f32[2,8,128], index: 7, kind: output, shape index: {0}]   ;;  %s3815_s8 = inlined_call_operand.vmem [shape: f32[2,8,128], index: 8, kind: output, shape index: {1}]  }
   0x1   :  { %32 = vst [vmem:[%s3814_s7] sm:$0xff] %v2332_v0  ;;  %33 = vst [vmem:[%s3814_s7 + $0x8] sm:$0xff] %v2332_v0  ;;  %p1895_p0 = scmp.le.s32.totalorder %s3807_s0, 0 }
   0x2   :  { %34 = vst [vmem:[%s3815_s8] sm:$0xff] %v2332_v0  ;;  %35 = vst [vmem:[%s3815_s8 + $0x8] sm:$0xff] %v2332_v0 }
   0x3   :  { %41 = sbr.rel (%p1895_p0) target bundleno = 1465 (0x5b9), region = 33 }
   0x8   :  { %v2397_v1 = vld [vmem:[%s3810_s3 + $0xe4] ss:$16 sps:$4 sm:$0xff]   ;;  %v2402_v2 = vld [vmem:[%s3810_s3 + $0xe0] ss:$16 sps:$4 sm:$0xff]   ;;  %v3816_v3 = vmov 0  }
   0x9   :  { %280 = vmatprep.mubr.bf16.mxu0 %v3816_v3  ;;  %321 = vmatprep.mubr.bf16.mxu1 %v3816_v3  ;;  %v2410_v4 = vld [vmem:[%s3810_s3 + $0xec] ss:$16 sps:$4 sm:$0xff]   ;;  %v2415_v5 = vld [vmem:[%s3810_s3 + $0xe8] ss:$16 sps:$4 sm:$0xff]   ;;  %v2422_v6 = vld [vmem:[%s3810_s3 + $0xc4] ss:$16 sps:$4 sm:$0xff]  }
   0xa   :  { %248 = vmatprep.subr.bf16.mxu0 %v2397_v1  ;;  %2010 = vset.pattern.permute.xlu0 %v3816_v3  ;;  %v2427_v7 = vld [vmem:[%s3810_s3 + $0xc0] ss:$16 sps:$4 sm:$0xff]   ;;  %v2434_v8 = vld [vmem:[%s3810_s3 + $0xcc] ss:$16 sps:$4 sm:$0xff]   ;;  %v2441_v9 = vld [vmem:[%s3810_s3 + $0xc8] ss:$16 sps:$4 sm:$0xff]  }
   0xb   :  { %249 = vmatpush1.bf16.msra.mxu0 %v2402_v2  ;;  %2011 = vset.pattern.permute.xlu1 %v3816_v3  ;;  %v2447_v10 = vld [vmem:[%s3810_s3 + $0xa4] ss:$16 sps:$4 sm:$0xff]   ;;  %v2453_v11 = vld [vmem:[%s3810_s3 + $0xa0] ss:$16 sps:$4 sm:$0xff]   ;;  %v2458_v12 = vld [vmem:[%s3810_s3 + $0xac] ss:$16 sps:$4 sm:$0xff]  }
   0xc   :  { %289 = vmatprep.subr.bf16.mxu1 %v2410_v4  ;;  %250 = vmatprep.subr.bf16.mxu0 %v2422_v6  ;;  %v2464_v13 = vld [vmem:[%s3810_s3 + $0x84] ss:$16 sps:$4 sm:$0xff]   ;;  %v2470_v14 = vld [vmem:[%s3810_s3 + $0xa8] ss:$16 sps:$4 sm:$0xff]   ;;  %v2476_v15 = vld [vmem:[%s3810_s3 + $0x8c] ss:$16 sps:$4 sm:$0xff]  }
   0xd   :  { %290 = vmatpush1.bf16.msra.mxu1 %v2415_v5  ;;  %v2482_v16 = vld [vmem:[%s3810_s3 + $0x80] ss:$16 sps:$4 sm:$0xff]   ;;  %v2488_v17 = vld [vmem:[%s3810_s3 + $0x64] ss:$16 sps:$4 sm:$0xff]   ;;  %v2494_v18 = vld [vmem:[%s3810_s3 + $0x88] ss:$16 sps:$4 sm:$0xff]  }
   0xe   :  { %291 = vmatprep.subr.bf16.mxu1 %v2434_v8  ;;  %v2500_v19 = vld [vmem:[%s3810_s3 + $0x6c] ss:$16 sps:$4 sm:$0xff]   ;;  %v2506_v20 = vld [vmem:[%s3810_s3 + $0x60] ss:$16 sps:$4 sm:$0xff]   ;;  %v2512_v21 = vld [vmem:[%s3810_s3 + $0x44] ss:$16 sps:$4 sm:$0xff]  }
   0xf   :  { %251 = vmatpush1.bf16.msra.mxu0 %v2427_v7  ;;  %v2518_v22 = vld [vmem:[%s3810_s3 + $0x68] ss:$16 sps:$4 sm:$0xff]   ;;  %v2524_v23 = vld [vmem:[%s3810_s3 + $0x4c] ss:$16 sps:$4 sm:$0xff]   ;;  %v2530_v24 = vld [vmem:[%s3810_s3 + $0x40] ss:$16 sps:$4 sm:$0xff]  }
  0x10   :  { %252 = vmatprep.subr.bf16.mxu0 %v2447_v10  ;;  %v2535_v25 = vld [vmem:[%s3810_s3 + $0x48] ss:$16 sps:$4 sm:$0xff]   ;;  %v2541_v26 = vld [vmem:[%s3810_s3 + $0x24] ss:$16 sps:$4 sm:$0xff]   ;;  %v2547_v27 = vld [vmem:[%s3810_s3 + $0x20] ss:$16 sps:$4 sm:$0xff]  }
  0x11   :  { %292 = vmatpush1.bf16.msra.mxu1 %v2441_v9  ;;  %v2552_v28 = vld [vmem:[%s3810_s3 + $0x2c] ss:$16 sps:$4 sm:$0xff]   ;;  %v2557_v29 = vld [vmem:[%s3808_s1] sm:$0xff]  ;;  %v2571_v31 = vld [vmem:[%s3810_s3 + $0x28] ss:$16 sps:$4 sm:$0xff]  }
  0x12   :  { %293 = vmatprep.subr.bf16.mxu1 %v2458_v12  ;;  %3930 = vst [vmem:[#allocation4_spill] sm:$0xff] %v2557_v29  ;;  %v2563_v30 = vld [vmem:[%s3810_s3 + $0x4] ss:$16 sps:$4 sm:$0xff]   ;;  %vm50_vm0 = vcmp.gt.s32.totalorder %v2557_v29, 0  ;;  %vm957_vm1 = vcmp.gt.s32.totalorder %v2557_v29, 1 }
  0x13   :  { %253 = vmatpush1.bf16.msra.mxu0 %v2453_v11  ;;  %v352_v32 = vsel %vm50_vm0, 1, %v3816_v3  ;;  %v2578_v33 = vld [vmem:[%s3810_s3 + $0xc] ss:$16 sps:$4 sm:$0xff]   ;;  %v2584_v34 = vld [vmem:[%s3810_s3] ss:$16 sps:$4 sm:$0xff]   ;;  %v1067_v36 = vsel %vm957_vm1, 1, %v3816_v3 }
  0x14   :  { %254 = vmatprep.subr.bf16.mxu0 %v2464_v13  ;;  %354 = vperm.xlu0 %2010, %v352_v32   ;;  %v2589_v35 = vld [vmem:[%s3814_s7] sm:$0xff]  ;;  %v2597_v37 = vld [vmem:[%s3810_s3 + $0x8] ss:$16 sps:$4 sm:$0xff]   ;;  %v2616_v40 = vld [vmem:[%s3812_s5 + $0xec] ss:$16 sps:$4 sm:$0xff]  }
  0x15   :  { %294 = vmatpush1.bf16.msra.mxu1 %v2470_v14  ;;  %v55_v38 = vpack.c.bf16 %v2589_v35, %v2589_v35  ;;  %v2611_v39 = vld [vmem:[%s3812_s5 + $0xe4] ss:$16 sps:$4 sm:$0xff]   ;;  %v2621_v41 = vld [vmem:[%s3812_s5 + $0xe0] ss:$16 sps:$4 sm:$0xff]   ;;  %v2626_v42 = vld [vmem:[%s3812_s5 + $0xe8] ss:$16 sps:$4 sm:$0xff]  }
  0x16   :  { %295 = vmatprep.subr.bf16.mxu1 %v2476_v15  ;;  %v2635_v43 = vld [vmem:[%s3812_s5 + $0xc4] ss:$16 sps:$4 sm:$0xff]   ;;  %v2640_v44 = vld [vmem:[%s3812_s5 + $0xcc] ss:$16 sps:$4 sm:$0xff]   ;;  %v2645_v45 = vld [vmem:[%s3812_s5 + $0xc0] ss:$16 sps:$4 sm:$0xff]  }
  0x17   :  { %255 = vmatpush1.bf16.msra.mxu0 %v2482_v16  ;;  %v2650_v46 = vld [vmem:[%s3812_s5 + $0xc8] ss:$16 sps:$4 sm:$0xff]   ;;  %v2659_v47 = vld [vmem:[%s3812_s5 + $0xa4] ss:$16 sps:$4 sm:$0xff]   ;;  %v2664_v48 = vld [vmem:[%s3812_s5 + $0xac] ss:$16 sps:$4 sm:$0xff]  }
  0x18   :  { %256 = vmatprep.subr.bf16.mxu0 %v2488_v17  ;;  %1069 = vperm.xlu0 %2010, %v1067_v36   ;;  %v2669_v49 = vld [vmem:[%s3812_s5 + $0xa0] ss:$16 sps:$4 sm:$0xff]   ;;  %v2674_v50 = vld [vmem:[%s3812_s5 + $0xa8] ss:$16 sps:$4 sm:$0xff]   ;;  %v2683_v51 = vld [vmem:[%s3812_s5 + $0x84] ss:$16 sps:$4 sm:$0xff]  }
  0x19   :  { %296 = vmatpush1.bf16.msra.mxu1 %v2494_v18  ;;  %3931 = vst [vmem:[#allocation5_spill] sm:$0xff] %v2683_v51  ;;  %v2688_v52 = vld [vmem:[%s3812_s5 + $0x8c] ss:$16 sps:$4 sm:$0xff]   ;;  %v2693_v53 = vld [vmem:[%s3812_s5 + $0x80] ss:$16 sps:$4 sm:$0xff]  }
  0x1a   :  { %297 = vmatprep.subr.bf16.mxu1 %v2500_v19  ;;  %3932 = vst [vmem:[#allocation6_spill] sm:$0xff] %v2688_v52  ;;  %3933 = vst [vmem:[#allocation7_spill] sm:$0xff] %v2693_v53  ;;  %v2698_v54 = vld [vmem:[%s3812_s5 + $0x88] ss:$16 sps:$4 sm:$0xff]   ;;  %v2707_v55 = vld [vmem:[%s3812_s5 + $0x64] ss:$16 sps:$4 sm:$0xff]  }
  0x1b   :  { %257 = vmatpush1.bf16.msra.mxu0 %v2506_v20  ;;  %3934 = vst [vmem:[#allocation8_spill] sm:$0xff] %v2698_v54  ;;  %3935 = vst [vmem:[#allocation9_spill] sm:$0xff] %v2707_v55  ;;  %v2712_v56 = vld [vmem:[%s3812_s5 + $0x6c] ss:$16 sps:$4 sm:$0xff]   ;;  %v2717_v57 = vld [vmem:[%s3812_s5 + $0x60] ss:$16 sps:$4 sm:$0xff]  }
  0x1c   :  { %258 = vmatprep.subr.bf16.mxu0 %v2512_v21  ;;  %3936 = vst [vmem:[#allocation10_spill] sm:$0xff] %v2712_v56  ;;  %3937 = vst [vmem:[#allocation11_spill] sm:$0xff] %v2717_v57  ;;  %v2722_v58 = vld [vmem:[%s3812_s5 + $0x68] ss:$16 sps:$4 sm:$0xff]   ;;  %v2731_v59 = vld [vmem:[%s3812_s5 + $0x44] ss:$16 sps:$4 sm:$0xff]  }
  0x1d   :  { %298 = vmatpush1.bf16.msra.mxu1 %v2518_v22  ;;  %3938 = vst [vmem:[#allocation12_spill] sm:$0xff] %v2722_v58  ;;  %3939 = vst [vmem:[#allocation13_spill] sm:$0xff] %v2731_v59  ;;  %v2736_v60 = vld [vmem:[%s3812_s5 + $0x4c] ss:$16 sps:$4 sm:$0xff]   ;;  %v2741_v61 = vld [vmem:[%s3812_s5 + $0x40] ss:$16 sps:$4 sm:$0xff]  }
  0x1e   :  { %299 = vmatprep.subr.bf16.mxu1 %v2524_v23  ;;  %3940 = vst [vmem:[#allocation14_spill] sm:$0xff] %v2736_v60  ;;  %3941 = vst [vmem:[#allocation15_spill] sm:$0xff] %v2741_v61  ;;  %v2746_v62 = vld [vmem:[%s3812_s5 + $0x48] ss:$16 sps:$4 sm:$0xff]   ;;  %v2755_v63 = vld [vmem:[%s3812_s5 + $0x24] ss:$16 sps:$4 sm:$0xff]  }
  0x1f   :  { %259 = vmatpush1.bf16.msra.mxu0 %v2530_v24  ;;  %3942 = vst [vmem:[#allocation16_spill] sm:$0xff] %v2746_v62  ;;  %3943 = vst [vmem:[#allocation17_spill] sm:$0xff] %v2755_v63  ;;  %v2760_v0 = vld [vmem:[%s3812_s5 + $0x2c] ss:$16 sps:$4 sm:$0xff]   ;;  %v2765_v32 = vld [vmem:[%s3812_s5 + $0x20] ss:$16 sps:$4 sm:$0xff]  }
  0x20   :  { %260 = vmatprep.subr.bf16.mxu0 %v2541_v26  ;;  %3944 = vst [vmem:[#allocation18_spill] sm:$0xff] %v2760_v0  ;;  %3945 = vst [vmem:[#allocation19_spill] sm:$0xff] %v2765_v32  ;;  %v2770_v36 = vld [vmem:[%s3812_s5 + $0x28] ss:$16 sps:$4 sm:$0xff]   ;;  %v2789_v29 = vld [vmem:[%s3812_s5] ss:$16 sps:$4 sm:$0xff]  }
  0x21   :  { %300 = vmatpush1.bf16.msra.mxu1 %v2535_v25  ;;  %3946 = vst [vmem:[#allocation20_spill] sm:$0xff] %v2770_v36  ;;  %3949 = vst [vmem:[#allocation23_spill] sm:$0xff] %v2789_v29 }
  0x22   :  { %301 = vmatprep.subr.bf16.mxu1 %v2552_v28 }
  0x23   :  { %261 = vmatpush1.bf16.msra.mxu0 %v2547_v27 }
  0x24   :  { %262 = vmatprep.subr.bf16.mxu0 %v2563_v30 }
  0x25   :  { %302 = vmatpush1.bf16.msra.mxu1 %v2571_v31 }
  0x26   :  { %303 = vmatprep.subr.bf16.mxu1 %v2578_v33 }
  0x27   :  { %263 = vmatpush1.bf16.msra.mxu0 %v2584_v34 }
  0x28   :  { %574 = vmatprep.subr.bf16.mxu0 %v2611_v39 }
  0x29   :  { %304 = vmatpush1.bf16.msra.mxu1 %v2597_v37 }
  0x2a   :  { %281 = vmatmul.mubr.bf16.vlgmr.msra.gmra.mxu0 %v55_v38  ;;  %615 = vmatprep.subr.bf16.mxu1 %v2616_v40 }
  0x2b   :  { %606 = vmatprep.mubr.bf16.mxu0 %v3816_v3  ;;  %575 = vmatpush1.bf16.msra.mxu0 %v2621_v41 }
  0x2c   :  { %322 = vmatmul.mubr.bf16.vlgmr.msra.gmra.mxu1 %v55_v38  ;;  %576 = vmatprep.subr.bf16.mxu0 %v2635_v43  ;;  %v2779_v38 = vld [vmem:[%s3812_s5 + $0x4] ss:$16 sps:$4 sm:$0xff]  }
  0x2d   :  { %647 = vmatprep.mubr.bf16.mxu1 %v3816_v3  ;;  %616 = vmatpush1.bf16.msra.mxu1 %v2626_v42  ;;  %3947 = vst [vmem:[#allocation21_spill] sm:$0xff] %v2779_v38  ;;  %v2784_v3 = vld [vmem:[%s3812_s5 + $0xc] ss:$16 sps:$4 sm:$0xff]  }
  0x2e   :  { %617 = vmatprep.subr.bf16.mxu1 %v2640_v44  ;;  %3948 = vst [vmem:[#allocation22_spill] sm:$0xff] %v2784_v3 }
  0x2f   :  { %577 = vmatpush1.bf16.msra.mxu0 %v2645_v45 }
  0x30   :  { %578 = vmatprep.subr.bf16.mxu0 %v2659_v47 }
  0x31   :  { %618 = vmatpush1.bf16.msra.mxu1 %v2650_v46 }
  0x32   :  { %619 = vmatprep.subr.bf16.mxu1 %v2664_v48 }
  0x33   :  { %579 = vmatpush1.bf16.msra.mxu0 %v2669_v49 }
  0x34   :  { %580 = vmatprep.subr.bf16.mxu0 %v2683_v51 }
  0x35   :  { %620 = vmatpush1.bf16.msra.mxu1 %v2674_v50 }
  0x36   :  { %621 = vmatprep.subr.bf16.mxu1 %v2688_v52 }
  0x37   :  { %581 = vmatpush1.bf16.msra.mxu0 %v2693_v53 }
  0x38   :  { %582 = vmatprep.subr.bf16.mxu0 %v2707_v55 }
  0x39   :  { %622 = vmatpush1.bf16.msra.mxu1 %v2698_v54 }
  0x3a   :  { %623 = vmatprep.subr.bf16.mxu1 %v2712_v56 }
  0x3b   :  { %583 = vmatpush1.bf16.msra.mxu0 %v2717_v57 }
  0x3c   :  { %584 = vmatprep.subr.bf16.mxu0 %v2731_v59 }
  0x3d   :  { %624 = vmatpush1.bf16.msra.mxu1 %v2722_v58 }
  0x3e   :  { %625 = vmatprep.subr.bf16.mxu1 %v2736_v60 }
  0x3f   :  { %585 = vmatpush1.bf16.msra.mxu0 %v2741_v61 }
  0x40   :  { %586 = vmatprep.subr.bf16.mxu0 %v2755_v63 }
  0x41   :  { %626 = vmatpush1.bf16.msra.mxu1 %v2746_v62  ;;  %v53_v62 = vld [vmem:[%s3809_s2 + $0x10] sm:$0xff] }
  0x42   :  { %627 = vmatprep.subr.bf16.mxu1 %v2760_v0  ;;  %v2808_v0 = vld [vmem:[%s3811_s4 + $0xec] ss:$16 sps:$4 sm:$0xff]  }
  0x43   :  { %587 = vmatpush1.bf16.msra.mxu0 %v2765_v32  ;;  %v2794_v32 = vld [vmem:[%s3812_s5 + $0x8] ss:$16 sps:$4 sm:$0xff]   ;;  %3952 = vst [vmem:[#allocation26_spill] sm:$0xff] %v2808_v0 }
  0x44   :  { %3950 = vst [vmem:[#allocation24_spill] sm:$0xff] %v2794_v32  ;;  %588 = vmatprep.subr.bf16.mxu0 %v2779_v38 }
  0x45   :  { %628 = vmatpush1.bf16.msra.mxu1 %v2770_v36  ;;  %v2803_v36 = vld [vmem:[%s3811_s4 + $0xe4] ss:$16 sps:$4 sm:$0xff]  }
  0x46   :  { %629 = vmatprep.subr.bf16.mxu1 %v2784_v3  ;;  %3951 = vst [vmem:[#allocation25_spill] sm:$0xff] %v2803_v36 }
  0x47   :  { %589 = vmatpush1.bf16.msra.mxu0 %v2789_v29  ;;  %v51_v29 = vld [vmem:[%s3809_s2] sm:$0xff] }
  0x48   :  { %849 = vmatprep.subr.bf16.mxu0 %v2803_v36 }
  0x49   :  { %630 = vmatpush1.bf16.msra.mxu1 %v2794_v32  ;;  %v52_v32 = vld [vmem:[%s3809_s2 + $0x8] sm:$0xff] }
  0x4a   :  { %890 = vmatprep.subr.bf16.mxu1 %v2808_v0 }
  0xea   :  { %v282_v3 = vpop.f32.mrf.mxu0 }
  0xeb   :  { %v330_v38 = vadd.f32 %v282_v3, %v51_v29  ;;  %v54_v3 = vld [vmem:[%s3809_s2 + $0x18] sm:$0xff] }
  0xec   :  { %v284_v63 = vpop.f32.mrf.mxu0  ;;  %v323_v61 = vpop.f32.mrf.mxu1 }
  0xed   :  { %v334_v60 = vmul.f32 0.5, %v330_v38  ;;  %v331_v36 = vadd.f32 %v284_v63, %v52_v32  ;;  %v332_v57 = vadd.f32 %v323_v61, %v53_v62 }
  0xee   :  { %v286_v59 = vpop.f32.mrf.mxu0  ;;  %v325_v0 = vpop.f32.mrf.mxu1 }
  0xef   :  { %2156 = vtanh.f32 %v334_v60  ;;  %v338_v58 = vmul.f32 0.5, %v331_v36  ;;  %v333_v29 = vadd.f32 %v325_v0, %v54_v3  ;;  %v2844_v36 = vld [vmem:[%s3811_s4 + $0xe0] ss:$16 sps:$4 sm:$0xff]   ;;  %v2849_v3 = vld [vmem:[%s3811_s4 + $0xe8] ss:$16 sps:$4 sm:$0xff]  }
  0xf0   :  { %v287_v56 = vpop.f32.mrf.mxu0  ;;  %v327_v55 = vpop.f32.mrf.mxu1 }
  0xf1   :  { %2158 = vtanh.f32 %v338_v58  ;;  %v343_v53 = vmul.f32 0.5, %v333_v29  ;;  %v2827_v55 = vld [vmem:[%s3815_s8] sm:$0xff] }
  0xf2   :  { %v328_v54 = vpop.f32.mrf.mxu1  ;;  %2160 = vtanh.f32 %v332_v57 }
  0xf3   :  { %2162 = vtanh.f32 %v343_v53 }
  0xfc   :  { %v2157_v52 = vpop.eup %2156 }
  0xfd   :  { %v336_v51 = vmul.f32 0.5, %v2157_v52 }
  0xfe   :  { %v2159_v38 = vpop.eup %2158 }
  0xff   :  { %v337_v63 = vadd.f32 0.5, %v336_v51  ;;  %v340_v59 = vmul.f32 0.5, %v2159_v38  ;;  %v2161_v60 = vpop.eup %2160  ;;  %v2833_v51 = vpop.permute.xlu0 %354  ;;  %v2858_v38 = vld [vmem:[%s3811_s4 + $0xc4] ss:$16 sps:$4 sm:$0xff]  }
 0x100   :  { %v2163_v61 = vpop.eup %2162  ;;  %vm356_vm2 = vcmp.eq.s32.totalorder %v2833_v51, 1 }
 0x101   :  { %v341_v54 = vadd.f32 0.5, %v340_v59  ;;  %v348_v57 = vmul.f32 %v2161_v60, %v337_v63  ;;  %v345_v52 = vmul.f32 0.5, %v2163_v61  ;;  %v2872_v63 = vld [vmem:[%s3811_s4 + $0xc0] ss:$16 sps:$4 sm:$0xff]   ;;  %v2877_v59 = vld [vmem:[%s3811_s4 + $0xc8] ss:$16 sps:$4 sm:$0xff]  }
 0x102   :  { %v2884_v60 = vld [vmem:[%s3811_s4 + $0xa4] ss:$16 sps:$4 sm:$0xff]   ;;  %v2903_v61 = vld [vmem:[%s3811_s4 + $0xa8] ss:$16 sps:$4 sm:$0xff]  }
 0x103   :  { %v347_v56 = vmul.f32 %v341_v54, %v2827_v55  ;;  %v346_v62 = vadd.f32 0.5, %v345_v52  ;;  %v2889_v54 = vld [vmem:[%s3811_s4 + $0xac] ss:$16 sps:$4 sm:$0xff]   ;;  %3956 = vst [vmem:[#allocation29_spill] sm:$0xff] %v2903_v61  ;;  %v2910_v52 = vld [vmem:[%s3811_s4 + $0x84] ss:$16 sps:$4 sm:$0xff]  }
 0x104   :  { %3953 = vst [vmem:[#allocation27_spill] sm:$0xff] %v2889_v54  ;;  %3957 = vst [vmem:[#allocation30_spill] sm:$0xff] %v2910_v52 }
 0x105   :  { %v2830_v58 = vadd.f32 %v348_v57, %v347_v56  ;;  %v3954_v56 = vmov 0   ;;  %v2898_v57 = vld [vmem:[%s3811_s4 + $0xa0] ss:$16 sps:$4 sm:$0xff]  }
 0x106   :  { %3955 = vst [vmem:[#allocation28_spill] sm:$0xff] %v2898_v57 }
 0x107   :  { %2164 = vtanh.f32 %v2830_v58 }
 0x114   :  { %v2165_v53 = vpop.eup %2164 }
 0x115   :  { %v351_v0 = vmul.f32 %v2165_v53, %v346_v62  ;;  %v2915_v62 = vld [vmem:[%s3811_s4 + $0x8c] ss:$16 sps:$4 sm:$0xff]   ;;  %v2922_v53 = vld [vmem:[%s3811_s4 + $0x80] ss:$16 sps:$4 sm:$0xff]  }
 0x116   :  { %3958 = vst [vmem:[#allocation31_spill] sm:$0xff] %v2915_v62  ;;  %3959 = vst [vmem:[#allocation32_spill] sm:$0xff] %v2922_v53 }
 0x117   :  { %v2839_v32 = vsel %vm356_vm2, %v351_v0, %v2589_v35  ;;  %v2863_v35 = vld [vmem:[%s3811_s4 + $0xcc] ss:$16 sps:$4 sm:$0xff]   ;;  %v2927_v0 = vld [vmem:[%s3811_s4 + $0x88] ss:$16 sps:$4 sm:$0xff]  }
 0x118   :  { %v2853_v29 = vpack.c.bf16 %v2839_v32, %v2839_v32  ;;  %3960 = vst [vmem:[#allocation33_spill] sm:$0xff] %v2927_v0 }
 0x11a   :  { %607 = vmatmul.mubr.bf16.vlgmr.msra.gmra.mxu0 %v2853_v29  ;;  %648 = vmatmul.mubr.bf16.vlgmr.msra.gmra.mxu1 %v2853_v29 }
 0x11b   :  { %850 = vmatpush1.bf16.msra.mxu0 %v2844_v36  ;;  %891 = vmatpush1.bf16.msra.mxu1 %v2849_v3 }
 0x11c   :  { %851 = vmatprep.subr.bf16.mxu0 %v2858_v38  ;;  %892 = vmatprep.subr.bf16.mxu1 %v2863_v35 }
 0x11d   :  { %881 = vmatprep.mubr.bf16.mxu0 %v3954_v56  ;;  %922 = vmatprep.mubr.bf16.mxu1 %v3954_v56 }
 0x11f   :  { %852 = vmatpush1.bf16.msra.mxu0 %v2872_v63  ;;  %893 = vmatpush1.bf16.msra.mxu1 %v2877_v59 }
 0x120   :  { %853 = vmatprep.subr.bf16.mxu0 %v2884_v60  ;;  %894 = vmatprep.subr.bf16.mxu1 %v2889_v54  ;;  %v3028_v54 = vld [vmem:[%s3814_s7 + $0x8] sm:$0xff] }
 0x123   :  { %854 = vmatpush1.bf16.msra.mxu0 %v2898_v57  ;;  %895 = vmatpush1.bf16.msra.mxu1 %v2903_v61  ;;  %v2934_v57 = vld [vmem:[%s3811_s4 + $0x64] ss:$16 sps:$4 sm:$0xff]   ;;  %v2939_v61 = vld [vmem:[%s3811_s4 + $0x6c] ss:$16 sps:$4 sm:$0xff]  }
 0x124   :  { %855 = vmatprep.subr.bf16.mxu0 %v2910_v52  ;;  %896 = vmatprep.subr.bf16.mxu1 %v2915_v62  ;;  %3961 = vst [vmem:[#allocation34_spill] sm:$0xff] %v2934_v57  ;;  %3962 = vst [vmem:[#allocation35_spill] sm:$0xff] %v2939_v61  ;;  %v2946_v52 = vld [vmem:[%s3811_s4 + $0x60] ss:$16 sps:$4 sm:$0xff]   ;;  %v2951_v62 = vld [vmem:[%s3811_s4 + $0x68] ss:$16 sps:$4 sm:$0xff]  }
 0x125   :  { %3963 = vst [vmem:[#allocation36_spill] sm:$0xff] %v2946_v52  ;;  %3964 = vst [vmem:[#allocation37_spill] sm:$0xff] %v2951_v62 }
 0x127   :  { %856 = vmatpush1.bf16.msra.mxu0 %v2922_v53  ;;  %897 = vmatpush1.bf16.msra.mxu1 %v2927_v0  ;;  %v2958_v53 = vld [vmem:[%s3811_s4 + $0x44] ss:$16 sps:$4 sm:$0xff]   ;;  %v2963_v0 = vld [vmem:[%s3811_s4 + $0x4c] ss:$16 sps:$4 sm:$0xff]  }
 0x128   :  { %857 = vmatprep.subr.bf16.mxu0 %v2934_v57  ;;  %898 = vmatprep.subr.bf16.mxu1 %v2939_v61  ;;  %3965 = vst [vmem:[#allocation38_spill] sm:$0xff] %v2958_v53  ;;  %3966 = vst [vmem:[#allocation39_spill] sm:$0xff] %v2963_v0  ;;  %v2970_v57 = vld [vmem:[%s3811_s4 + $0x40] ss:$16 sps:$4 sm:$0xff]   ;;  %v2975_v61 = vld [vmem:[%s3811_s4 + $0x48] ss:$16 sps:$4 sm:$0xff]  }
 0x129   :  { %3967 = vst [vmem:[#allocation40_spill] sm:$0xff] %v2970_v57  ;;  %3968 = vst [vmem:[#allocation41_spill] sm:$0xff] %v2975_v61 }
 0x12b   :  { %858 = vmatpush1.bf16.msra.mxu0 %v2946_v52  ;;  %899 = vmatpush1.bf16.msra.mxu1 %v2951_v62  ;;  %v2982_v52 = vld [vmem:[%s3811_s4 + $0x24] ss:$16 sps:$4 sm:$0xff]   ;;  %v2987_v62 = vld [vmem:[%s3811_s4 + $0x2c] ss:$16 sps:$4 sm:$0xff]  }
 0x12c   :  { %859 = vmatprep.subr.bf16.mxu0 %v2958_v53  ;;  %900 = vmatprep.subr.bf16.mxu1 %v2963_v0  ;;  %3969 = vst [vmem:[#allocation42_spill] sm:$0xff] %v2982_v52  ;;  %3970 = vst [vmem:[#allocation43_spill] sm:$0xff] %v2987_v62  ;;  %v2994_v53 = vld [vmem:[%s3811_s4 + $0x20] ss:$16 sps:$4 sm:$0xff]   ;;  %v2999_v0 = vld [vmem:[%s3811_s4 + $0x28] ss:$16 sps:$4 sm:$0xff]  }
 0x12d   :  { %3971 = vst [vmem:[#allocation44_spill] sm:$0xff] %v2999_v0 }
 0x12f   :  { %860 = vmatpush1.bf16.msra.mxu0 %v2970_v57  ;;  %901 = vmatpush1.bf16.msra.mxu1 %v2975_v61  ;;  %v3006_v57 = vld [vmem:[%s3811_s4 + $0x4] ss:$16 sps:$4 sm:$0xff]   ;;  %v3011_v61 = vld [vmem:[%s3811_s4 + $0xc] ss:$16 sps:$4 sm:$0xff]  }
 0x130   :  { %861 = vmatprep.subr.bf16.mxu0 %v2982_v52  ;;  %902 = vmatprep.subr.bf16.mxu1 %v2987_v62  ;;  %3972 = vst [vmem:[#allocation45_spill] sm:$0xff] %v3011_v61  ;;  %v3018_v52 = vld [vmem:[%s3811_s4] ss:$16 sps:$4 sm:$0xff]   ;;  %v3023_v62 = vld [vmem:[%s3811_s4 + $0x8] ss:$16 sps:$4 sm:$0xff]  }
 0x133   :  { %862 = vmatpush1.bf16.msra.mxu0 %v2994_v53  ;;  %903 = vmatpush1.bf16.msra.mxu1 %v2999_v0  ;;  %v656_v0 = vpack.c.bf16 %v3028_v54, %v3028_v54 }
 0x134   :  { %863 = vmatprep.subr.bf16.mxu0 %v3006_v57  ;;  %904 = vmatprep.subr.bf16.mxu1 %v3011_v61 }
 0x137   :  { %864 = vmatpush1.bf16.msra.mxu0 %v3018_v52  ;;  %905 = vmatpush1.bf16.msra.mxu1 %v3023_v62 }
 0x138   :  { %963 = vmatprep.subr.bf16.mxu0 %v2397_v1  ;;  %1004 = vmatprep.subr.bf16.mxu1 %v2410_v4  ;;  %v3973_v1 = vld [vmem:[#allocation5_spill] sm:$0xff]  ;;  %v3975_v4 = vld [vmem:[#allocation7_spill] sm:$0xff] }
 0x13a   :  { %882 = vmatmul.mubr.bf16.vlgmr.msra.gmra.mxu0 %v656_v0  ;;  %923 = vmatmul.mubr.bf16.vlgmr.msra.gmra.mxu1 %v656_v0  ;;  %v394_v0 = vlaneseq }
 0x13b   :  { %964 = vmatpush1.bf16.msra.mxu0 %v2402_v2  ;;  %1005 = vmatpush1.bf16.msra.mxu1 %v2415_v5  ;;  %v3974_v2 = vld [vmem:[#allocation6_spill] sm:$0xff]  ;;  %v3976_v5 = vld [vmem:[#allocation8_spill] sm:$0xff] }
 0x13c   :  { %965 = vmatprep.subr.bf16.mxu0 %v2422_v6  ;;  %1006 = vmatprep.subr.bf16.mxu1 %v2434_v8  ;;  %v3977_v6 = vld [vmem:[#allocation9_spill] sm:$0xff]  ;;  %v3979_v8 = vld [vmem:[#allocation11_spill] sm:$0xff] }
 0x13d   :  { %995 = vmatprep.mubr.bf16.mxu0 %v3954_v56  ;;  %1036 = vmatprep.mubr.bf16.mxu1 %v3954_v56 }
 0x13f   :  { %966 = vmatpush1.bf16.msra.mxu0 %v2427_v7  ;;  %1007 = vmatpush1.bf16.msra.mxu1 %v2441_v9  ;;  %v3978_v7 = vld [vmem:[#allocation10_spill] sm:$0xff]  ;;  %v3980_v9 = vld [vmem:[#allocation12_spill] sm:$0xff] }
 0x140   :  { %967 = vmatprep.subr.bf16.mxu0 %v2447_v10  ;;  %1008 = vmatprep.subr.bf16.mxu1 %v2458_v12  ;;  %v3981_v10 = vld [vmem:[#allocation13_spill] sm:$0xff]  ;;  %v3983_v12 = vld [vmem:[#allocation15_spill] sm:$0xff] }
 0x143   :  { %968 = vmatpush1.bf16.msra.mxu0 %v2453_v11  ;;  %1009 = vmatpush1.bf16.msra.mxu1 %v2470_v14  ;;  %v3982_v11 = vld [vmem:[#allocation14_spill] sm:$0xff]  ;;  %v3985_v14 = vld [vmem:[#allocation17_spill] sm:$0xff] }
 0x144   :  { %969 = vmatprep.subr.bf16.mxu0 %v2464_v13  ;;  %1010 = vmatprep.subr.bf16.mxu1 %v2476_v15  ;;  %v3984_v13 = vld [vmem:[#allocation16_spill] sm:$0xff]  ;;  %v3986_v15 = vld [vmem:[#allocation18_spill] sm:$0xff] }
 0x147   :  { %970 = vmatpush1.bf16.msra.mxu0 %v2482_v16  ;;  %1011 = vmatpush1.bf16.msra.mxu1 %v2494_v18  ;;  %v3987_v16 = vld [vmem:[#allocation19_spill] sm:$0xff]  ;;  %v3989_v18 = vld [vmem:[#allocation21_spill] sm:$0xff] }
 0x148   :  { %971 = vmatprep.subr.bf16.mxu0 %v2488_v17  ;;  %1012 = vmatprep.subr.bf16.mxu1 %v2500_v19  ;;  %v3988_v17 = vld [vmem:[#allocation20_spill] sm:$0xff]  ;;  %v3990_v19 = vld [vmem:[#allocation22_spill] sm:$0xff] }
 0x14b   :  { %972 = vmatpush1.bf16.msra.mxu0 %v2506_v20  ;;  %1013 = vmatpush1.bf16.msra.mxu1 %v2518_v22  ;;  %v3991_v20 = vld [vmem:[#allocation23_spill] sm:$0xff]  ;;  %v3993_v22 = vld [vmem:[#allocation25_spill] sm:$0xff] }
 0x14c   :  { %973 = vmatprep.subr.bf16.mxu0 %v2512_v21  ;;  %1014 = vmatprep.subr.bf16.mxu1 %v2524_v23  ;;  %v3992_v21 = vld [vmem:[#allocation24_spill] sm:$0xff]  ;;  %v3994_v23 = vld [vmem:[#allocation26_spill] sm:$0xff] }
 0x14f   :  { %974 = vmatpush1.bf16.msra.mxu0 %v2530_v24  ;;  %1015 = vmatpush1.bf16.msra.mxu1 %v2535_v25 }
 0x150   :  { %975 = vmatprep.subr.bf16.mxu0 %v2541_v26  ;;  %1016 = vmatprep.subr.bf16.mxu1 %v2552_v28 }
 0x153   :  { %976 = vmatpush1.bf16.msra.mxu0 %v2547_v27  ;;  %1017 = vmatpush1.bf16.msra.mxu1 %v2571_v31 }
 0x154   :  { %977 = vmatprep.subr.bf16.mxu0 %v2563_v30  ;;  %1018 = vmatprep.subr.bf16.mxu1 %v2578_v33 }
 0x157   :  { %978 = vmatpush1.bf16.msra.mxu0 %v2584_v34  ;;  %1019 = vmatpush1.bf16.msra.mxu1 %v2597_v37 }
 0x158   :  { %1075 = vmatprep.subr.bf16.mxu0 %v2611_v39  ;;  %1116 = vmatprep.subr.bf16.mxu1 %v2616_v40 }
 0x15a   :  { %996 = vmatmul.mubr.bf16.vlgmr.msra.gmra.mxu0 %v2853_v29  ;;  %1037 = vmatmul.mubr.bf16.vlgmr.msra.gmra.mxu1 %v2853_v29 }
 0x15b   :  { %1076 = vmatpush1.bf16.msra.mxu0 %v2621_v41  ;;  %1117 = vmatpush1.bf16.msra.mxu1 %v2626_v42 }
 0x15c   :  { %1077 = vmatprep.subr.bf16.mxu0 %v2635_v43  ;;  %1118 = vmatprep.subr.bf16.mxu1 %v2640_v44 }
 0x15d   :  { %1107 = vmatprep.mubr.bf16.mxu0 %v3954_v56  ;;  %1148 = vmatprep.mubr.bf16.mxu1 %v3954_v56 }
 0x15f   :  { %1078 = vmatpush1.bf16.msra.mxu0 %v2645_v45  ;;  %1119 = vmatpush1.bf16.msra.mxu1 %v2650_v46 }
 0x160   :  { %1079 = vmatprep.subr.bf16.mxu0 %v2659_v47  ;;  %1120 = vmatprep.subr.bf16.mxu1 %v2664_v48 }
 0x163   :  { %1080 = vmatpush1.bf16.msra.mxu0 %v2669_v49  ;;  %1121 = vmatpush1.bf16.msra.mxu1 %v2674_v50 }
 0x164   :  { %1081 = vmatprep.subr.bf16.mxu0 %v3973_v1  ;;  %1122 = vmatprep.subr.bf16.mxu1 %v3974_v2 }
 0x167   :  { %1082 = vmatpush1.bf16.msra.mxu0 %v3975_v4  ;;  %1123 = vmatpush1.bf16.msra.mxu1 %v3976_v5 }
 0x168   :  { %1083 = vmatprep.subr.bf16.mxu0 %v3977_v6  ;;  %1124 = vmatprep.subr.bf16.mxu1 %v3978_v7 }
 0x16b   :  { %1084 = vmatpush1.bf16.msra.mxu0 %v3979_v8  ;;  %1125 = vmatpush1.bf16.msra.mxu1 %v3980_v9 }
 0x16c   :  { %1085 = vmatprep.subr.bf16.mxu0 %v3981_v10  ;;  %1126 = vmatprep.subr.bf16.mxu1 %v3982_v11 }
 0x16f   :  { %1086 = vmatpush1.bf16.msra.mxu0 %v3983_v12  ;;  %1127 = vmatpush1.bf16.msra.mxu1 %v3984_v13 }
 0x170   :  { %1087 = vmatprep.subr.bf16.mxu0 %v3985_v14  ;;  %1128 = vmatprep.subr.bf16.mxu1 %v3986_v15 }
 0x173   :  { %1088 = vmatpush1.bf16.msra.mxu0 %v3987_v16  ;;  %1129 = vmatpush1.bf16.msra.mxu1 %v3988_v17 }
 0x174   :  { %1089 = vmatprep.subr.bf16.mxu0 %v3989_v18  ;;  %1130 = vmatprep.subr.bf16.mxu1 %v3990_v19  ;;  %v395_v18 = vshrl.u32 %v394_v0, 7 }
 0x176   :  { %v396_v17 = vsub.s32 0, %v395_v18  ;;  %v404_v19 = vsub.s32 2, %v395_v18 }
 0x177   :  { %1090 = vmatpush1.bf16.msra.mxu0 %v3991_v20  ;;  %1131 = vmatpush1.bf16.msra.mxu1 %v3992_v21  ;;  %v392_v21 = vld [vmem:[%s3813_s6] sm:$0xf]  ;;  %v400_v20 = vsub.s32 1, %v395_v18 }
 0x178   :  { %1158 = vmatprep.subr.bf16.mxu0 %v3993_v22  ;;  %1199 = vmatprep.subr.bf16.mxu1 %v3994_v23  ;;  %v408_v22 = vsub.s32 3, %v395_v18  ;;  %v3111_v16 = vrot.slane %v392_v21, %v396_v17  ;;  %v3113_v23 = vrot.slane %v392_v21, %v404_v19 }
 0x179   :  { %v3115_v15 = vrot.slane %v392_v21, %v400_v20 }
 0x17a   :  { %3995 = vst [vmem:[#allocation5_spill] sm:$0xff] %v3111_v16 }
 0x17b   :  { %3996 = vst [vmem:[#allocation6_spill] sm:$0xff] %v3115_v15 }
 0x1da   :  { %v608_v24 = vpop.f32.mrf.mxu0  ;;  %v649_v25 = vpop.f32.mrf.mxu1 }
 0x1dc   :  { %v610_v26 = vpop.f32.mrf.mxu0  ;;  %v651_v27 = vpop.f32.mrf.mxu1 }
 0x1dd   :  { %v611_v14 = vadd.f32 %v610_v26, %v3115_v15 }
 0x1de   :  { %v612_v28 = vpop.f32.mrf.mxu0  ;;  %v653_v30 = vpop.f32.mrf.mxu1 }
 0x1df   :  { %v3117_v28 = vrot.slane %v392_v21, %v408_v22  ;;  %v609_v30 = vadd.f32 %v608_v24, %v3111_v16 }
 0x1e0   :  { %v613_v31 = vpop.f32.mrf.mxu0  ;;  %v654_v29 = vpop.f32.mrf.mxu1 }
 0x1e1   :  { %v650_v31 = vadd.f32 %v649_v25, %v3113_v23  ;;  %v652_v13 = vadd.f32 %v651_v27, %v3117_v28  ;;  %v3997_v25 = vld [vmem:[#allocation4_spill] sm:$0xff] }
 0x1e2   :  { %vm1266_vm3 = vcmp.gt.s32.totalorder %v3997_v25, 2  ;;  %vm1575_vm4 = vcmp.gt.s32.totalorder %v3997_v25, 3 }
 0x1e3   :  { %v1376_v27 = vsel %vm1266_vm3, 1, %v3954_v56 }
 0x1e4   :  { %1378 = vperm.xlu1 %2011, %v1376_v27  }
 0x1fa   :  { %v883_v29 = vpop.f32.mrf.mxu0  ;;  %v924_v0 = vpop.f32.mrf.mxu1 }
 0x1fb   :  { %v931_v12 = vadd.f32 %v883_v29, %v609_v30  ;;  %v933_v18 = vadd.f32 %v924_v0, %v650_v31 }
 0x1fc   :  { %v885_v17 = vpop.f32.mrf.mxu0  ;;  %v926_v11 = vpop.f32.mrf.mxu1 }
 0x1fd   :  { %v935_v19 = vmul.f32 0.5, %v931_v12  ;;  %v932_v10 = vadd.f32 %v885_v17, %v611_v14  ;;  %v934_v20 = vadd.f32 %v926_v11, %v652_v13  ;;  %v1685_v11 = vsel %vm1575_vm4, 1, %v3954_v56  ;;  %v1994_v17 = vld [vmem:[%s3809_s2 + $0x20] sm:$0xff] }
 0x1fe   :  { %v887_v9 = vpop.f32.mrf.mxu0  ;;  %v928_v21 = vpop.f32.mrf.mxu1  ;;  %1687 = vperm.xlu1 %2011, %v1685_v11  }
 0x1ff   :  { %2166 = vtanh.f32 %v935_v19  ;;  %v939_v22 = vmul.f32 0.5, %v932_v10  ;;  %v944_v26 = vmul.f32 0.5, %v934_v20  ;;  %v1995_v21 = vld [vmem:[%s3809_s2 + $0x28] sm:$0xff] }
 0x200   :  { %v888_v24 = vpop.f32.mrf.mxu0  ;;  %v929_v16 = vpop.f32.mrf.mxu1 }
 0x201   :  { %2168 = vtanh.f32 %v939_v22  ;;  %v3130_v16 = vld [vmem:[%s3815_s8 + $0x8] sm:$0xff] }
 0x202   :  { %2170 = vtanh.f32 %v933_v18 }
 0x203   :  { %2172 = vtanh.f32 %v944_v26 }
 0x20c   :  { %v2167_v30 = vpop.eup %2166 }
 0x20d   :  { %v937_v12 = vmul.f32 0.5, %v2167_v30 }
 0x20e   :  { %v2169_v9 = vpop.eup %2168 }
 0x20f   :  { %v938_v13 = vadd.f32 0.5, %v937_v12  ;;  %v941_v14 = vmul.f32 0.5, %v2169_v9  ;;  %v2171_v10 = vpop.eup %2170  ;;  %v1996_v12 = vld [vmem:[%s3809_s2 + $0x30] sm:$0xff] }
 0x210   :  { %v2173_v24 = vpop.eup %2172 }
 0x211   :  { %v942_v31 = vadd.f32 0.5, %v941_v14  ;;  %v949_v29 = vmul.f32 %v2171_v10, %v938_v13  ;;  %v946_v13 = vmul.f32 0.5, %v2173_v24 }
 0x213   :  { %v948_v0 = vmul.f32 %v3130_v16, %v942_v31 }
 0x215   :  { %v3133_v18 = vadd.f32 %v949_v29, %v948_v0  ;;  %v947_v0 = vadd.f32 0.5, %v946_v13 }
 0x217   :  { %3998 = vst [vmem:[#allocation7_spill] sm:$0xff] %v3133_v18  ;;  %2174 = vtanh.f32 %v3133_v18 }
 0x21a   :  { %v997_v19 = vpop.f32.mrf.mxu0  ;;  %v1038_v20 = vpop.f32.mrf.mxu1 }
 0x21b   :  { %v1045_v22 = vadd.f32 %v1994_v17, %v997_v19  ;;  %v1047_v29 = vadd.f32 %v1996_v12, %v1038_v20  ;;  %v1997_v19 = vld [vmem:[%s3809_s2 + $0x38] sm:$0xff]  ;;  %v358_v20 = vsel %vm356_vm2, %v2830_v58, %v2827_v55  ;;  %v3152_v12 = vpop.permute.xlu0 %1069 }
 0x21c   :  { %v999_v25 = vpop.f32.mrf.mxu0  ;;  %v1040_v26 = vpop.f32.mrf.mxu1  ;;  %vm1071_vm5 = vcmp.eq.s32.totalorder %v3152_v12, 1 }
 0x21d   :  { %v1049_v27 = vmul.f32 0.5, %v1045_v22  ;;  %v1046_v30 = vadd.f32 %v1995_v21, %v999_v25  ;;  %v1048_v22 = vadd.f32 %v1997_v19, %v1040_v26 }
 0x21e   :  { %v1001_v11 = vpop.f32.mrf.mxu0  ;;  %v1042_v9 = vpop.f32.mrf.mxu1 }
 0x21f   :  { %2176 = vtanh.f32 %v1049_v27  ;;  %v1053_v14 = vmul.f32 0.5, %v1046_v30  ;;  %v1058_v25 = vmul.f32 0.5, %v1048_v22  ;;  %v4000_v22 = vld [vmem:[#allocation28_spill] sm:$0xff] }
 0x220   :  { %v1002_v10 = vpop.f32.mrf.mxu0  ;;  %v1043_v31 = vpop.f32.mrf.mxu1 }
 0x221   :  { %2178 = vtanh.f32 %v1053_v14 }
 0x222   :  { %2180 = vtanh.f32 %v1047_v29 }
 0x223   :  { %2182 = vtanh.f32 %v1058_v25  ;;  %v4001_v25 = vld [vmem:[#allocation29_spill] sm:$0xff] }
 0x224   :  { %v2175_v17 = vpop.eup %2174 }
 0x225   :  { %v952_v21 = vmul.f32 %v2175_v17, %v947_v0 }
 0x22c   :  { %v2177_v18 = vpop.eup %2176 }
 0x22d   :  { %v1051_v11 = vmul.f32 0.5, %v2177_v18 }
 0x22e   :  { %v2179_v9 = vpop.eup %2178 }
 0x22f   :  { %v1052_v24 = vadd.f32 0.5, %v1051_v11  ;;  %v1055_v27 = vmul.f32 0.5, %v2179_v9  ;;  %v2181_v10 = vpop.eup %2180  ;;  %v4002_v11 = vld [vmem:[#allocation30_spill] sm:$0xff]  ;;  %v4003_v9 = vld [vmem:[#allocation31_spill] sm:$0xff] }
 0x230   :  { %v2183_v26 = vpop.eup %2182 }
 0x231   :  { %v1056_v30 = vadd.f32 0.5, %v1055_v27  ;;  %v1063_v14 = vmul.f32 %v2181_v10, %v1052_v24  ;;  %v1060_v29 = vmul.f32 0.5, %v2183_v26  ;;  %v4004_v24 = vld [vmem:[#allocation32_spill] sm:$0xff]  ;;  %v4005_v27 = vld [vmem:[#allocation33_spill] sm:$0xff]  ;;  %v4007_v10 = vld [vmem:[#allocation35_spill] sm:$0xff] }
 0x232   :  { %v4012_v26 = vld [vmem:[#allocation40_spill] sm:$0xff] }
 0x233   :  { %v1062_v13 = vmul.f32 %v1056_v30, %v358_v20  ;;  %v1061_v0 = vadd.f32 0.5, %v1060_v29  ;;  %v4006_v30 = vld [vmem:[#allocation34_spill] sm:$0xff]  ;;  %v4013_v29 = vld [vmem:[#allocation41_spill] sm:$0xff] }
 0x235   :  { %v1064_v31 = vadd.f32 %v1063_v14, %v1062_v13  ;;  %v4009_v13 = vld [vmem:[#allocation37_spill] sm:$0xff]  ;;  %v4010_v14 = vld [vmem:[#allocation38_spill] sm:$0xff] }
 0x237   :  { %2184 = vtanh.f32 %v1064_v31  ;;  %v3157_v18 = vsel %vm1071_vm5, %v1064_v31, %v358_v20  ;;  %v4008_v20 = vld [vmem:[#allocation36_spill] sm:$0xff]  ;;  %v4011_v31 = vld [vmem:[#allocation39_spill] sm:$0xff] }
 0x244   :  { %v2185_v17 = vpop.eup %2184 }
 0x245   :  { %v1066_v19 = vmul.f32 %v2185_v17, %v1061_v0  ;;  %v4014_v0 = vld [vmem:[#allocation42_spill] sm:$0xff]  ;;  %v4015_v17 = vld [vmem:[#allocation43_spill] sm:$0xff] }
 0x247   :  { %v3162_v55 = vsel %vm1071_vm5, %v1066_v19, %v2839_v32  ;;  %v3999_v32 = vld [vmem:[#allocation27_spill] sm:$0xff]  ;;  %v4016_v19 = vld [vmem:[#allocation44_spill] sm:$0xff] }
 0x248   :  { %v3166_v58 = vpack.c.bf16 %v3162_v55, %v3162_v55 }
 0x24a   :  { %1108 = vmatmul.mubr.bf16.vlgmr.msra.gmra.mxu0 %v3166_v58  ;;  %1149 = vmatmul.mubr.bf16.vlgmr.msra.gmra.mxu1 %v3166_v58 }
 0x24b   :  { %1159 = vmatpush1.bf16.msra.mxu0 %v2844_v36  ;;  %1200 = vmatpush1.bf16.msra.mxu1 %v2849_v3 }
 0x24c   :  { %1160 = vmatprep.subr.bf16.mxu0 %v2858_v38  ;;  %1201 = vmatprep.subr.bf16.mxu1 %v2863_v35 }
 0x24d   :  { %1190 = vmatprep.mubr.bf16.mxu0 %v3954_v56  ;;  %1231 = vmatprep.mubr.bf16.mxu1 %v3954_v56 }
 0x24f   :  { %1161 = vmatpush1.bf16.msra.mxu0 %v2872_v63  ;;  %1202 = vmatpush1.bf16.msra.mxu1 %v2877_v59 }
 0x250   :  { %1162 = vmatprep.subr.bf16.mxu0 %v2884_v60  ;;  %1203 = vmatprep.subr.bf16.mxu1 %v3999_v32 }
 0x253   :  { %1163 = vmatpush1.bf16.msra.mxu0 %v4000_v22  ;;  %1204 = vmatpush1.bf16.msra.mxu1 %v4001_v25 }
 0x254   :  { %1164 = vmatprep.subr.bf16.mxu0 %v4002_v11  ;;  %1205 = vmatprep.subr.bf16.mxu1 %v4003_v9 }
 0x257   :  { %1165 = vmatpush1.bf16.msra.mxu0 %v4004_v24  ;;  %1206 = vmatpush1.bf16.msra.mxu1 %v4005_v27 }
 0x258   :  { %1166 = vmatprep.subr.bf16.mxu0 %v4006_v30  ;;  %1207 = vmatprep.subr.bf16.mxu1 %v4007_v10 }
 0x25b   :  { %1167 = vmatpush1.bf16.msra.mxu0 %v4008_v20  ;;  %1208 = vmatpush1.bf16.msra.mxu1 %v4009_v13 }
 0x25c   :  { %1168 = vmatprep.subr.bf16.mxu0 %v4010_v14  ;;  %1209 = vmatprep.subr.bf16.mxu1 %v4011_v31  ;;  %v3203_v31 = vsel %vm356_vm2, %v952_v21, %v3028_v54  ;;  %v3224_v54 = vld [vmem:[%s3810_s3 + $0xe0] ss:$16 sps:$4 sm:$0xff]   ;;  %v3230_v21 = vld [vmem:[%s3810_s3 + $0xe8] ss:$16 sps:$4 sm:$0xff]  }
 0x25d   :  { %4018 = vst [vmem:[#allocation9_spill] sm:$0xff] %v3224_v54  ;;  %4019 = vst [vmem:[#allocation10_spill] sm:$0xff] %v3230_v21 }
 0x25f   :  { %1169 = vmatpush1.bf16.msra.mxu0 %v4012_v26  ;;  %1210 = vmatpush1.bf16.msra.mxu1 %v4013_v29 }
 0x260   :  { %1170 = vmatprep.subr.bf16.mxu0 %v4014_v0  ;;  %1211 = vmatprep.subr.bf16.mxu1 %v4015_v17  ;;  %v1157_v17 = vpack.c.bf16 %v3203_v31, %v3203_v31 }
 0x263   :  { %1171 = vmatpush1.bf16.msra.mxu0 %v2994_v53  ;;  %1212 = vmatpush1.bf16.msra.mxu1 %v4016_v19  ;;  %v3212_v19 = vld [vmem:[%s3810_s3 + $0xe4] ss:$16 sps:$4 sm:$0xff]  }
 0x264   :  { %1172 = vmatprep.subr.bf16.mxu0 %v3006_v57  ;;  %1213 = vmatprep.subr.bf16.mxu1 %v3011_v61  ;;  %v3218_v61 = vld [vmem:[%s3810_s3 + $0xec] ss:$16 sps:$4 sm:$0xff]  }
 0x265   :  { %4017 = vst [vmem:[#allocation8_spill] sm:$0xff] %v3218_v61 }
 0x267   :  { %1173 = vmatpush1.bf16.msra.mxu0 %v3018_v52  ;;  %1214 = vmatpush1.bf16.msra.mxu1 %v3023_v62 }
 0x268   :  { %1272 = vmatprep.subr.bf16.mxu0 %v3212_v19  ;;  %1313 = vmatprep.subr.bf16.mxu1 %v3218_v61  ;;  %v3236_v61 = vld [vmem:[%s3810_s3 + $0xc4] ss:$16 sps:$4 sm:$0xff]  }
 0x269   :  { %4020 = vst [vmem:[#allocation11_spill] sm:$0xff] %v3236_v61 }
 0x26a   :  { %1191 = vmatmul.mubr.bf16.vlgmr.msra.gmra.mxu0 %v1157_v17  ;;  %1232 = vmatmul.mubr.bf16.vlgmr.msra.gmra.mxu1 %v1157_v17  ;;  %v3242_v17 = vld [vmem:[%s3810_s3 + $0xcc] ss:$16 sps:$4 sm:$0xff]  }
 0x26b   :  { %1273 = vmatpush1.bf16.msra.mxu0 %v3224_v54  ;;  %1314 = vmatpush1.bf16.msra.mxu1 %v3230_v21  ;;  %4021 = vst [vmem:[#allocation4_spill] sm:$0xff] %v3242_v17  ;;  %v3250_v21 = vld [vmem:[%s3810_s3 + $0xc0] ss:$16 sps:$4 sm:$0xff]   ;;  %v3268_v54 = vld [vmem:[%s3810_s3 + $0xac] ss:$16 sps:$4 sm:$0xff]  }
 0x26c   :  { %1274 = vmatprep.subr.bf16.mxu0 %v3236_v61  ;;  %1315 = vmatprep.subr.bf16.mxu1 %v3242_v17  ;;  %4022 = vst [vmem:[#allocation27_spill] sm:$0xff] %v3250_v21  ;;  %v3256_v61 = vld [vmem:[%s3810_s3 + $0xc8] ss:$16 sps:$4 sm:$0xff]   ;;  %v3262_v17 = vld [vmem:[%s3810_s3 + $0xa4] ss:$16 sps:$4 sm:$0xff]   ;;  %4025 = vst [vmem:[#allocation30_spill] sm:$0xff] %v3268_v54 }
 0x26d   :  { %1304 = vmatprep.mubr.bf16.mxu0 %v3954_v56  ;;  %1345 = vmatprep.mubr.bf16.mxu1 %v3954_v56  ;;  %4023 = vst [vmem:[#allocation28_spill] sm:$0xff] %v3256_v61  ;;  %4024 = vst [vmem:[#allocation29_spill] sm:$0xff] %v3262_v17 }
 0x26f   :  { %1275 = vmatpush1.bf16.msra.mxu0 %v3250_v21  ;;  %1316 = vmatpush1.bf16.msra.mxu1 %v3256_v61  ;;  %v3274_v21 = vld [vmem:[%s3810_s3 + $0xa0] ss:$16 sps:$4 sm:$0xff]   ;;  %v3280_v61 = vld [vmem:[%s3810_s3 + $0xa8] ss:$16 sps:$4 sm:$0xff]  }
 0x270   :  { %1276 = vmatprep.subr.bf16.mxu0 %v3262_v17  ;;  %1317 = vmatprep.subr.bf16.mxu1 %v3268_v54  ;;  %4026 = vst [vmem:[#allocation31_spill] sm:$0xff] %v3274_v21  ;;  %4027 = vst [vmem:[#allocation32_spill] sm:$0xff] %v3280_v61  ;;  %v3286_v17 = vld [vmem:[%s3810_s3 + $0x84] ss:$16 sps:$4 sm:$0xff]   ;;  %v3292_v54 = vld [vmem:[%s3810_s3 + $0x8c] ss:$16 sps:$4 sm:$0xff]  }
 0x271   :  { %4028 = vst [vmem:[#allocation33_spill] sm:$0xff] %v3286_v17  ;;  %4029 = vst [vmem:[#allocation34_spill] sm:$0xff] %v3292_v54  ;;  %v4065_v12 = vld [vmem:[#allocation11_spill] sm:$0xff] }
 0x273   :  { %1277 = vmatpush1.bf16.msra.mxu0 %v3274_v21  ;;  %1318 = vmatpush1.bf16.msra.mxu1 %v3280_v61  ;;  %v3298_v21 = vld [vmem:[%s3810_s3 + $0x80] ss:$16 sps:$4 sm:$0xff]   ;;  %v3304_v61 = vld [vmem:[%s3810_s3 + $0x88] ss:$16 sps:$4 sm:$0xff]  }
 0x274   :  { %1278 = vmatprep.subr.bf16.mxu0 %v3286_v17  ;;  %1319 = vmatprep.subr.bf16.mxu1 %v3292_v54  ;;  %4030 = vst [vmem:[#allocation35_spill] sm:$0xff] %v3298_v21  ;;  %4031 = vst [vmem:[#allocation36_spill] sm:$0xff] %v3304_v61  ;;  %v3310_v17 = vld [vmem:[%s3810_s3 + $0x64] ss:$16 sps:$4 sm:$0xff]   ;;  %v3316_v54 = vld [vmem:[%s3810_s3 + $0x6c] ss:$16 sps:$4 sm:$0xff]  }
 0x275   :  { %4032 = vst [vmem:[#allocation37_spill] sm:$0xff] %v3310_v17  ;;  %4033 = vst [vmem:[#allocation38_spill] sm:$0xff] %v3316_v54 }
 0x277   :  { %1279 = vmatpush1.bf16.msra.mxu0 %v3298_v21  ;;  %1320 = vmatpush1.bf16.msra.mxu1 %v3304_v61  ;;  %v3322_v21 = vld [vmem:[%s3810_s3 + $0x60] ss:$16 sps:$4 sm:$0xff]   ;;  %v3328_v61 = vld [vmem:[%s3810_s3 + $0x68] ss:$16 sps:$4 sm:$0xff]  }
 0x278   :  { %1280 = vmatprep.subr.bf16.mxu0 %v3310_v17  ;;  %1321 = vmatprep.subr.bf16.mxu1 %v3316_v54  ;;  %4034 = vst [vmem:[#allocation40_spill] sm:$0xff] %v3322_v21  ;;  %4035 = vst [vmem:[#allocation41_spill] sm:$0xff] %v3328_v61  ;;  %v3334_v17 = vld [vmem:[%s3810_s3 + $0x44] ss:$16 sps:$4 sm:$0xff]   ;;  %v3340_v54 = vld [vmem:[%s3810_s3 + $0x4c] ss:$16 sps:$4 sm:$0xff]  }
 0x279   :  { %4036 = vst [vmem:[#allocation42_spill] sm:$0xff] %v3334_v17  ;;  %4037 = vst [vmem:[#allocation46_spill] sm:$0xff] %v3340_v54 }
 0x27b   :  { %1281 = vmatpush1.bf16.msra.mxu0 %v3322_v21  ;;  %1322 = vmatpush1.bf16.msra.mxu1 %v3328_v61  ;;  %v3346_v21 = vld [vmem:[%s3810_s3 + $0x40] ss:$16 sps:$4 sm:$0xff]   ;;  %v3352_v61 = vld [vmem:[%s3810_s3 + $0x48] ss:$16 sps:$4 sm:$0xff]  }
 0x27c   :  { %1282 = vmatprep.subr.bf16.mxu0 %v3334_v17  ;;  %1323 = vmatprep.subr.bf16.mxu1 %v3340_v54  ;;  %4038 = vst [vmem:[#allocation47_spill] sm:$0xff] %v3346_v21  ;;  %4039 = vst [vmem:[#allocation48_spill] sm:$0xff] %v3352_v61  ;;  %v3358_v17 = vld [vmem:[%s3810_s3 + $0x24] ss:$16 sps:$4 sm:$0xff]   ;;  %v3364_v54 = vld [vmem:[%s3810_s3 + $0x2c] ss:$16 sps:$4 sm:$0xff]  }
 0x27d   :  { %4040 = vst [vmem:[#allocation49_spill] sm:$0xff] %v3358_v17 }
 0x27f   :  { %1283 = vmatpush1.bf16.msra.mxu0 %v3346_v21  ;;  %1324 = vmatpush1.bf16.msra.mxu1 %v3352_v61  ;;  %v3370_v21 = vld [vmem:[%s3810_s3 + $0x20] ss:$16 sps:$4 sm:$0xff]   ;;  %v3376_v61 = vld [vmem:[%s3810_s3 + $0x28] ss:$16 sps:$4 sm:$0xff]  }
 0x280   :  { %1284 = vmatprep.subr.bf16.mxu0 %v3358_v17  ;;  %1325 = vmatprep.subr.bf16.mxu1 %v3364_v54  ;;  %v3382_v17 = vld [vmem:[%s3810_s3 + $0x4] ss:$16 sps:$4 sm:$0xff]  }
 0x283   :  { %1285 = vmatpush1.bf16.msra.mxu0 %v3370_v21  ;;  %1326 = vmatpush1.bf16.msra.mxu1 %v3376_v61 }
 0x284   :  { %1286 = vmatprep.subr.bf16.mxu0 %v3382_v17  ;;  %1327 = vmatprep.subr.bf16.mxu1 %v2578_v33  ;;  %v4041_v33 = vld [vmem:[#allocation12_spill] sm:$0xff] }
 0x287   :  { %1287 = vmatpush1.bf16.msra.mxu0 %v2584_v34  ;;  %1328 = vmatpush1.bf16.msra.mxu1 %v2597_v37  ;;  %v4042_v34 = vld [vmem:[#allocation13_spill] sm:$0xff]  ;;  %v4043_v37 = vld [vmem:[#allocation14_spill] sm:$0xff] }
 0x288   :  { %1384 = vmatprep.subr.bf16.mxu0 %v2611_v39  ;;  %1425 = vmatprep.subr.bf16.mxu1 %v2616_v40  ;;  %v4044_v39 = vld [vmem:[#allocation15_spill] sm:$0xff]  ;;  %v4045_v40 = vld [vmem:[#allocation16_spill] sm:$0xff] }
 0x28a   :  { %1305 = vmatmul.mubr.bf16.vlgmr.msra.gmra.mxu0 %v3166_v58  ;;  %1346 = vmatmul.mubr.bf16.vlgmr.msra.gmra.mxu1 %v3166_v58 }
 0x28b   :  { %1385 = vmatpush1.bf16.msra.mxu0 %v2621_v41  ;;  %1426 = vmatpush1.bf16.msra.mxu1 %v2626_v42  ;;  %v4046_v41 = vld [vmem:[#allocation17_spill] sm:$0xff]  ;;  %v4047_v42 = vld [vmem:[#allocation18_spill] sm:$0xff] }
 0x28c   :  { %1386 = vmatprep.subr.bf16.mxu0 %v2635_v43  ;;  %1427 = vmatprep.subr.bf16.mxu1 %v2640_v44  ;;  %v4048_v43 = vld [vmem:[#allocation19_spill] sm:$0xff]  ;;  %v4049_v44 = vld [vmem:[#allocation20_spill] sm:$0xff] }
 0x28d   :  { %1416 = vmatprep.mubr.bf16.mxu0 %v3954_v56  ;;  %1457 = vmatprep.mubr.bf16.mxu1 %v3954_v56 }
 0x28f   :  { %1387 = vmatpush1.bf16.msra.mxu0 %v2645_v45  ;;  %1428 = vmatpush1.bf16.msra.mxu1 %v2650_v46  ;;  %v4050_v45 = vld [vmem:[#allocation21_spill] sm:$0xff]  ;;  %v4051_v46 = vld [vmem:[#allocation22_spill] sm:$0xff] }
 0x290   :  { %1388 = vmatprep.subr.bf16.mxu0 %v2659_v47  ;;  %1429 = vmatprep.subr.bf16.mxu1 %v2664_v48  ;;  %v4052_v47 = vld [vmem:[#allocation23_spill] sm:$0xff]  ;;  %v4053_v48 = vld [vmem:[#allocation24_spill] sm:$0xff] }
 0x293   :  { %1389 = vmatpush1.bf16.msra.mxu0 %v2669_v49  ;;  %1430 = vmatpush1.bf16.msra.mxu1 %v2674_v50  ;;  %v4054_v49 = vld [vmem:[#allocation25_spill] sm:$0xff]  ;;  %v4055_v50 = vld [vmem:[#allocation26_spill] sm:$0xff] }
 0x294   :  { %1390 = vmatprep.subr.bf16.mxu0 %v3973_v1  ;;  %1431 = vmatprep.subr.bf16.mxu1 %v3974_v2 }
 0x297   :  { %1391 = vmatpush1.bf16.msra.mxu0 %v3975_v4  ;;  %1432 = vmatpush1.bf16.msra.mxu1 %v3976_v5 }
 0x298   :  { %1392 = vmatprep.subr.bf16.mxu0 %v3977_v6  ;;  %1433 = vmatprep.subr.bf16.mxu1 %v3978_v7 }
 0x29b   :  { %1393 = vmatpush1.bf16.msra.mxu0 %v3979_v8  ;;  %1434 = vmatpush1.bf16.msra.mxu1 %v4041_v33  ;;  %v4056_v33 = vld [vmem:[#allocation5_spill] sm:$0xff] }
 0x29c   :  { %1394 = vmatprep.subr.bf16.mxu0 %v4042_v34  ;;  %1435 = vmatprep.subr.bf16.mxu1 %v4043_v37 }
 0x29f   :  { %1395 = vmatpush1.bf16.msra.mxu0 %v4044_v39  ;;  %1436 = vmatpush1.bf16.msra.mxu1 %v4045_v40 }
 0x2a0   :  { %1396 = vmatprep.subr.bf16.mxu0 %v4046_v41  ;;  %1437 = vmatprep.subr.bf16.mxu1 %v4047_v42 }
 0x2a3   :  { %1397 = vmatpush1.bf16.msra.mxu0 %v4048_v43  ;;  %1438 = vmatpush1.bf16.msra.mxu1 %v4049_v44 }
 0x2a4   :  { %1398 = vmatprep.subr.bf16.mxu0 %v4050_v45  ;;  %1439 = vmatprep.subr.bf16.mxu1 %v4051_v46 }
 0x2a7   :  { %1399 = vmatpush1.bf16.msra.mxu0 %v4052_v47  ;;  %1440 = vmatpush1.bf16.msra.mxu1 %v4053_v48 }
 0x2a8   :  { %1467 = vmatprep.subr.bf16.mxu0 %v4054_v49  ;;  %1508 = vmatprep.subr.bf16.mxu1 %v4055_v50 }
 0x30a   :  { %v1109_v1 = vpop.f32.mrf.mxu0  ;;  %v1150_v2 = vpop.f32.mrf.mxu1 }
 0x30b   :  { %v1110_v34 = vadd.f32 %v1109_v1, %v4056_v33  ;;  %v1151_v37 = vadd.f32 %v1150_v2, %v3113_v23 }
 0x30c   :  { %v1111_v4 = vpop.f32.mrf.mxu0  ;;  %v1152_v5 = vpop.f32.mrf.mxu1 }
 0x30d   :  { %v1112_v41 = vadd.f32 %v1111_v4, %v3115_v15  ;;  %v1153_v42 = vadd.f32 %v1152_v5, %v3117_v28 }
 0x30e   :  { %v1113_v6 = vpop.f32.mrf.mxu0  ;;  %v1154_v7 = vpop.f32.mrf.mxu1 }
 0x310   :  { %v1114_v8 = vpop.f32.mrf.mxu0  ;;  %v1155_v58 = vpop.f32.mrf.mxu1 }
 0x32a   :  { %v1192_v39 = vpop.f32.mrf.mxu0  ;;  %v1233_v40 = vpop.f32.mrf.mxu1 }
 0x32b   :  { %v1240_v43 = vadd.f32 %v1192_v39, %v1110_v34  ;;  %v1242_v44 = vadd.f32 %v1233_v40, %v1151_v37 }
 0x32c   :  { %v1194_v45 = vpop.f32.mrf.mxu0  ;;  %v1235_v46 = vpop.f32.mrf.mxu1 }
 0x32d   :  { %v1244_v47 = vmul.f32 0.5, %v1240_v43  ;;  %v1241_v48 = vadd.f32 %v1194_v45, %v1112_v41  ;;  %v1243_v49 = vadd.f32 %v1235_v46, %v1153_v42  ;;  %v4057_v41 = vld [vmem:[#allocation7_spill] sm:$0xff] }
 0x32e   :  { %v1196_v50 = vpop.f32.mrf.mxu0  ;;  %v1237_v6 = vpop.f32.mrf.mxu1  ;;  %v954_v42 = vsel %vm356_vm2, %v4057_v41, %v3130_v16  ;;  %v2001_v41 = vld [vmem:[%s3809_s2 + $0x58] sm:$0xff] }
 0x32f   :  { %2186 = vtanh.f32 %v1244_v47  ;;  %v1248_v7 = vmul.f32 0.5, %v1241_v48  ;;  %v1253_v2 = vmul.f32 0.5, %v1243_v49  ;;  %v1999_v48 = vld [vmem:[%s3809_s2 + $0x48] sm:$0xff] }
 0x330   :  { %v1197_v1 = vpop.f32.mrf.mxu0  ;;  %v1238_v8 = vpop.f32.mrf.mxu1 }
 0x331   :  { %2188 = vtanh.f32 %v1248_v7  ;;  %v2000_v1 = vld [vmem:[%s3809_s2 + $0x50] sm:$0xff] }
 0x332   :  { %2190 = vtanh.f32 %v1242_v44 }
 0x333   :  { %2192 = vtanh.f32 %v1253_v2 }
 0x33c   :  { %v2187_v58 = vpop.eup %2186 }
 0x33d   :  { %v1246_v4 = vmul.f32 0.5, %v2187_v58 }
 0x33e   :  { %v2189_v15 = vpop.eup %2188 }
 0x33f   :  { %v1247_v5 = vadd.f32 0.5, %v1246_v4  ;;  %v1250_v34 = vmul.f32 0.5, %v2189_v15  ;;  %v2191_v37 = vpop.eup %2190  ;;  %v1998_v15 = vld [vmem:[%s3809_s2 + $0x40] sm:$0xff] }
 0x340   :  { %v2193_v51 = vpop.eup %2192 }
 0x341   :  { %v1251_v39 = vadd.f32 0.5, %v1250_v34  ;;  %v1258_v40 = vmul.f32 %v2191_v37, %v1247_v5  ;;  %v1255_v58 = vmul.f32 0.5, %v2193_v51 }
 0x343   :  { %v1257_v43 = vmul.f32 %v1251_v39, %v954_v42  ;;  %v1256_v39 = vadd.f32 0.5, %v1255_v58 }
 0x345   :  { %v1259_v45 = vadd.f32 %v1258_v40, %v1257_v43 }
 0x347   :  { %2194 = vtanh.f32 %v1259_v45  ;;  %v3436_v44 = vsel %vm1071_vm5, %v1259_v45, %v954_v42 }
 0x34a   :  { %v1306_v46 = vpop.f32.mrf.mxu0  ;;  %v1347_v47 = vpop.f32.mrf.mxu1 }
 0x34b   :  { %v1354_v49 = vadd.f32 %v1998_v15, %v1306_v46  ;;  %v1356_v37 = vadd.f32 %v2000_v1, %v1347_v47 }
 0x34c   :  { %v1308_v16 = vpop.f32.mrf.mxu0  ;;  %v1349_v50 = vpop.f32.mrf.mxu1 }
 0x34d   :  { %v1358_v6 = vmul.f32 0.5, %v1354_v49  ;;  %v1355_v7 = vadd.f32 %v1999_v48, %v1308_v16  ;;  %v1357_v43 = vadd.f32 %v2001_v41, %v1349_v50  ;;  %v2271_v41 = vld [vmem:[%s3812_s5 + $0xe8] ss:$16 sps:$4 sm:$0xff]  }
 0x34e   :  { %v1310_v8 = vpop.f32.mrf.mxu0  ;;  %v1351_v2 = vpop.f32.mrf.mxu1 }
 0x34f   :  { %2196 = vtanh.f32 %v1358_v6  ;;  %v1362_v4 = vmul.f32 0.5, %v1355_v7  ;;  %v1367_v45 = vmul.f32 0.5, %v1357_v43  ;;  %v3450_v6 = vpop.permute.xlu1 %1378  ;;  %v2273_v43 = vld [vmem:[%s3812_s5 + $0xcc] ss:$16 sps:$4 sm:$0xff]  }
 0x350   :  { %v1311_v5 = vpop.f32.mrf.mxu0  ;;  %v1352_v34 = vpop.f32.mrf.mxu1  ;;  %vm1380_vm6 = vcmp.eq.s32.totalorder %v3450_v6, 1 }
 0x351   :  { %2198 = vtanh.f32 %v1362_v4 }
 0x352   :  { %2200 = vtanh.f32 %v1356_v37 }
 0x353   :  { %2202 = vtanh.f32 %v1367_v45  ;;  %v2274_v45 = vld [vmem:[%s3812_s5 + $0xc0] ss:$16 sps:$4 sm:$0xff]  }
 0x354   :  { %v2195_v40 = vpop.eup %2194 }
 0x355   :  { %v1261_v42 = vmul.f32 %v2195_v40, %v1256_v39  ;;  %v2266_v40 = vld [vmem:[%s3810_s3] ss:$16 sps:$4 sm:$0xff]  }
 0x35c   :  { %v2197_v15 = vpop.eup %2196 }
 0x35d   :  { %v1360_v46 = vmul.f32 0.5, %v2197_v15  ;;  %v2275_v15 = vld [vmem:[%s3812_s5 + $0xc8] ss:$16 sps:$4 sm:$0xff]  }
 0x35e   :  { %v2199_v48 = vpop.eup %2198 }
 0x35f   :  { %v1361_v49 = vadd.f32 0.5, %v1360_v46  ;;  %v1364_v51 = vmul.f32 0.5, %v2199_v48  ;;  %v2201_v47 = vpop.eup %2200  ;;  %v2276_v46 = vld [vmem:[%s3812_s5 + $0xa4] ss:$16 sps:$4 sm:$0xff]   ;;  %v2277_v48 = vld [vmem:[%s3812_s5 + $0xac] ss:$16 sps:$4 sm:$0xff]  }
 0x360   :  { %v2203_v2 = vpop.eup %2202 }
 0x361   :  { %v1365_v16 = vadd.f32 0.5, %v1364_v51  ;;  %v1372_v1 = vmul.f32 %v2201_v47, %v1361_v49  ;;  %v1369_v58 = vmul.f32 0.5, %v2203_v2  ;;  %v2278_v49 = vld [vmem:[%s3812_s5 + $0xa0] ss:$16 sps:$4 sm:$0xff]   ;;  %v2279_v51 = vld [vmem:[%s3812_s5 + $0xa8] ss:$16 sps:$4 sm:$0xff]  }
 0x362   :  { %v2281_v47 = vld [vmem:[%s3812_s5 + $0x8c] ss:$16 sps:$4 sm:$0xff]  }
 0x363   :  { %v1371_v7 = vmul.f32 %v1365_v16, %v3157_v18  ;;  %v1370_v4 = vadd.f32 0.5, %v1369_v58  ;;  %v2280_v16 = vld [vmem:[%s3812_s5 + $0x84] ss:$16 sps:$4 sm:$0xff]   ;;  %v2285_v2 = vld [vmem:[%s3812_s5 + $0x6c] ss:$16 sps:$4 sm:$0xff]  }
 0x364   :  { %v2286_v58 = vld [vmem:[%s3812_s5 + $0x60] ss:$16 sps:$4 sm:$0xff]  }
 0x365   :  { %v1373_v8 = vadd.f32 %v1372_v1, %v1371_v7  ;;  %v2282_v7 = vld [vmem:[%s3812_s5 + $0x80] ss:$16 sps:$4 sm:$0xff]   ;;  %v2283_v1 = vld [vmem:[%s3812_s5 + $0x88] ss:$16 sps:$4 sm:$0xff]  }
 0x367   :  { %2204 = vtanh.f32 %v1373_v8  ;;  %v3457_v50 = vsel %vm1380_vm6, %v1373_v8, %v3157_v18  ;;  %v4066_v18 = vld [vmem:[#allocation4_spill] sm:$0xff] }
 0x368   :  { %v2284_v8 = vld [vmem:[%s3812_s5 + $0x64] ss:$16 sps:$4 sm:$0xff]  }
 0x374   :  { %v2205_v5 = vpop.eup %2204 }
 0x375   :  { %v1375_v34 = vmul.f32 %v2205_v5, %v1370_v4  ;;  %v2287_v4 = vld [vmem:[%s3812_s5 + $0x68] ss:$16 sps:$4 sm:$0xff]   ;;  %v2288_v5 = vld [vmem:[%s3812_s5 + $0x44] ss:$16 sps:$4 sm:$0xff]  }
 0x377   :  { %v3462_v37 = vsel %vm1380_vm6, %v1375_v34, %v3162_v55  ;;  %v4069_v55 = vld [vmem:[#allocation29_spill] sm:$0xff] }
 0x378   :  { %v3466_v39 = vpack.c.bf16 %v3462_v37, %v3462_v37  ;;  %v2289_v34 = vld [vmem:[%s3812_s5 + $0x4c] ss:$16 sps:$4 sm:$0xff]  }
 0x37a   :  { %1417 = vmatmul.mubr.bf16.vlgmr.msra.gmra.mxu0 %v3466_v39  ;;  %1458 = vmatmul.mubr.bf16.vlgmr.msra.gmra.mxu1 %v3466_v39 }
 0x37b   :  { %1468 = vmatpush1.bf16.msra.mxu0 %v2844_v36  ;;  %1509 = vmatpush1.bf16.msra.mxu1 %v2849_v3  ;;  %v4058_v36 = vld [vmem:[#allocation39_spill] sm:$0xff] }
 0x37c   :  { %1469 = vmatprep.subr.bf16.mxu0 %v2858_v38  ;;  %1510 = vmatprep.subr.bf16.mxu1 %v2863_v35  ;;  %v4059_v3 = vld [vmem:[#allocation43_spill] sm:$0xff]  ;;  %v4060_v38 = vld [vmem:[#allocation44_spill] sm:$0xff]  ;;  %v4061_v35 = vld [vmem:[#allocation45_spill] sm:$0xff] }
 0x37d   :  { %1499 = vmatprep.mubr.bf16.mxu0 %v3954_v56  ;;  %1540 = vmatprep.mubr.bf16.mxu1 %v3954_v56 }
 0x37f   :  { %1470 = vmatpush1.bf16.msra.mxu0 %v2872_v63  ;;  %1511 = vmatpush1.bf16.msra.mxu1 %v2877_v59  ;;  %v3503_v63 = vsel %vm1071_vm5, %v1261_v42, %v3203_v31  ;;  %v4082_v31 = vld [vmem:[#allocation46_spill] sm:$0xff] }
 0x380   :  { %1471 = vmatprep.subr.bf16.mxu0 %v2884_v60  ;;  %1512 = vmatprep.subr.bf16.mxu1 %v3999_v32  ;;  %v1466_v59 = vpack.c.bf16 %v3503_v63, %v3503_v63  ;;  %v4062_v60 = vld [vmem:[#allocation8_spill] sm:$0xff]  ;;  %v4070_v32 = vld [vmem:[#allocation30_spill] sm:$0xff] }
 0x381   :  { %v2272_v42 = vld [vmem:[%s3812_s5 + $0xc4] ss:$16 sps:$4 sm:$0xff]  }
 0x383   :  { %1472 = vmatpush1.bf16.msra.mxu0 %v4000_v22  ;;  %1513 = vmatpush1.bf16.msra.mxu1 %v4001_v25  ;;  %v4071_v22 = vld [vmem:[#allocation31_spill] sm:$0xff]  ;;  %v4072_v25 = vld [vmem:[#allocation32_spill] sm:$0xff] }
 0x384   :  { %1473 = vmatprep.subr.bf16.mxu0 %v4002_v11  ;;  %1514 = vmatprep.subr.bf16.mxu1 %v4003_v9  ;;  %v4073_v11 = vld [vmem:[#allocation33_spill] sm:$0xff]  ;;  %v4074_v9 = vld [vmem:[#allocation34_spill] sm:$0xff] }
 0x387   :  { %1474 = vmatpush1.bf16.msra.mxu0 %v4004_v24  ;;  %1515 = vmatpush1.bf16.msra.mxu1 %v4005_v27  ;;  %v4075_v24 = vld [vmem:[#allocation35_spill] sm:$0xff]  ;;  %v4076_v27 = vld [vmem:[#allocation36_spill] sm:$0xff] }
 0x388   :  { %1475 = vmatprep.subr.bf16.mxu0 %v4006_v30  ;;  %1516 = vmatprep.subr.bf16.mxu1 %v4007_v10  ;;  %v4077_v30 = vld [vmem:[#allocation37_spill] sm:$0xff]  ;;  %v4078_v10 = vld [vmem:[#allocation38_spill] sm:$0xff] }
 0x38b   :  { %1476 = vmatpush1.bf16.msra.mxu0 %v4008_v20  ;;  %1517 = vmatpush1.bf16.msra.mxu1 %v4009_v13  ;;  %v4079_v20 = vld [vmem:[#allocation40_spill] sm:$0xff]  ;;  %v4080_v13 = vld [vmem:[#allocation41_spill] sm:$0xff] }
 0x38c   :  { %1477 = vmatprep.subr.bf16.mxu0 %v4010_v14  ;;  %1518 = vmatprep.subr.bf16.mxu1 %v4058_v36  ;;  %v4081_v14 = vld [vmem:[#allocation42_spill] sm:$0xff]  ;;  %v2291_v36 = vld [vmem:[%s3812_s5 + $0x48] ss:$16 sps:$4 sm:$0xff]  }
 0x38f   :  { %1478 = vmatpush1.bf16.msra.mxu0 %v4012_v26  ;;  %1519 = vmatpush1.bf16.msra.mxu1 %v4013_v29  ;;  %v4083_v26 = vld [vmem:[#allocation47_spill] sm:$0xff]  ;;  %v4084_v29 = vld [vmem:[#allocation48_spill] sm:$0xff] }
 0x390   :  { %1479 = vmatprep.subr.bf16.mxu0 %v4014_v0  ;;  %1520 = vmatprep.subr.bf16.mxu1 %v4059_v3  ;;  %v4085_v0 = vld [vmem:[#allocation49_spill] sm:$0xff]  ;;  %v2292_v3 = vld [vmem:[%s3812_s5 + $0x24] ss:$16 sps:$4 sm:$0xff]  }
 0x393   :  { %1480 = vmatpush1.bf16.msra.mxu0 %v2994_v53  ;;  %1521 = vmatpush1.bf16.msra.mxu1 %v4060_v38  ;;  %v4064_v53 = vld [vmem:[#allocation10_spill] sm:$0xff]  ;;  %v2293_v38 = vld [vmem:[%s3812_s5 + $0x2c] ss:$16 sps:$4 sm:$0xff]  }
 0x394   :  { %1481 = vmatprep.subr.bf16.mxu0 %v3006_v57  ;;  %1522 = vmatprep.subr.bf16.mxu1 %v4061_v35  ;;  %v4063_v57 = vld [vmem:[#allocation9_spill] sm:$0xff]  ;;  %v2294_v35 = vld [vmem:[%s3812_s5 + $0x20] ss:$16 sps:$4 sm:$0xff]  }
 0x397   :  { %1482 = vmatpush1.bf16.msra.mxu0 %v3018_v52  ;;  %1523 = vmatpush1.bf16.msra.mxu1 %v3023_v62  ;;  %v4067_v52 = vld [vmem:[#allocation27_spill] sm:$0xff]  ;;  %v4068_v62 = vld [vmem:[#allocation28_spill] sm:$0xff] }
 0x398   :  { %1581 = vmatprep.subr.bf16.mxu0 %v3212_v19  ;;  %1622 = vmatprep.subr.bf16.mxu1 %v4062_v60  ;;  %v2265_v19 = vld [vmem:[%s3810_s3 + $0xc] ss:$16 sps:$4 sm:$0xff]   ;;  %v2296_v60 = vld [vmem:[%s3812_s5 + $0x4] ss:$16 sps:$4 sm:$0xff]  }
 0x39a   :  { %1500 = vmatmul.mubr.bf16.vlgmr.msra.gmra.mxu0 %v1466_v59  ;;  %1541 = vmatmul.mubr.bf16.vlgmr.msra.gmra.mxu1 %v1466_v59  ;;  %v2295_v59 = vld [vmem:[%s3812_s5 + $0x28] ss:$16 sps:$4 sm:$0xff]  }
 0x39b   :  { %1582 = vmatpush1.bf16.msra.mxu0 %v4063_v57  ;;  %1623 = vmatpush1.bf16.msra.mxu1 %v4064_v53  ;;  %v2297_v57 = vld [vmem:[%s3812_s5 + $0xc] ss:$16 sps:$4 sm:$0xff]   ;;  %v2298_v53 = vld [vmem:[%s3812_s5] ss:$16 sps:$4 sm:$0xff]  }
 0x39c   :  { %1583 = vmatprep.subr.bf16.mxu0 %v4065_v12  ;;  %1624 = vmatprep.subr.bf16.mxu1 %v4066_v18  ;;  %v2299_v12 = vld [vmem:[%s3812_s5 + $0x8] ss:$16 sps:$4 sm:$0xff]   ;;  %v2300_v18 = vld [vmem:[%s3811_s4 + $0xe4] ss:$16 sps:$4 sm:$0xff]  }
 0x39d   :  { %1613 = vmatprep.mubr.bf16.mxu0 %v3954_v56  ;;  %1654 = vmatprep.mubr.bf16.mxu1 %v3954_v56 }
 0x39f   :  { %1584 = vmatpush1.bf16.msra.mxu0 %v4067_v52  ;;  %1625 = vmatpush1.bf16.msra.mxu1 %v4068_v62  ;;  %v2301_v52 = vld [vmem:[%s3811_s4 + $0xec] ss:$16 sps:$4 sm:$0xff]  }
 0x3a0   :  { %1585 = vmatprep.subr.bf16.mxu0 %v4069_v55  ;;  %1626 = vmatprep.subr.bf16.mxu1 %v4070_v32 }
 0x3a3   :  { %1586 = vmatpush1.bf16.msra.mxu0 %v4071_v22  ;;  %1627 = vmatpush1.bf16.msra.mxu1 %v4072_v25 }
 0x3a4   :  { %1587 = vmatprep.subr.bf16.mxu0 %v4073_v11  ;;  %1628 = vmatprep.subr.bf16.mxu1 %v4074_v9 }
 0x3a7   :  { %1588 = vmatpush1.bf16.msra.mxu0 %v4075_v24  ;;  %1629 = vmatpush1.bf16.msra.mxu1 %v4076_v27 }
 0x3a8   :  { %1589 = vmatprep.subr.bf16.mxu0 %v4077_v30  ;;  %1630 = vmatprep.subr.bf16.mxu1 %v4078_v10 }
 0x3ab   :  { %1590 = vmatpush1.bf16.msra.mxu0 %v4079_v20  ;;  %1631 = vmatpush1.bf16.msra.mxu1 %v4080_v13  ;;  %v4086_v13 = vld [vmem:[#allocation6_spill] sm:$0xff] }
 0x3ac   :  { %1591 = vmatprep.subr.bf16.mxu0 %v4081_v14  ;;  %1632 = vmatprep.subr.bf16.mxu1 %v4082_v31 }
 0x3af   :  { %1592 = vmatpush1.bf16.msra.mxu0 %v4083_v26  ;;  %1633 = vmatpush1.bf16.msra.mxu1 %v4084_v29 }
 0x3b0   :  { %1593 = vmatprep.subr.bf16.mxu0 %v4085_v0  ;;  %1634 = vmatprep.subr.bf16.mxu1 %v3364_v54  ;;  %v2267_v54 = vld [vmem:[%s3810_s3 + $0x8] ss:$16 sps:$4 sm:$0xff]  }
 0x3b3   :  { %1594 = vmatpush1.bf16.msra.mxu0 %v3370_v21  ;;  %1635 = vmatpush1.bf16.msra.mxu1 %v3376_v61  ;;  %v2268_v61 = vld [vmem:[%s3812_s5 + $0xe4] ss:$16 sps:$4 sm:$0xff]   ;;  %v2269_v21 = vld [vmem:[%s3812_s5 + $0xec] ss:$16 sps:$4 sm:$0xff]  }
 0x3b4   :  { %1595 = vmatprep.subr.bf16.mxu0 %v3382_v17  ;;  %1636 = vmatprep.subr.bf16.mxu1 %v2265_v19  ;;  %v2270_v17 = vld [vmem:[%s3812_s5 + $0xe0] ss:$16 sps:$4 sm:$0xff]  }
 0x3b7   :  { %1596 = vmatpush1.bf16.msra.mxu0 %v2266_v40  ;;  %1637 = vmatpush1.bf16.msra.mxu1 %v2267_v54 }
 0x3b8   :  { %1693 = vmatprep.subr.bf16.mxu0 %v2268_v61  ;;  %1734 = vmatprep.subr.bf16.mxu1 %v2269_v21 }
 0x3ba   :  { %1614 = vmatmul.mubr.bf16.vlgmr.msra.gmra.mxu0 %v3466_v39  ;;  %1655 = vmatmul.mubr.bf16.vlgmr.msra.gmra.mxu1 %v3466_v39  ;;  %v2290_v39 = vld [vmem:[%s3812_s5 + $0x40] ss:$16 sps:$4 sm:$0xff]  }
 0x3bb   :  { %1694 = vmatpush1.bf16.msra.mxu0 %v2270_v17  ;;  %1735 = vmatpush1.bf16.msra.mxu1 %v2271_v41 }
 0x3bc   :  { %1695 = vmatprep.subr.bf16.mxu0 %v2272_v42  ;;  %1736 = vmatprep.subr.bf16.mxu1 %v2273_v43 }
 0x3bd   :  { %1725 = vmatprep.mubr.bf16.mxu0 %v3954_v56  ;;  %1766 = vmatprep.mubr.bf16.mxu1 %v3954_v56 }
 0x3bf   :  { %1696 = vmatpush1.bf16.msra.mxu0 %v2274_v45  ;;  %1737 = vmatpush1.bf16.msra.mxu1 %v2275_v15 }
 0x3c0   :  { %1697 = vmatprep.subr.bf16.mxu0 %v2276_v46  ;;  %1738 = vmatprep.subr.bf16.mxu1 %v2277_v48 }
 0x3c3   :  { %1698 = vmatpush1.bf16.msra.mxu0 %v2278_v49  ;;  %1739 = vmatpush1.bf16.msra.mxu1 %v2279_v51 }
 0x3c4   :  { %1699 = vmatprep.subr.bf16.mxu0 %v2280_v16  ;;  %1740 = vmatprep.subr.bf16.mxu1 %v2281_v47 }
 0x3c7   :  { %1700 = vmatpush1.bf16.msra.mxu0 %v2282_v7  ;;  %1741 = vmatpush1.bf16.msra.mxu1 %v2283_v1 }
 0x3c8   :  { %1701 = vmatprep.subr.bf16.mxu0 %v2284_v8  ;;  %1742 = vmatprep.subr.bf16.mxu1 %v2285_v2 }
 0x3cb   :  { %1702 = vmatpush1.bf16.msra.mxu0 %v2286_v58  ;;  %1743 = vmatpush1.bf16.msra.mxu1 %v2287_v4  ;;  %v2002_v58 = vld [vmem:[%s3809_s2 + $0x60] sm:$0xff] }
 0x3cc   :  { %1703 = vmatprep.subr.bf16.mxu0 %v2288_v5  ;;  %1744 = vmatprep.subr.bf16.mxu1 %v2289_v34  ;;  %v2003_v34 = vld [vmem:[%s3809_s2 + $0x68] sm:$0xff] }
 0x3cf   :  { %1704 = vmatpush1.bf16.msra.mxu0 %v2290_v39  ;;  %1745 = vmatpush1.bf16.msra.mxu1 %v2291_v36 }
 0x3d0   :  { %1705 = vmatprep.subr.bf16.mxu0 %v2292_v3  ;;  %1746 = vmatprep.subr.bf16.mxu1 %v2293_v38 }
 0x3d3   :  { %1706 = vmatpush1.bf16.msra.mxu0 %v2294_v35  ;;  %1747 = vmatpush1.bf16.msra.mxu1 %v2295_v59 }
 0x3d4   :  { %1707 = vmatprep.subr.bf16.mxu0 %v2296_v60  ;;  %1748 = vmatprep.subr.bf16.mxu1 %v2297_v57 }
 0x3d7   :  { %1708 = vmatpush1.bf16.msra.mxu0 %v2298_v53  ;;  %1749 = vmatpush1.bf16.msra.mxu1 %v2299_v12 }
 0x3d8   :  { %1776 = vmatprep.subr.bf16.mxu0 %v2300_v18  ;;  %1817 = vmatprep.subr.bf16.mxu1 %v2301_v52 }
 0x43a   :  { %v1418_v62 = vpop.f32.mrf.mxu0  ;;  %v1459_v55 = vpop.f32.mrf.mxu1 }
 0x43b   :  { %v1419_v27 = vadd.f32 %v1418_v62, %v4056_v33  ;;  %v1460_v30 = vadd.f32 %v1459_v55, %v3113_v23 }
 0x43c   :  { %v1420_v32 = vpop.f32.mrf.mxu0  ;;  %v1461_v22 = vpop.f32.mrf.mxu1 }
 0x43d   :  { %v1421_v14 = vadd.f32 %v1420_v32, %v4086_v13  ;;  %v1462_v31 = vadd.f32 %v1461_v22, %v3117_v28  ;;  %v2005_v22 = vld [vmem:[%s3809_s2 + $0x78] sm:$0xff] }
 0x43e   :  { %v1422_v25 = vpop.f32.mrf.mxu0  ;;  %v1463_v11 = vpop.f32.mrf.mxu1 }
 0x440   :  { %v1423_v9 = vpop.f32.mrf.mxu0  ;;  %v1464_v24 = vpop.f32.mrf.mxu1 }
 0x45a   :  { %v1501_v10 = vpop.f32.mrf.mxu0  ;;  %v1542_v20 = vpop.f32.mrf.mxu1 }
 0x45b   :  { %v1549_v26 = vadd.f32 %v1501_v10, %v1419_v27  ;;  %v1551_v29 = vadd.f32 %v1542_v20, %v1460_v30 }
 0x45c   :  { %v1503_v0 = vpop.f32.mrf.mxu0  ;;  %v1544_v19 = vpop.f32.mrf.mxu1 }
 0x45d   :  { %v1553_v40 = vmul.f32 0.5, %v1549_v26  ;;  %v1550_v54 = vadd.f32 %v1503_v0, %v1421_v14  ;;  %v1552_v61 = vadd.f32 %v1544_v19, %v1462_v31  ;;  %v3679_v26 = vpop.permute.xlu1 %1687 }
 0x45e   :  { %v1505_v21 = vpop.f32.mrf.mxu0  ;;  %v1546_v17 = vpop.f32.mrf.mxu1  ;;  %vm1689_vm7 = vcmp.eq.s32.totalorder %v3679_v26, 1 }
 0x45f   :  { %2206 = vtanh.f32 %v1553_v40  ;;  %v1557_v41 = vmul.f32 0.5, %v1550_v54  ;;  %v1562_v45 = vmul.f32 0.5, %v1552_v61 }
 0x460   :  { %v1506_v42 = vpop.f32.mrf.mxu0  ;;  %v1547_v43 = vpop.f32.mrf.mxu1 }
 0x461   :  { %2208 = vtanh.f32 %v1557_v41 }
 0x462   :  { %2210 = vtanh.f32 %v1551_v29 }
 0x463   :  { %2212 = vtanh.f32 %v1562_v45  ;;  %v2303_v45 = vld [vmem:[%s3811_s4 + $0xe8] ss:$16 sps:$4 sm:$0xff]  }
 0x46c   :  { %v2207_v15 = vpop.eup %2206 }
 0x46d   :  { %v1555_v46 = vmul.f32 0.5, %v2207_v15  ;;  %v2305_v15 = vld [vmem:[%s3811_s4 + $0xcc] ss:$16 sps:$4 sm:$0xff]  }
 0x46e   :  { %v2209_v48 = vpop.eup %2208 }
 0x46f   :  { %v1556_v49 = vadd.f32 0.5, %v1555_v46  ;;  %v1559_v51 = vmul.f32 0.5, %v2209_v48  ;;  %v2211_v16 = vpop.eup %2210  ;;  %v2306_v46 = vld [vmem:[%s3811_s4 + $0xc0] ss:$16 sps:$4 sm:$0xff]   ;;  %v2307_v48 = vld [vmem:[%s3811_s4 + $0xc8] ss:$16 sps:$4 sm:$0xff]  }
 0x470   :  { %v2213_v36 = vpop.eup %2212 }
 0x471   :  { %v1560_v47 = vadd.f32 0.5, %v1559_v51  ;;  %v1567_v7 = vmul.f32 %v2211_v16, %v1556_v49  ;;  %v1564_v53 = vmul.f32 0.5, %v2213_v36  ;;  %v2308_v49 = vld [vmem:[%s3811_s4 + $0xa4] ss:$16 sps:$4 sm:$0xff]   ;;  %v2309_v51 = vld [vmem:[%s3811_s4 + $0xac] ss:$16 sps:$4 sm:$0xff]  }
 0x472   :  { %v2311_v16 = vld [vmem:[%s3811_s4 + $0xa8] ss:$16 sps:$4 sm:$0xff]   ;;  %v2321_v36 = vld [vmem:[%s3811_s4 + $0x4c] ss:$16 sps:$4 sm:$0xff]  }
 0x473   :  { %v1566_v1 = vmul.f32 %v1560_v47, %v3436_v44  ;;  %v1565_v55 = vadd.f32 0.5, %v1564_v53  ;;  %v2312_v47 = vld [vmem:[%s3811_s4 + $0x84] ss:$16 sps:$4 sm:$0xff]   ;;  %v2329_v53 = vld [vmem:[%s3811_s4 + $0xc] ss:$16 sps:$4 sm:$0xff]  }
 0x475   :  { %v1568_v8 = vadd.f32 %v1567_v7, %v1566_v1  ;;  %v2313_v7 = vld [vmem:[%s3811_s4 + $0x8c] ss:$16 sps:$4 sm:$0xff]   ;;  %v2314_v1 = vld [vmem:[%s3811_s4 + $0x80] ss:$16 sps:$4 sm:$0xff]  }
 0x477   :  { %2214 = vtanh.f32 %v1568_v8  ;;  %v3663_v2 = vsel %vm1380_vm6, %v1568_v8, %v3436_v44  ;;  %v2004_v44 = vld [vmem:[%s3809_s2 + $0x70] sm:$0xff]  ;;  %v2315_v8 = vld [vmem:[%s3811_s4 + $0x88] ss:$16 sps:$4 sm:$0xff]  }
 0x47a   :  { %v1615_v4 = vpop.f32.mrf.mxu0  ;;  %v1656_v5 = vpop.f32.mrf.mxu1 }
 0x47b   :  { %v1663_v39 = vadd.f32 %v2002_v58, %v1615_v4  ;;  %v1665_v62 = vadd.f32 %v2004_v44, %v1656_v5  ;;  %v2316_v58 = vld [vmem:[%s3811_s4 + $0x64] ss:$16 sps:$4 sm:$0xff]   ;;  %v2317_v4 = vld [vmem:[%s3811_s4 + $0x6c] ss:$16 sps:$4 sm:$0xff]   ;;  %v2318_v5 = vld [vmem:[%s3811_s4 + $0x60] ss:$16 sps:$4 sm:$0xff]  }
 0x47c   :  { %v1617_v3 = vpop.f32.mrf.mxu0  ;;  %v1658_v38 = vpop.f32.mrf.mxu1  ;;  %v2326_v44 = vld [vmem:[%s3811_s4 + $0x20] ss:$16 sps:$4 sm:$0xff]  }
 0x47d   :  { %v1667_v35 = vmul.f32 0.5, %v1663_v39  ;;  %v1664_v59 = vadd.f32 %v2003_v34, %v1617_v3  ;;  %v1666_v11 = vadd.f32 %v2005_v22, %v1658_v38  ;;  %v2319_v34 = vld [vmem:[%s3811_s4 + $0x68] ss:$16 sps:$4 sm:$0xff]   ;;  %v2320_v39 = vld [vmem:[%s3811_s4 + $0x44] ss:$16 sps:$4 sm:$0xff]  }
 0x47e   :  { %v1619_v60 = vpop.f32.mrf.mxu0  ;;  %v1660_v57 = vpop.f32.mrf.mxu1  ;;  %v2322_v3 = vld [vmem:[%s3811_s4 + $0x40] ss:$16 sps:$4 sm:$0xff]   ;;  %v2323_v38 = vld [vmem:[%s3811_s4 + $0x48] ss:$16 sps:$4 sm:$0xff]  }
 0x47f   :  { %2216 = vtanh.f32 %v1667_v35  ;;  %v1671_v12 = vmul.f32 0.5, %v1664_v59  ;;  %v1676_v9 = vmul.f32 0.5, %v1666_v11  ;;  %v2324_v35 = vld [vmem:[%s3811_s4 + $0x24] ss:$16 sps:$4 sm:$0xff]   ;;  %v2325_v59 = vld [vmem:[%s3811_s4 + $0x2c] ss:$16 sps:$4 sm:$0xff]  }
 0x480   :  { %v1620_v18 = vpop.f32.mrf.mxu0  ;;  %v1661_v52 = vpop.f32.mrf.mxu1  ;;  %v2327_v60 = vld [vmem:[%s3811_s4 + $0x28] ss:$16 sps:$4 sm:$0xff]   ;;  %v2328_v57 = vld [vmem:[%s3811_s4 + $0x4] ss:$16 sps:$4 sm:$0xff]  }
 0x481   :  { %2218 = vtanh.f32 %v1671_v12  ;;  %v2330_v18 = vld [vmem:[%s3811_s4] ss:$16 sps:$4 sm:$0xff]   ;;  %v2331_v52 = vld [vmem:[%s3811_s4 + $0x8] ss:$16 sps:$4 sm:$0xff]  }
 0x482   :  { %2220 = vtanh.f32 %v1665_v62 }
 0x483   :  { %2222 = vtanh.f32 %v1676_v9 }
 0x484   :  { %v2215_v32 = vpop.eup %2214 }
 0x485   :  { %v3677_v25 = vmul.f32 %v2215_v32, %v1565_v55 }
 0x487   :  { %v1571_v12 = vsel %vm1380_vm6, %v3677_v25, %v3503_v63 }
 0x488   :  { %v1775_v62 = vpack.c.bf16 %v1571_v12, %v1571_v12 }
 0x48c   :  { %v2217_v24 = vpop.eup %2216 }
 0x48d   :  { %v1669_v27 = vmul.f32 0.5, %v2217_v24 }
 0x48e   :  { %v2219_v30 = vpop.eup %2218 }
 0x48f   :  { %v1670_v10 = vadd.f32 0.5, %v1669_v27  ;;  %v1673_v20 = vmul.f32 0.5, %v2219_v30  ;;  %v2221_v31 = vpop.eup %2220 }
 0x490   :  { %v2223_v54 = vpop.eup %2222 }
 0x491   :  { %v1674_v14 = vadd.f32 0.5, %v1673_v20  ;;  %v1681_v0 = vmul.f32 %v2221_v31, %v1670_v10  ;;  %v1678_v61 = vmul.f32 0.5, %v2223_v54 }
 0x493   :  { %v1680_v29 = vmul.f32 %v1674_v14, %v3457_v50  ;;  %v1679_v21 = vadd.f32 0.5, %v1678_v61 }
 0x495   :  { %v1682_v19 = vadd.f32 %v1681_v0, %v1680_v29 }
 0x497   :  { %2224 = vtanh.f32 %v1682_v19  ;;  %v1691_v40 = vsel %vm1689_vm7, %v1682_v19, %v3457_v50  ;;  %v2302_v50 = vld [vmem:[%s3811_s4 + $0xe0] ss:$16 sps:$4 sm:$0xff]  }
 0x498   :  { %1883 = vst [vmem:[%s3815_s8] sm:$0xff] %v1691_v40 }
 0x4a4   :  { %v2225_v17 = vpop.eup %2224 }
 0x4a5   :  { %v1684_v41 = vmul.f32 %v2225_v17, %v1679_v21 }
 0x4a7   :  { %v1690_v42 = vsel %vm1689_vm7, %v1684_v41, %v3462_v37  ;;  %v2304_v37 = vld [vmem:[%s3811_s4 + $0xc4] ss:$16 sps:$4 sm:$0xff]  }
 0x4a8   :  { %v1692_v43 = vpack.c.bf16 %v1690_v42, %v1690_v42  ;;  %1882 = vst [vmem:[%s3814_s7] sm:$0xff] %v1690_v42 }
 0x4aa   :  { %1726 = vmatmul.mubr.bf16.vlgmr.msra.gmra.mxu0 %v1692_v43  ;;  %1767 = vmatmul.mubr.bf16.vlgmr.msra.gmra.mxu1 %v1692_v43 }
 0x4ab   :  { %1777 = vmatpush1.bf16.msra.mxu0 %v2302_v50  ;;  %1818 = vmatpush1.bf16.msra.mxu1 %v2303_v45 }
 0x4ac   :  { %1778 = vmatprep.subr.bf16.mxu0 %v2304_v37  ;;  %1819 = vmatprep.subr.bf16.mxu1 %v2305_v15 }
 0x4ad   :  { %1808 = vmatprep.mubr.bf16.mxu0 %v3954_v56  ;;  %1849 = vmatprep.mubr.bf16.mxu1 %v3954_v56  ;;  %v2310_v56 = vld [vmem:[%s3811_s4 + $0xa0] ss:$16 sps:$4 sm:$0xff]  }
 0x4af   :  { %1779 = vmatpush1.bf16.msra.mxu0 %v2306_v46  ;;  %1820 = vmatpush1.bf16.msra.mxu1 %v2307_v48 }
 0x4b0   :  { %1780 = vmatprep.subr.bf16.mxu0 %v2308_v49  ;;  %1821 = vmatprep.subr.bf16.mxu1 %v2309_v51 }
 0x4b3   :  { %1781 = vmatpush1.bf16.msra.mxu0 %v2310_v56  ;;  %1822 = vmatpush1.bf16.msra.mxu1 %v2311_v16 }
 0x4b4   :  { %1782 = vmatprep.subr.bf16.mxu0 %v2312_v47  ;;  %1823 = vmatprep.subr.bf16.mxu1 %v2313_v7 }
 0x4b7   :  { %1783 = vmatpush1.bf16.msra.mxu0 %v2314_v1  ;;  %1824 = vmatpush1.bf16.msra.mxu1 %v2315_v8 }
 0x4b8   :  { %1784 = vmatprep.subr.bf16.mxu0 %v2316_v58  ;;  %1825 = vmatprep.subr.bf16.mxu1 %v2317_v4 }
 0x4bb   :  { %1785 = vmatpush1.bf16.msra.mxu0 %v2318_v5  ;;  %1826 = vmatpush1.bf16.msra.mxu1 %v2319_v34 }
 0x4bc   :  { %1786 = vmatprep.subr.bf16.mxu0 %v2320_v39  ;;  %1827 = vmatprep.subr.bf16.mxu1 %v2321_v36 }
 0x4bf   :  { %1787 = vmatpush1.bf16.msra.mxu0 %v2322_v3  ;;  %1828 = vmatpush1.bf16.msra.mxu1 %v2323_v38 }
 0x4c0   :  { %1788 = vmatprep.subr.bf16.mxu0 %v2324_v35  ;;  %1829 = vmatprep.subr.bf16.mxu1 %v2325_v59 }
 0x4c3   :  { %1789 = vmatpush1.bf16.msra.mxu0 %v2326_v44  ;;  %1830 = vmatpush1.bf16.msra.mxu1 %v2327_v60 }
 0x4c4   :  { %1790 = vmatprep.subr.bf16.mxu0 %v2328_v57  ;;  %1831 = vmatprep.subr.bf16.mxu1 %v2329_v53 }
 0x4c7   :  { %1791 = vmatpush1.bf16.msra.mxu0 %v2330_v18  ;;  %1832 = vmatpush1.bf16.msra.mxu1 %v2331_v52 }
 0x4ca   :  { %1809 = vmatmul.mubr.bf16.vlgmr.msra.gmra.mxu0 %v1775_v62  ;;  %1850 = vmatmul.mubr.bf16.vlgmr.msra.gmra.mxu1 %v1775_v62 }
 0x56a   :  { %v1727_v55 = vpop.f32.mrf.mxu0  ;;  %v1768_v32 = vpop.f32.mrf.mxu1 }
 0x56b   :  { %v1728_v24 = vadd.f32 %v1727_v55, %v4056_v33  ;;  %v1769_v54 = vadd.f32 %v1768_v32, %v3113_v23 }
 0x56c   :  { %v1729_v22 = vpop.f32.mrf.mxu0  ;;  %v1770_v11 = vpop.f32.mrf.mxu1 }
 0x56d   :  { %v1730_v10 = vadd.f32 %v1729_v22, %v4086_v13  ;;  %v1771_v33 = vadd.f32 %v1770_v11, %v3117_v28 }
 0x56e   :  { %v1731_v9 = vpop.f32.mrf.mxu0  ;;  %v1772_v6 = vpop.f32.mrf.mxu1 }
 0x570   :  { %v1732_v63 = vpop.f32.mrf.mxu0  ;;  %v1773_v25 = vpop.f32.mrf.mxu1 }
 0x58a   :  { %v1810_v27 = vpop.f32.mrf.mxu0  ;;  %v1851_v30 = vpop.f32.mrf.mxu1 }
 0x58b   :  { %v1858_v20 = vadd.f32 %v1810_v27, %v1728_v24  ;;  %v1860_v41 = vadd.f32 %v1851_v30, %v1769_v54 }
 0x58c   :  { %v1812_v14 = vpop.f32.mrf.mxu0  ;;  %v1853_v31 = vpop.f32.mrf.mxu1 }
 0x58d   :  { %v1862_v29 = vmul.f32 0.5, %v1858_v20  ;;  %v1859_v0 = vadd.f32 %v1812_v14, %v1730_v10  ;;  %v1861_v42 = vadd.f32 %v1853_v31, %v1771_v33 }
 0x58e   :  { %v1814_v19 = vpop.f32.mrf.mxu0  ;;  %v1855_v40 = vpop.f32.mrf.mxu1 }
 0x58f   :  { %2226 = vtanh.f32 %v1862_v29  ;;  %v1866_v61 = vmul.f32 0.5, %v1859_v0  ;;  %v1871_v13 = vmul.f32 0.5, %v1861_v42 }
 0x590   :  { %v1815_v21 = vpop.f32.mrf.mxu0  ;;  %v1856_v17 = vpop.f32.mrf.mxu1 }
 0x591   :  { %2228 = vtanh.f32 %v1866_v61 }
 0x592   :  { %2230 = vtanh.f32 %v1860_v41 }
 0x593   :  { %2232 = vtanh.f32 %v1871_v13 }
 0x59c   :  { %v2227_v43 = vpop.eup %2226 }
 0x59d   :  { %v1864_v50 = vmul.f32 0.5, %v2227_v43 }
 0x59e   :  { %v2229_v45 = vpop.eup %2228 }
 0x59f   :  { %v1865_v37 = vadd.f32 0.5, %v1864_v50  ;;  %v1868_v15 = vmul.f32 0.5, %v2229_v45  ;;  %v2231_v48 = vpop.eup %2230 }
 0x5a0   :  { %v2233_v56 = vpop.eup %2232 }
 0x5a1   :  { %v1869_v46 = vadd.f32 0.5, %v1868_v15  ;;  %v1876_v49 = vmul.f32 %v2231_v48, %v1865_v37  ;;  %v1873_v16 = vmul.f32 0.5, %v2233_v56 }
 0x5a3   :  { %v1875_v23 = vmul.f32 %v1869_v46, %v3663_v2  ;;  %v1874_v47 = vadd.f32 0.5, %v1873_v16 }
 0x5a5   :  { %v1877_v51 = vadd.f32 %v1876_v49, %v1875_v23 }
 0x5a7   :  { %2234 = vtanh.f32 %v1877_v51  ;;  %v1881_v28 = vsel %vm1689_vm7, %v1877_v51, %v3663_v2 }
 0x5a8   :  { %2007 = vst [vmem:[%s3815_s8 + $0x8] sm:$0xff] %v1881_v28 }
 0x5b4   :  { %v2235_v7 = vpop.eup %2234 }
 0x5b5   :  { %v1879_v1 = vmul.f32 %v2235_v7, %v1874_v47 }
 0x5b7   :  { %v1880_v8 = vsel %vm1689_vm7, %v1879_v1, %v1571_v12 }
 0x5b8   :  { %2006 = vst [vmem:[%s3814_s7 + $0x8] sm:$0xff] %v1880_v8 }
 0x5b9 PF:  {}

</bundles_post_ra>
